<compile_context>
chip_gen: v7x
topology: tpu7x:2x2x1
jax: 0.10.0
libtpu: 0.0.40
codegen_flags: <defaults>
</compile_context>

<pallas_src>
import jax
import jax.numpy as jnp
from jax import lax
from jax.experimental import pallas as pl
from jax.experimental.pallas import tpu as pltpu

EPS = 1e-5


def conv1x1_bn_kernel(x_ref, w_ref, gamma_ref, beta_ref, o_ref):
    # x_ref:     (Cin, M)   all pixels (same block every grid step)
    # w_ref:     (Cb, Cin)  block of output-channel rows of the conv weight
    # gamma_ref: (Cb, 1)    f32
    # beta_ref:  (Cb, 1)    f32
    # o_ref:     (Cb, M)
    x = x_ref[...]                      # bf16 (or f32) MXU operand
    w = w_ref[...]                      # bf16 (or f32) MXU operand
    m = x.shape[1]
    inv_m = 1.0 / m

    # 1x1 conv in NCHW-native orientation: single MXU matmul, f32 accumulate.
    y = jnp.dot(w, x, preferred_element_type=jnp.float32)               # (Cb, M)

    # Per-channel mean via linearity of the conv.  Both reductions are MXU
    # matvecs against a ones-vector (the vmatmul slot is essentially idle),
    # instead of XLU cross-lane reduce trees.
    ones_x = jnp.ones((m, 1), dtype=x.dtype)
    x_rowsum = jnp.dot(x, ones_x, preferred_element_type=jnp.float32)   # (Cin, 1)
    mean = jnp.dot(w.astype(jnp.float32), x_rowsum,
                   preferred_element_type=jnp.float32) * inv_m          # (Cb, 1)

    # Biased variance, numerically-safe subtract-mean form (matches
    # torch.nn.BatchNorm2d training-mode forward normalization).
    diff = y - mean                                                      # (Cb, M)
    ones_f = jnp.ones((m, 1), dtype=jnp.float32)
    var = jnp.dot(diff * diff, ones_f,
                  preferred_element_type=jnp.float32) * inv_m           # (Cb, 1)

    # Fold gamma and inv_std into one per-channel scale; epilogue is mul+add.
    scale = gamma_ref[...] * lax.rsqrt(var + EPS)                        # (Cb, 1)
    o_ref[...] = (diff * scale + beta_ref[...]).astype(o_ref.dtype)


def _num_tensorcores_per_chip():
    """2 for chips with two TensorCores exposed to one device (v7x, v4)."""
    try:
        kind = jax.devices()[0].device_kind.lower()
    except Exception:
        return 1
    if "7x" in kind or "v7" in kind or " v4" in kind or kind.endswith("v4"):
        return 2
    return 1


def conv1x1_bn(x_nchw, weight_oi, gamma, beta, *,
               compute_dtype=jnp.bfloat16, out_dtype=jnp.float32):
    """Training-mode Conv2d(1x1, bias=False) + BatchNorm2d forward.

    x_nchw: (N, Cin, H, W); weight_oi: (Cout, Cin[,1,1]); gamma/beta: (Cout,).
    Returns (N, Cout, H, W) in out_dtype (f32 by default, module semantics).
    """
    n, cin, h, w = x_nchw.shape
    weight_oi = weight_oi.reshape(weight_oi.shape[0], cin)
    cout = weight_oi.shape[0]
    m = n * h * w

    if n == 1:
        # NCHW with N == 1 is already (Cin, H*W): free reshape, no transpose.
        x_mat = x_nchw.reshape(cin, m)
    else:
        # TODO(synk): if the N > 1 path ever becomes hot, fold this transpose
        # into per-n BlockSpec index_maps instead of a wrapper transpose.
        x_mat = jnp.transpose(x_nchw, (1, 0, 2, 3)).reshape(cin, m)

    # bf16 MXU operands, f32 accumulation + f32 BN statistics/epilogue.
    x_mat = x_mat.astype(compute_dtype)
    w_mat = weight_oi.astype(compute_dtype)
    g = gamma.reshape(cout, 1).astype(jnp.float32)
    b = beta.reshape(cout, 1).astype(jnp.float32)

    # Split output channels only when there really are 2 TensorCores; on
    # single-TC chips a 1-step grid avoids paying ~0.35 us/step overhead.
    num_tc = _num_tensorcores_per_chip()
    if num_tc >= 2 and cout % num_tc == 0 and (cout // num_tc) % 8 == 0:
        cout_blocks = num_tc
        semantics_options = ((pltpu.CORE_PARALLEL,), (pltpu.PARALLEL,))
    else:
        cout_blocks = 1
        semantics_options = ((pltpu.ARBITRARY,),)
    cb = cout // cout_blocks

    in_bytes = jnp.dtype(compute_dtype).itemsize
    out_bytes = jnp.dtype(out_dtype).itemsize
    cost = pl.CostEstimate(
        flops=2 * cout * cin * m + 4 * cout * m,
        transcendentals=cout,
        bytes_accessed=(cin * m * in_bytes + cout * cin * in_bytes
                        + 2 * cout * 4 + cout * m * out_bytes),
    )

    def build(semantics):
        return pl.pallas_call(
            conv1x1_bn_kernel,
            out_shape=jax.ShapeDtypeStruct((cout, m), out_dtype),
            grid=(cout_blocks,),
            in_specs=[
                pl.BlockSpec((cin, m), lambda i: (0, 0)),   # x: same block each step
                pl.BlockSpec((cb, cin), lambda i: (i, 0)),  # conv weight rows
                pl.BlockSpec((cb, 1), lambda i: (i, 0)),    # gamma
                pl.BlockSpec((cb, 1), lambda i: (i, 0)),    # beta
            ],
            out_specs=pl.BlockSpec((cb, m), lambda i: (i, 0)),
            compiler_params=pltpu.CompilerParams(dimension_semantics=semantics),
            cost_estimate=cost,
        )

    out_mat = None
    last_err = None
    for sem in semantics_options:
        try:
            out_mat = build(sem)(x_mat, w_mat, g, b)
            out_mat = jax.block_until_ready(out_mat)
            break
        except Exception as e:  # e.g. CORE_PARALLEL unsupported -> PARALLEL
            last_err = e
            out_mat = None
    if out_mat is None:
        raise last_err

    if n == 1:
        return out_mat.reshape(1, cout, h, w)
    return jnp.transpose(out_mat.reshape(cout, n, h, w), (1, 0, 2, 3))


if __name__ == "__main__":
    N, CIN, H, W = 1, 120, 14, 14
    COUT = 720

    key = jax.random.PRNGKey(0)
    kx, kw, kg, kb = jax.random.split(key, 4)

    # Shapes match the PyTorch module:
    #   Conv2d(120, 720, kernel_size=1, bias=False).weight : (720, 120, 1, 1)
    #   BatchNorm2d(720).weight/.bias                       : (720,)
    x = jax.random.normal(kx, (N, CIN, H, W), dtype=jnp.float32)
    conv_w = jax.random.normal(kw, (COUT, CIN, 1, 1), dtype=jnp.float32) * 0.05
    gamma = 1.0 + 0.1 * jax.random.normal(kg, (COUT,), dtype=jnp.float32)
    beta = 0.1 * jax.random.normal(kb, (COUT,), dtype=jnp.float32)

    out = conv1x1_bn(x, conv_w, gamma, beta)
    out = jax.block_until_ready(out)
    assert out.shape == (N, COUT, H, W), out.shape
    assert out.dtype == jnp.float32, out.dtype

    w2d = conv_w.reshape(COUT, CIN)

    # (a) Tight check: pure-JAX reference using the SAME bf16 conv operands
    # with f32 accumulation — verifies the kernel's conv + BN math exactly.
    xb = x.astype(jnp.bfloat16).astype(jnp.float32)
    wb = w2d.astype(jnp.bfloat16).astype(jnp.float32)
    y_b = jnp.einsum("oc,nchw->nohw", wb, xb, precision=lax.Precision.HIGHEST)
    mu_b = jnp.mean(y_b, axis=(0, 2, 3), keepdims=True)
    var_b = jnp.mean((y_b - mu_b) ** 2, axis=(0, 2, 3), keepdims=True)
    ref_b = (y_b - mu_b) * lax.rsqrt(var_b + EPS) * gamma.reshape(1, COUT, 1, 1) \
        + beta.reshape(1, COUT, 1, 1)
    err_b = float(jnp.max(jnp.abs(out - ref_b)))
    assert err_b < 2e-3, err_b

    # (b) Sanity check vs. the full-f32 module forward (bf16 MXU operands
    # perturb numerics slightly; tolerance loosened accordingly).
    y_f = jnp.einsum("oc,nchw->nohw", w2d, x, precision=lax.Precision.HIGHEST)
    mu_f = jnp.mean(y_f, axis=(0, 2, 3), keepdims=True)
    var_f = jnp.mean((y_f - mu_f) ** 2, axis=(0, 2, 3), keepdims=True)
    ref_f = (y_f - mu_f) * lax.rsqrt(var_f + EPS) * gamma.reshape(1, COUT, 1, 1) \
        + beta.reshape(1, COUT, 1, 1)
    err_f = float(jnp.max(jnp.abs(out - ref_f)))
    assert err_f < 5e-2, err_f

    # TODO(synk): running_mean / running_var buffer updates (momentum=0.1,
    # unbiased variance) are not emitted — forward activation only.
    print("KERNEL_OK")
</pallas_src>

<mosaic_0001>
module attributes {stable_mosaic.version = 11 : i64} {
  func.func @conv1x1_bn_kernel(%arg0: i32, %arg1: memref<120x196xbf16, #tpu.memory_space<vmem>>, %arg2: memref<720x120xbf16, #tpu.memory_space<vmem>>, %arg3: memref<720x1xf32, #tpu.memory_space<vmem>>, %arg4: memref<720x1xf32, #tpu.memory_space<vmem>>, %arg5: memref<720x196xf32, #tpu.memory_space<vmem>>) attributes {dimension_semantics = [#tpu.dimension_semantics<arbitrary>], iteration_bounds = array<i64: 1>, scalar_prefetch = 0 : i64, scratch_operands = 0 : i64, tpu.core_type = #tpu.core_type<tc>, window_params = [{pipeline_mode = #tpu.pipeline_mode<synchronous>, transform_indices = @transform_0, window_bounds = array<i64: 120, 196>}, {transform_indices = @transform_1, window_bounds = array<i64: 720, 120>}, {transform_indices = @transform_2, window_bounds = array<i64: 720, 1>}, {transform_indices = @transform_3, window_bounds = array<i64: 720, 1>}, {transform_indices = @transform_4, window_bounds = array<i64: 720, 196>}]} {
    %c0 = arith.constant 0 : index
    %c0_0 = arith.constant 0 : index
    %0 = vector.load %arg1[%c0, %c0_0] : memref<120x196xbf16, #tpu.memory_space<vmem>>, vector<120x196xbf16>
    %c0_1 = arith.constant 0 : index
    %c0_2 = arith.constant 0 : index
    %1 = vector.load %arg2[%c0_1, %c0_2] : memref<720x120xbf16, #tpu.memory_space<vmem>>, vector<720x120xbf16>
    %cst = arith.constant dense<0.000000e+00> : vector<720x196xf32>
    %2 = tpu.matmul %1, %0, %cst {dimension_numbers = #tpu.dot_dimension_numbers<[1], [0], [0], [1], [0, 0, 1, 1], [], []>} : vector<720x120xbf16>, vector<120x196xbf16>, vector<720x196xf32> -> vector<720x196xf32>
    %cst_3 = arith.constant 1.000000e+00 : bf16
    %3 = vector.broadcast %cst_3 : bf16 to vector<196x1xbf16>
    %cst_4 = arith.constant dense<0.000000e+00> : vector<120x1xf32>
    %4 = tpu.matmul %0, %3, %cst_4 {dimension_numbers = #tpu.dot_dimension_numbers<[1], [0], [0], [1], [0, 0, 1, 1], [], []>} : vector<120x196xbf16>, vector<196x1xbf16>, vector<120x1xf32> -> vector<120x1xf32>
    %5 = arith.extf %1 : vector<720x120xbf16> to vector<720x120xf32>
    %cst_5 = arith.constant dense<0.000000e+00> : vector<720x1xf32>
    %6 = tpu.matmul %5, %4, %cst_5 {dimension_numbers = #tpu.dot_dimension_numbers<[1], [0], [0], [1], [0, 0, 1, 1], [], []>} : vector<720x120xf32>, vector<120x1xf32>, vector<720x1xf32> -> vector<720x1xf32>
    %cst_6 = arith.constant 0.00510204071 : f32
    %7 = vector.broadcast %cst_6 : f32 to vector<720x1xf32>
    %8 = arith.mulf %6, %7 : vector<720x1xf32>
    %9 = vector.broadcast %8 : vector<720x1xf32> to vector<720x196xf32>
    %10 = arith.subf %2, %9 : vector<720x196xf32>
    %cst_7 = arith.constant 1.000000e+00 : f32
    %11 = vector.broadcast %cst_7 : f32 to vector<196x1xf32>
    %12 = arith.mulf %10, %10 : vector<720x196xf32>
    %cst_8 = arith.constant dense<0.000000e+00> : vector<720x1xf32>
    %13 = tpu.matmul %12, %11, %cst_8 {dimension_numbers = #tpu.dot_dimension_numbers<[1], [0], [0], [1], [0, 0, 1, 1], [], []>} : vector<720x196xf32>, vector<196x1xf32>, vector<720x1xf32> -> vector<720x1xf32>
    %cst_9 = arith.constant 0.00510204071 : f32
    %14 = vector.broadcast %cst_9 : f32 to vector<720x1xf32>
    %15 = arith.mulf %13, %14 : vector<720x1xf32>
    %c0_10 = arith.constant 0 : index
    %c0_11 = arith.constant 0 : index
    %16 = vector.load %arg3[%c0_10, %c0_11] : memref<720x1xf32, #tpu.memory_space<vmem>>, vector<720x1xf32>
    %cst_12 = arith.constant 9.99999974E-6 : f32
    %17 = vector.broadcast %cst_12 : f32 to vector<720x1xf32>
    %18 = arith.addf %15, %17 : vector<720x1xf32>
    %19 = math.rsqrt %18 : vector<720x1xf32>
    %20 = arith.mulf %16, %19 : vector<720x1xf32>
    %21 = vector.broadcast %20 : vector<720x1xf32> to vector<720x196xf32>
    %22 = arith.mulf %10, %21 : vector<720x196xf32>
    %c0_13 = arith.constant 0 : index
    %c0_14 = arith.constant 0 : index
    %23 = vector.load %arg4[%c0_13, %c0_14] : memref<720x1xf32, #tpu.memory_space<vmem>>, vector<720x1xf32>
    %24 = vector.broadcast %23 : vector<720x1xf32> to vector<720x196xf32>
    %25 = arith.addf %22, %24 : vector<720x196xf32>
    %c0_15 = arith.constant 0 : index
    %c0_16 = arith.constant 0 : index
    %26 = vector.load %arg5[%c0_15, %c0_16] : memref<720x196xf32, #tpu.memory_space<vmem>>, vector<720x196xf32>
    tpu.vector_store %arg5[%c0_15, %c0_16], %25 {strides = array<i32>} : memref<720x196xf32, #tpu.memory_space<vmem>>, vector<720x196xf32>,
    return
  }
  func.func @transform_0(%arg0: i32) -> (i32, i32) {
    %c0_i32 = arith.constant 0 : i32
    %c0_i32_0 = arith.constant 0 : i32
    %c0_i32_1 = arith.constant 0 : i32
    return %c0_i32, %c0_i32_0 : i32, i32
  }
  func.func @transform_1(%arg0: i32) -> (i32, i32) {
    %c0_i32 = arith.constant 0 : i32
    %c0_i32_0 = arith.constant 0 : i32
    return %arg0, %c0_i32 : i32, i32
  }
  func.func @transform_2(%arg0: i32) -> (i32, i32) {
    %c0_i32 = arith.constant 0 : i32
    %c0_i32_0 = arith.constant 0 : i32
    return %arg0, %c0_i32 : i32, i32
  }
  func.func @transform_3(%arg0: i32) -> (i32, i32) {
    %c0_i32 = arith.constant 0 : i32
    %c0_i32_0 = arith.constant 0 : i32
    return %arg0, %c0_i32 : i32, i32
  }
  func.func @transform_4(%arg0: i32) -> (i32, i32) {
    %c0_i32 = arith.constant 0 : i32
    %c0_i32_0 = arith.constant 0 : i32
    return %arg0, %c0_i32 : i32, i32
  }
}

</mosaic_0001>

<bundles_post_ra>
// kernel: tpu_custom_call.1
= control target key start
LH: loop header
LB: loop body
LE: loop exit
PB: predicated region body
PF: predicated region fallthrough
CT: control target
= control target key end

     0   :  { %v6667_v0 = vmov 0   ;;  %vm1051_vm0 = vcmask 556032   ;;  %v6668_v1 = vmov 1065369472   ;;  %vm1075_vm1 = vcmask 1041408   ;;  %s10671_s0 = inlined_call_operand.vmem [shape: bf16[120,196], index: 0, kind: input, shape index: {}]   ;;  %s10672_s1 = inlined_call_operand.vmem [shape: bf16[720,120], index: 1, kind: input, shape index: {}]   ;;  %s10673_s3 = inlined_call_operand.vmem [shape: f32[720,1], index: 3, kind: input, shape index: {}]   ;;  %s10674_s2 = inlined_call_operand.vmem [shape: f32[720,1], index: 2, kind: input, shape index: {}]   ;;  %s10675_s4 = inlined_call_operand.vmem [shape: f32[720,196], index: 4, kind: output, shape index: {}]  }
   0x1   :  { %1079 = vmatprep.subr.bf16.mxu1 %v6667_v0  ;;  %599 = vmatprep.mubr.bf16.mxu0 %v6667_v0  ;;  %v6376_v2 = vld [vmem:[%s10671_s0 + $0x4] ss:$8 sps:$4 sm:$0xff]   ;;  %v6374_v3 = vld [vmem:[%s10671_s0] ss:$8 sps:$4 sm:$0xff]   ;;  %v6377_v4 = vld [vmem:[%s10671_s0 + $0x14] ss:$8 sps:$4 sm:$0xff]  }
   0x2   :  { %1080 = vmatpush1.bf16.msra.mxu1 %v6668_v1  ;;  %6372 = vset.pattern.permute.xlu0 %v6667_v0  ;;  %v6379_v5 = vld [vmem:[%s10671_s0 + $0x10] ss:$8 sps:$4 sm:$0xff]   ;;  %v6380_v6 = vld [vmem:[%s10671_s0 + $0x24] ss:$8 sps:$4 sm:$0xff]   ;;  %v6382_v7 = vld [vmem:[%s10671_s0 + $0x20] ss:$8 sps:$4 sm:$0xff]  }
   0x3   :  { %1081 = vmatprep.subr.bf16.mxu1 %v6667_v0  ;;  %6373 = vset.pattern.permute.xlu1 %v6667_v0  ;;  %v6383_v8 = vld [vmem:[%s10671_s0 + $0x34] ss:$8 sps:$4 sm:$0xff]   ;;  %v6385_v9 = vld [vmem:[%s10671_s0 + $0x30] ss:$8 sps:$4 sm:$0xff]   ;;  %v6386_v10 = vld [vmem:[%s10671_s0 + $0x44] ss:$8 sps:$4 sm:$0xff]  }
   0x4   :  { %5829 = vmatprep.mubr.msk.bf16.mxu1 %vm1051_vm0, %v6376_v2  ;;  %567 = vmatprep.subr.bf16.mxu0 %v6376_v2  ;;  %v6388_v11 = vld [vmem:[%s10671_s0 + $0x40] ss:$8 sps:$4 sm:$0xff]   ;;  %v6389_v12 = vld [vmem:[%s10671_s0 + $0x54] ss:$8 sps:$4 sm:$0xff]   ;;  %v6391_v13 = vld [vmem:[%s10671_s0 + $0x50] ss:$8 sps:$4 sm:$0xff]  }
   0x5   :  { %568 = vmatpush1.bf16.msra.mxu0 %v6374_v3  ;;  %v6392_v14 = vld [vmem:[%s10671_s0 + $0x64] ss:$8 sps:$4 sm:$0xff]   ;;  %v6394_v15 = vld [vmem:[%s10671_s0 + $0x60] ss:$8 sps:$4 sm:$0xff]   ;;  %v1077_v16 = vsel %vm1075_vm1, 1065369472, %v6667_v0 }
   0x6   :  { %1082 = vmatpush1.bf16.msra.mxu1 %v6668_v1  ;;  %569 = vmatprep.subr.bf16.mxu0 %v6377_v4  ;;  %v33_v17 = vld [vmem:[%s10671_s0 + $0x70] sm:$0xff]  ;;  %vm560_vm2 = vcmask 1043456   ;;  %v6773_v21 = vld [vmem:[%s10672_s1] sm:$0xff]   ;;  %vm424_vm3 = vcmask 982016   ;;  %v6781_v22 = vld [vmem:[%s10672_s1 + $0x8] sm:$0xff]   ;;  %v6669_v44 = vmov 0.0|0.0  }
   0x7   :  { %1083 = vmatprep.subr.bf16.mxu1 %v6667_v0  ;;  %v5782_v18 = vcombine.high %v33_v17, %v33_v17  ;;  %v5781_v19 = vcombine.low %v33_v17, %v33_v17  ;;  %v1175_v23 = vunpack.c.l.bf16 %v6773_v21  ;;  %v6791_v24 = vld [vmem:[%s10672_s1 + $0x10] sm:$0xff]   ;;  %v6799_v25 = vld [vmem:[%s10672_s1 + $0x18] sm:$0xff]   ;;  %v6807_v26 = vld [vmem:[%s10672_s1 + $0x20] sm:$0xff]   ;;  %v6670_v45 = vmov 1.0|1.0  }
   0x8   :  { %v6815_v27 = vld [vmem:[%s10672_s1 + $0x28] sm:$0xff]   ;;  %v6823_v28 = vld [vmem:[%s10672_s1 + $0x30] sm:$0xff]   ;;  %v6831_v29 = vld [vmem:[%s10672_s1 + $0x38] sm:$0xff]  }
   0x9   :  { %570 = vmatpush1.bf16.msra.mxu0 %v6379_v5  ;;  %v562_v20 = vsel %vm560_vm2, %v5781_v19, 0  ;;  %v6839_v30 = vld [vmem:[%s10672_s1 + $0x40] sm:$0xff]   ;;  %v6847_v31 = vld [vmem:[%s10672_s1 + $0x48] sm:$0xff]   ;;  %v6855_v32 = vld [vmem:[%s10672_s1 + $0x50] sm:$0xff]  }
   0xa   :  { %1084 = vmatpush1.bf16.msra.mxu1 %v6668_v1  ;;  %571 = vmatprep.subr.bf16.mxu0 %v6380_v6  ;;  %v6863_v38 = vld [vmem:[%s10672_s1 + $0x58] sm:$0xff]   ;;  %v6873_v46 = vld [vmem:[%s10672_s1 + $0x60] sm:$0xff]   ;;  %v6885_v52 = vld [vmem:[%s10672_s1 + $0x68] sm:$0xff]  }
   0xb   :  { %1085 = vmatprep.subr.bf16.mxu1 %v6667_v0  ;;  %v6897_v58 = vld [vmem:[%s10672_s1 + $0x70] sm:$0xff]  }
   0xd   :  { %572 = vmatpush1.bf16.msra.mxu0 %v6382_v7 }
   0xe   :  { %1086 = vmatpush1.bf16.msra.mxu1 %v6668_v1  ;;  %573 = vmatprep.subr.bf16.mxu0 %v6383_v8 }
   0xf   :  { %1087 = vmatprep.subr.bf16.mxu1 %v6667_v0 }
  0x11   :  { %574 = vmatpush1.bf16.msra.mxu0 %v6385_v9 }
  0x12   :  { %1088 = vmatpush1.bf16.msra.mxu1 %v6668_v1  ;;  %575 = vmatprep.subr.bf16.mxu0 %v6386_v10 }
  0x13   :  { %1089 = vmatprep.subr.bf16.mxu1 %v6667_v0 }
  0x15   :  { %576 = vmatpush1.bf16.msra.mxu0 %v6388_v11 }
  0x16   :  { %1090 = vmatpush1.bf16.msra.mxu1 %v6668_v1  ;;  %577 = vmatprep.subr.bf16.mxu0 %v6389_v12 }
  0x17   :  { %1091 = vmatprep.subr.bf16.mxu1 %v6667_v0 }
  0x19   :  { %578 = vmatpush1.bf16.msra.mxu0 %v6391_v13 }
  0x1a   :  { %1092 = vmatpush1.bf16.msra.mxu1 %v6668_v1  ;;  %579 = vmatprep.subr.bf16.mxu0 %v6392_v14 }
  0x1b   :  { %1093 = vmatprep.subr.bf16.mxu1 %v6667_v0 }
  0x1d   :  { %580 = vmatpush1.bf16.msra.mxu0 %v6394_v15 }
  0x1e   :  { %1094 = vmatpush1.bf16.msra.mxu1 %v6668_v1  ;;  %5783 = vmatprep.subr.msk.bf16.mxu0 %vm560_vm2, %v5782_v18 }
  0x1f   :  { %1095 = vmatprep.subr.bf16.mxu1 %v6667_v0 }
  0x21   :  { %582 = vmatpush1.bf16.msra.mxu0 %v562_v20  ;;  %v1178_v20 = vunpack.c.h.bf16 %v6781_v22 }
  0x22   :  { %1096 = vmatpush1.bf16.msra.mxu1 %v6668_v1  ;;  %6316 = vmatprep.subr.bf16.mxu0 %v6669_v44 }
  0x23   :  { %1097 = vmatprep.subr.bf16.mxu1 %v6667_v0 }
  0x24   :  { %5784 = vmatmul.mubr.msk.bf16.vlgmr.msra.gmra.mrb[0].mxu0 %vm424_vm3, %v6773_v21 }
  0x25   :  { %609 = vmatprep.mubr.bf16.mxu0 %v6667_v0  ;;  %6317 = vmatpush1.bf16.msra.mxu0 %v6670_v45 }
  0x26   :  { %1098 = vmatpush1.bf16.msra.mxu1 %v6668_v1  ;;  %6318 = vmatprep.subr.bf16.mxu0 %v6669_v44 }
  0x27   :  { %1099 = vmatprep.subr.bf16.mxu1 %v6667_v0 }
  0x29   :  { %6319 = vmatpush1.bf16.msra.mxu0 %v6670_v45 }
  0x2a   :  { %1100 = vmatpush1.bf16.msra.mxu1 %v6668_v1  ;;  %6320 = vmatprep.subr.bf16.mxu0 %v6669_v44 }
  0x2b   :  { %1101 = vmatprep.subr.bf16.mxu1 %v6667_v0 }
  0x2c   :  { %5785 = vmatmul.mubr.msk.bf16.gmra.mrb[4].mxu0 %vm424_vm3, %v6781_v22 }
  0x2d   :  { %619 = vmatprep.mubr.bf16.mxu0 %v6667_v0  ;;  %6321 = vmatpush1.bf16.msra.mxu0 %v6670_v45 }
  0x2e   :  { %1102 = vmatpush1.bf16.msra.mxu1 %v6668_v1  ;;  %6322 = vmatprep.subr.bf16.mxu0 %v6669_v44  ;;  %v6909_v1 = vld [vmem:[%s10672_s1 + $0x78] sm:$0xff]  }
  0x2f   :  { %1103 = vmatprep.subr.bf16.mxu1 %v6667_v0 }
  0x31   :  { %6323 = vmatpush1.bf16.msra.mxu0 %v6670_v45 }
  0x32   :  { %1104 = vmatpush1.bf16.msra.mxu1 %v1077_v16  ;;  %6324 = vmatprep.subr.bf16.mxu0 %v6669_v44  ;;  %v1177_v16 = vunpack.c.l.bf16 %v6781_v22  ;;  %v1180_v22 = vunpack.c.h.bf16 %v6791_v24 }
  0x34   :  { %5786 = vmatmul.mubr.msk.bf16.gmra.mrb[8].mxu0 %vm424_vm3, %v6791_v24 }
  0x35   :  { %1112 = vmatmul.mubr.bf16.vlgmr.msra.gmra.mrb[0].mxu1 %v6374_v3  ;;  %629 = vmatprep.mubr.bf16.mxu0 %v6667_v0 }
  0x36   :  { %5830 = vmatprep.mubr.msk.bf16.mxu1 %vm1051_vm0, %v6377_v4  ;;  %6325 = vmatpush1.bf16.msra.mxu0 %v6670_v45 }
  0x37   :  { %6326 = vmatprep.subr.bf16.mxu0 %v6669_v44 }
  0x3a   :  { %6327 = vmatpush1.bf16.msra.mxu0 %v6670_v45 }
  0x3b   :  { %6328 = vmatprep.subr.bf16.mxu0 %v6669_v44 }
  0x3c   :  { %5787 = vmatmul.mubr.msk.bf16.gmra.mrb[12].mxu0 %vm424_vm3, %v6799_v25 }
  0x3d   :  { %1120 = vmatmul.mubr.bf16.gmra.mrb[4].mxu1 %v6379_v5  ;;  %639 = vmatprep.mubr.bf16.mxu0 %v6667_v0 }
  0x3e   :  { %5831 = vmatprep.mubr.msk.bf16.mxu1 %vm1051_vm0, %v6380_v6  ;;  %6329 = vmatpush1.bf16.msra.mxu0 %v6670_v45 }
  0x3f   :  { %6330 = vmatprep.subr.bf16.mxu0 %v6669_v44 }
  0x42   :  { %6331 = vmatpush1.bf16.msra.mxu0 %v6670_v45 }
  0x43   :  { %6332 = vmatprep.subr.bf16.mxu0 %v6669_v44 }
  0x44   :  { %5788 = vmatmul.mubr.msk.bf16.gmra.mrb[16].mxu0 %vm424_vm3, %v6807_v26 }
  0x45   :  { %1128 = vmatmul.mubr.bf16.gmra.mrb[8].mxu1 %v6382_v7  ;;  %649 = vmatprep.mubr.bf16.mxu0 %v6667_v0  ;;  %v6921_v7 = vld [vmem:[%s10672_s1 + $0x80] sm:$0xff]  }
  0x46   :  { %5832 = vmatprep.mubr.msk.bf16.mxu1 %vm1051_vm0, %v6383_v8  ;;  %6333 = vmatpush1.bf16.msra.mxu0 %v6670_v45 }
  0x47   :  { %6334 = vmatprep.subr.bf16.mxu0 %v6669_v44 }
  0x4a   :  { %6335 = vmatpush1.bf16.msra.mxu0 %v6670_v45 }
  0x4b   :  { %6336 = vmatprep.subr.bf16.mxu0 %v6669_v44 }
  0x4c   :  { %5789 = vmatmul.mubr.msk.bf16.gmra.mrb[20].mxu0 %vm424_vm3, %v6815_v27 }
  0x4d   :  { %1136 = vmatmul.mubr.bf16.gmra.mrb[12].mxu1 %v6385_v9  ;;  %659 = vmatprep.mubr.bf16.mxu0 %v6667_v0 }
  0x4e   :  { %5833 = vmatprep.mubr.msk.bf16.mxu1 %vm1051_vm0, %v6386_v10  ;;  %6337 = vmatpush1.bf16.msra.mxu0 %v6670_v45 }
  0x4f   :  { %6338 = vmatprep.subr.bf16.mxu0 %v6669_v44 }
  0x52   :  { %6339 = vmatpush1.bf16.msra.mxu0 %v6670_v45 }
  0x54   :  { %5790 = vmatmul.mubr.msk.bf16.gmra.mrb[24].mxu0 %vm424_vm3, %v6823_v28 }
  0x55   :  { %1144 = vmatmul.mubr.bf16.gmra.mrb[16].mxu1 %v6388_v11  ;;  %669 = vmatprep.mubr.bf16.mxu0 %v6667_v0 }
  0x56   :  { %5834 = vmatprep.mubr.msk.bf16.mxu1 %vm1051_vm0, %v6389_v12 }
  0x5c   :  { %5791 = vmatmul.mubr.msk.bf16.gmra.mrb[28].mxu0 %vm424_vm3, %v6831_v29 }
  0x5d   :  { %1152 = vmatmul.mubr.bf16.gmra.mrb[20].mxu1 %v6391_v13  ;;  %679 = vmatprep.mubr.bf16.mxu0 %v6667_v0  ;;  %v6933_v13 = vld [vmem:[%s10672_s1 + $0x88] sm:$0xff]  }
  0x5e   :  { %5835 = vmatprep.mubr.msk.bf16.mxu1 %vm1051_vm0, %v6392_v14  ;;  %v1176_v14 = vunpack.c.h.bf16 %v6773_v21  ;;  %v1179_v21 = vunpack.c.l.bf16 %v6791_v24  ;;  %v1183_v24 = vunpack.c.l.bf16 %v6807_v26 }
  0x64   :  { %5792 = vmatmul.mubr.msk.bf16.gmra.mrb[32].mxu0 %vm424_vm3, %v6839_v30 }
  0x65   :  { %1160 = vmatmul.mubr.bf16.gmra.mrb[24].mxu1 %v6394_v15  ;;  %689 = vmatprep.mubr.bf16.mxu0 %v6667_v0 }
  0x66   :  { %5836 = vmatprep.mubr.msk.bf16.mxu1 %vm1051_vm0, %v5782_v18 }
  0x6c   :  { %5793 = vmatmul.mubr.msk.bf16.gmra.mrb[36].mxu0 %vm424_vm3, %v6847_v31 }
  0x6d   :  { %1168 = vmatmul.mubr.bf16.gmra.mrb[28].mxu1 %v5781_v19  ;;  %699 = vmatprep.mubr.bf16.mxu0 %v6667_v0 }
  0x6e   :  { %6153 = vmatprep.mubr.msk.f32.mxu1 %vm424_vm3, %v1175_v23  ;;  %v6950_v23 = vld [vmem:[%s10672_s1 + $0x90] sm:$0xff]  }
  0x74   :  { %5794 = vmatmul.mubr.msk.bf16.gmra.mrb[40].mxu0 %vm424_vm3, %v6855_v32 }
  0x75   :  { %709 = vmatprep.mubr.bf16.mxu0 %v6667_v0 }
  0x7c   :  { %5795 = vmatmul.mubr.msk.bf16.gmra.mrb[44].mxu0 %vm424_vm3, %v6863_v38 }
  0x7d   :  { %719 = vmatprep.mubr.bf16.mxu0 %v6667_v0 }
  0x84   :  { %5796 = vmatmul.mubr.msk.bf16.gmra.mrb[48].mxu0 %vm424_vm3, %v6873_v46 }
  0x85   :  { %729 = vmatprep.mubr.bf16.mxu0 %v6667_v0 }
  0x8c   :  { %5797 = vmatmul.mubr.msk.bf16.gmra.mrb[52].mxu0 %vm424_vm3, %v6885_v52 }
  0x8d   :  { %739 = vmatprep.mubr.bf16.mxu0 %v6667_v0 }
  0x94   :  { %5798 = vmatmul.mubr.msk.bf16.gmra.mrb[56].mxu0 %vm424_vm3, %v6897_v58 }
  0x95   :  { %749 = vmatprep.mubr.bf16.mxu0 %v6667_v0 }
  0x9c   :  { %5799 = vmatmul.mubr.msk.bf16.gmra.mrb[60].mxu0 %vm424_vm3, %v6909_v1 }
  0x9d   :  { %759 = vmatprep.mubr.bf16.mxu0 %v6667_v0 }
  0xa4   :  { %5800 = vmatmul.mubr.msk.bf16.gmra.mrb[64].mxu0 %vm424_vm3, %v6921_v7 }
  0xa5   :  { %769 = vmatprep.mubr.bf16.mxu0 %v6667_v0 }
  0xac   :  { %5801 = vmatmul.mubr.msk.bf16.gmra.mrb[68].mxu0 %vm424_vm3, %v6933_v13 }
  0xad   :  { %779 = vmatprep.mubr.bf16.mxu0 %v6667_v0 }
  0xb4   :  { %5802 = vmatmul.mubr.msk.bf16.gmra.mrb[72].mxu0 %vm424_vm3, %v6950_v23 }
  0xb5   :  { %789 = vmatprep.mubr.bf16.mxu0 %v6667_v0 }
 0x108   :  { %v1113_v33 = vpop.f32.mrb[0].mxu1 }
 0x109   :  { %v1115_v34 = vpop.f32.mrb[1].mxu1 }
 0x10a   :  { %v1116_v35 = vpop.f32.mrb[2].mxu1  ;;  %v1182_v34 = vunpack.c.h.bf16 %v6799_v25 }
 0x10b   :  { %v6288_v36 = vpack.c.bf16 %v1116_v35, %v1113_v33  ;;  %v1118_v37 = vpop.f32.mrb[3].mxu1  ;;  %v1181_v33 = vunpack.c.l.bf16 %v6799_v25  ;;  %v6970_v35 = vld [vmem:[%s10672_s1 + $0x98] sm:$0xff]   ;;  %v1185_v25 = vunpack.c.l.bf16 %v6815_v27 }
 0x10c   :  { %5803 = vmatmul.mubr.msk.bf16.gmra.mrb[76].mxu0 %vm424_vm3, %v6970_v35  ;;  %v1186_v37 = vunpack.c.h.bf16 %v6815_v27  ;;  %v1189_v27 = vunpack.c.l.bf16 %v6831_v29 }
 0x10d   :  { %6289 = vmatprep.subr.bf16.mxu1 %v6288_v36  ;;  %799 = vmatprep.mubr.bf16.mxu0 %v6667_v0 }
 0x10e   :  { %6291 = vmatpush3.bf16.msra.mxu1 %v6288_v36  ;;  %v1184_v36 = vunpack.c.h.bf16 %v6807_v26  ;;  %v1187_v26 = vunpack.c.l.bf16 %v6823_v28 }
 0x110   :  { %v1121_v39 = vpop.f32.mrb[4].mxu1 }
 0x111   :  { %v1123_v40 = vpop.f32.mrb[5].mxu1 }
 0x112   :  { %v1124_v41 = vpop.f32.mrb[6].mxu1  ;;  %v1188_v40 = vunpack.c.h.bf16 %v6823_v28  ;;  %v1191_v28 = vunpack.c.l.bf16 %v6839_v30 }
 0x113   :  { %v6292_v42 = vpack.c.bf16 %v1124_v41, %v1121_v39  ;;  %v1126_v43 = vpop.f32.mrb[7].mxu1  ;;  %v6990_v39 = vld [vmem:[%s10672_s1 + $0xa0] sm:$0xff]   ;;  %v1190_v41 = vunpack.c.h.bf16 %v6831_v29  ;;  %v1193_v29 = vunpack.c.l.bf16 %v6847_v31 }
 0x114   :  { %5804 = vmatmul.mubr.msk.bf16.gmra.mrb[80].mxu0 %vm424_vm3, %v6990_v39  ;;  %v1192_v43 = vunpack.c.h.bf16 %v6839_v30  ;;  %v1195_v30 = vunpack.c.l.bf16 %v6855_v32 }
 0x115   :  { %6293 = vmatprep.subr.bf16.mxu1 %v6292_v42  ;;  %809 = vmatprep.mubr.bf16.mxu0 %v6667_v0 }
 0x116   :  { %6295 = vmatpush3.bf16.msra.mxu1 %v6292_v42  ;;  %v7010_v42 = vld [vmem:[%s10672_s1 + $0xa8] sm:$0xff]  }
 0x118   :  { %v1129_v47 = vpop.f32.mrb[8].mxu1 }
 0x119   :  { %v1131_v48 = vpop.f32.mrb[9].mxu1 }
 0x11a   :  { %v1132_v49 = vpop.f32.mrb[10].mxu1  ;;  %v7030_v48 = vld [vmem:[%s10672_s1 + $0xb0] sm:$0xff]  }
 0x11b   :  { %v6296_v50 = vpack.c.bf16 %v1132_v49, %v1129_v47  ;;  %v1134_v51 = vpop.f32.mrb[11].mxu1  ;;  %v1194_v47 = vunpack.c.h.bf16 %v6847_v31  ;;  %v1196_v49 = vunpack.c.h.bf16 %v6855_v32  ;;  %v1197_v31 = vunpack.c.l.bf16 %v6863_v38 }
 0x11c   :  { %5805 = vmatmul.mubr.msk.bf16.gmra.mrb[84].mxu0 %vm424_vm3, %v7010_v42  ;;  %v1199_v32 = vunpack.c.l.bf16 %v6873_v46  ;;  %v7050_v51 = vld [vmem:[%s10672_s1 + $0xb8] sm:$0xff]  }
 0x11d   :  { %6297 = vmatprep.subr.bf16.mxu1 %v6296_v50  ;;  %819 = vmatprep.mubr.bf16.mxu0 %v6667_v0 }
 0x11e   :  { %6299 = vmatpush3.bf16.msra.mxu1 %v6296_v50  ;;  %v1198_v50 = vunpack.c.h.bf16 %v6863_v38  ;;  %v1201_v38 = vunpack.c.l.bf16 %v6885_v52 }
 0x120   :  { %v1137_v53 = vpop.f32.mrb[12].mxu1 }
 0x121   :  { %v1139_v54 = vpop.f32.mrb[13].mxu1 }
 0x122   :  { %v1140_v55 = vpop.f32.mrb[14].mxu1  ;;  %v1202_v54 = vunpack.c.h.bf16 %v6885_v52  ;;  %v1206_v52 = vunpack.c.h.bf16 %v6909_v1 }
 0x123   :  { %v6300_v56 = vpack.c.bf16 %v1140_v55, %v1137_v53  ;;  %v1142_v57 = vpop.f32.mrb[15].mxu1  ;;  %v1200_v53 = vunpack.c.h.bf16 %v6873_v46  ;;  %v82_v46 = vld [vmem:[%s10672_s1 + $0xc0] sm:$0xff]   ;;  %v1205_v55 = vunpack.c.l.bf16 %v6909_v1  ;;  %v1213_v1 = vunpack.c.l.bf16 %v6970_v35 }
 0x124   :  { %5806 = vmatmul.mubr.msk.bf16.gmra.mrb[88].mxu0 %vm424_vm3, %v7030_v48  ;;  %v84_v57 = vld [vmem:[%s10672_s1 + $0xc8] sm:$0xff]  }
 0x125   :  { %6301 = vmatprep.subr.bf16.mxu1 %v6300_v56  ;;  %829 = vmatprep.mubr.bf16.mxu0 %v6667_v0 }
 0x126   :  { %6303 = vmatpush3.bf16.msra.mxu1 %v6300_v56  ;;  %v1207_v56 = vunpack.c.l.bf16 %v6921_v7 }
 0x128   :  { %v1145_v59 = vpop.f32.mrb[16].mxu1 }
 0x129   :  { %v1147_v60 = vpop.f32.mrb[17].mxu1 }
 0x12a   :  { %v1148_v61 = vpop.f32.mrb[18].mxu1  ;;  %v1210_v60 = vunpack.c.h.bf16 %v6933_v13 }
 0x12b   :  { %v6304_v62 = vpack.c.bf16 %v1148_v61, %v1145_v59  ;;  %v1150_v63 = vpop.f32.mrb[19].mxu1  ;;  %v1209_v59 = vunpack.c.l.bf16 %v6933_v13  ;;  %v1211_v61 = vunpack.c.l.bf16 %v6950_v23  ;;  %v1223_v13 = vunpack.c.l.bf16 %v82_v46 }
 0x12c   :  { %5807 = vmatmul.mubr.msk.bf16.gmra.mrb[92].mxu0 %vm424_vm3, %v7050_v51  ;;  %v1212_v63 = vunpack.c.h.bf16 %v6950_v23 }
 0x12d   :  { %6305 = vmatprep.subr.bf16.mxu1 %v6304_v62  ;;  %839 = vmatprep.mubr.bf16.mxu0 %v6667_v0 }
 0x12e   :  { %6307 = vmatpush3.bf16.msra.mxu1 %v6304_v62  ;;  %v86_v62 = vld [vmem:[%s10672_s1 + $0xd0] sm:$0xff]  }
 0x130   :  { %v1153_v2 = vpop.f32.mrb[20].mxu1 }
 0x131   :  { %v1155_v3 = vpop.f32.mrb[21].mxu1 }
 0x132   :  { %v1156_v4 = vpop.f32.mrb[22].mxu1  ;;  %v1215_v3 = vunpack.c.l.bf16 %v6990_v39 }
 0x133   :  { %v6308_v5 = vpack.c.bf16 %v1156_v4, %v1153_v2  ;;  %v1158_v6 = vpop.f32.mrb[23].mxu1  ;;  %v1214_v2 = vunpack.c.h.bf16 %v6970_v35  ;;  %v88_v4 = vld [vmem:[%s10672_s1 + $0xd8] sm:$0xff]  }
 0x134   :  { %5808 = vmatmul.mubr.msk.bf16.gmra.mrb[96].mxu0 %vm424_vm3, %v82_v46  ;;  %v1217_v6 = vunpack.c.l.bf16 %v7010_v42  ;;  %v1230_v23 = vunpack.c.h.bf16 %v88_v4 }
 0x135   :  { %6309 = vmatprep.subr.bf16.mxu1 %v6308_v5  ;;  %849 = vmatprep.mubr.bf16.mxu0 %v6667_v0 }
 0x136   :  { %6311 = vmatpush3.bf16.msra.mxu1 %v6308_v5  ;;  %v1216_v5 = vunpack.c.h.bf16 %v6990_v39 }
 0x138   :  { %v1161_v8 = vpop.f32.mrb[24].mxu1 }
 0x139   :  { %v1163_v9 = vpop.f32.mrb[25].mxu1 }
 0x13a   :  { %v1164_v10 = vpop.f32.mrb[26].mxu1  ;;  %v1220_v9 = vunpack.c.h.bf16 %v7030_v48 }
 0x13b   :  { %v6312_v11 = vpack.c.bf16 %v1164_v10, %v1161_v8  ;;  %v1166_v12 = vpop.f32.mrb[27].mxu1  ;;  %v1219_v8 = vunpack.c.l.bf16 %v7030_v48  ;;  %v90_v10 = vld [vmem:[%s10672_s1 + $0xe0] sm:$0xff]  }
 0x13c   :  { %5809 = vmatmul.mubr.msk.bf16.gmra.mrb[100].mxu0 %vm424_vm3, %v84_v57  ;;  %v1222_v12 = vunpack.c.h.bf16 %v7050_v51 }
 0x13d   :  { %6313 = vmatprep.subr.bf16.mxu1 %v6312_v11  ;;  %859 = vmatprep.mubr.bf16.mxu0 %v6667_v0 }
 0x13e   :  { %6315 = vmatpush3.bf16.msra.mxu1 %v6312_v11  ;;  %v1221_v11 = vunpack.c.l.bf16 %v7050_v51 }
 0x140   :  { %v1169_v15 = vpop.f32.mrb[28].mxu1 }
 0x141   :  { %6151 = vmatprep.subr.mxu1 %v1169_v15  ;;  %v1171_v17 = vpop.f32.mrb[29].mxu1 }
 0x142   :  { %6152 = vmatpush3.msra.mxu1 %v1169_v15  ;;  %v1172_v18 = vpop.f32.mrb[30].mxu1  ;;  %v92_v15 = vld [vmem:[%s10672_s1 + $0xe8] sm:$0xff]   ;;  %v1226_v17 = vunpack.c.h.bf16 %v84_v57 }
 0x143   :  { %6154 = vmatmul.mubr.msk.f32.vlgmr.msra.gmra.mrb[32].mxu1 %vm424_vm3, %v1176_v14  ;;  %v1173_v19 = vpop.f32.mrb[31].mxu1  ;;  %6340 = vmatprep.subr.bf16.mxu1 %v6669_v44  ;;  %v1224_v14 = vunpack.c.h.bf16 %v82_v46  ;;  %v1227_v18 = vunpack.c.l.bf16 %v86_v62  ;;  %v1234_v35 = vunpack.c.h.bf16 %v92_v15  ;;  %v7202_v46 = vpop.f32.mrb[0].mxu0 }
 0x144   :  { %6156 = vmatprep.mubr.msk.f32.mxu1 %vm424_vm3, %v1177_v16  ;;  %6353 = vmatpush1.bf16.msra.mxu1 %v6670_v45  ;;  %v1225_v16 = vunpack.c.l.bf16 %v84_v57  ;;  %v1228_v19 = vunpack.c.h.bf16 %v86_v62 }
 0x145   :  { %6341 = vmatprep.subr.bf16.mxu1 %v6669_v44  ;;  %5810 = vmatmul.mubr.msk.bf16.gmra.mrb[104].mxu0 %vm424_vm3, %v86_v62 }
 0x146   :  { %869 = vmatprep.mubr.bf16.mxu0 %v6667_v0 }
 0x147   :  { %6157 = vmatmul.mubr.msk.f32.gmra.mrb[34].mxu1 %vm424_vm3, %v1178_v20  ;;  %v94_v20 = vld [vmem:[%s10672_s1 + $0xf0] sm:$0xff]  }
 0x148   :  { %6159 = vmatprep.mubr.msk.f32.mxu1 %vm424_vm3, %v1179_v21  ;;  %6354 = vmatpush1.bf16.msra.mxu1 %v6670_v45  ;;  %v1229_v21 = vunpack.c.l.bf16 %v88_v4 }
 0x149   :  { %6342 = vmatprep.subr.bf16.mxu1 %v6669_v44 }
 0x14b   :  { %6160 = vmatmul.mubr.msk.f32.gmra.mrb[36].mxu1 %vm424_vm3, %v1180_v22  ;;  %v1231_v22 = vunpack.c.l.bf16 %v90_v10 }
 0x14c   :  { %6162 = vmatprep.mubr.msk.f32.mxu1 %vm424_vm3, %v1181_v33  ;;  %6355 = vmatpush1.bf16.msra.mxu1 %v6670_v45  ;;  %v1232_v33 = vunpack.c.h.bf16 %v90_v10 }
 0x14d   :  { %6343 = vmatprep.subr.bf16.mxu1 %v6669_v44  ;;  %5811 = vmatmul.mubr.msk.bf16.gmra.mrb[108].mxu0 %vm424_vm3, %v88_v4 }
 0x14e   :  { %879 = vmatprep.mubr.bf16.mxu0 %v6667_v0 }
 0x14f   :  { %6163 = vmatmul.mubr.msk.f32.gmra.mrb[38].mxu1 %vm424_vm3, %v1182_v34  ;;  %v96_v34 = vld [vmem:[%s10672_s1 + $0xf8] sm:$0xff]  }
 0x150   :  { %6165 = vmatprep.mubr.msk.f32.mxu1 %vm424_vm3, %v1183_v24  ;;  %6356 = vmatpush1.bf16.msra.mxu1 %v6670_v45  ;;  %v1233_v24 = vunpack.c.l.bf16 %v92_v15  ;;  %v1238_v39 = vunpack.c.h.bf16 %v96_v34 }
 0x151   :  { %6344 = vmatprep.subr.bf16.mxu1 %v6669_v44 }
 0x153   :  { %6166 = vmatmul.mubr.msk.f32.gmra.mrb[40].mxu1 %vm424_vm3, %v1184_v36  ;;  %v1235_v36 = vunpack.c.l.bf16 %v94_v20 }
 0x154   :  { %6168 = vmatprep.mubr.msk.f32.mxu1 %vm424_vm3, %v1185_v25  ;;  %6357 = vmatpush1.bf16.msra.mxu1 %v6670_v45  ;;  %v1236_v25 = vunpack.c.h.bf16 %v94_v20 }
 0x155   :  { %6345 = vmatprep.subr.bf16.mxu1 %v6669_v44  ;;  %5812 = vmatmul.mubr.msk.bf16.gmra.mrb[112].mxu0 %vm424_vm3, %v90_v10  ;;  %v120_v10 = vld [vmem:[%s10672_s1 + $0x158] sm:$0xff]  }
 0x156   :  { %889 = vmatprep.mubr.bf16.mxu0 %v6667_v0 }
 0x157   :  { %6169 = vmatmul.mubr.msk.f32.gmra.mrb[42].mxu1 %vm424_vm3, %v1186_v37  ;;  %v98_v37 = vld [vmem:[%s10672_s1 + $0x100] sm:$0xff]  }
 0x158   :  { %6171 = vmatprep.mubr.msk.f32.mxu1 %vm424_vm3, %v1187_v26  ;;  %6358 = vmatpush1.bf16.msra.mxu1 %v6670_v45  ;;  %v1237_v26 = vunpack.c.l.bf16 %v96_v34 }
 0x159   :  { %6346 = vmatprep.subr.bf16.mxu1 %v6669_v44 }
 0x15b   :  { %6172 = vmatmul.mubr.msk.f32.gmra.mrb[44].mxu1 %vm424_vm3, %v1188_v40  ;;  %v1239_v40 = vunpack.c.l.bf16 %v98_v37 }
 0x15c   :  { %6174 = vmatprep.mubr.msk.f32.mxu1 %vm424_vm3, %v1189_v27  ;;  %6359 = vmatpush1.bf16.msra.mxu1 %v6670_v45  ;;  %v100_v27 = vld [vmem:[%s10672_s1 + $0x108] sm:$0xff]  }
 0x15d   :  { %6347 = vmatprep.subr.bf16.mxu1 %v6669_v44  ;;  %5813 = vmatmul.mubr.msk.bf16.gmra.mrb[116].mxu0 %vm424_vm3, %v92_v15  ;;  %v1261_v15 = vunpack.c.l.bf16 %v120_v10 }
 0x15e   :  { %899 = vmatprep.mubr.bf16.mxu0 %v6667_v0 }
 0x15f   :  { %6175 = vmatmul.mubr.msk.f32.gmra.mrb[46].mxu1 %vm424_vm3, %v1190_v41  ;;  %v1240_v41 = vunpack.c.h.bf16 %v98_v37 }
 0x160   :  { %6177 = vmatprep.mubr.msk.f32.mxu1 %vm424_vm3, %v1191_v28  ;;  %6360 = vmatpush1.bf16.msra.mxu1 %v6670_v45  ;;  %v1241_v28 = vunpack.c.l.bf16 %v100_v27 }
 0x161   :  { %6348 = vmatprep.subr.bf16.mxu1 %v6669_v44 }
 0x163   :  { %6178 = vmatmul.mubr.msk.f32.gmra.mrb[48].mxu1 %vm424_vm3, %v1192_v43  ;;  %v1242_v43 = vunpack.c.h.bf16 %v100_v27 }
 0x164   :  { %6180 = vmatprep.mubr.msk.f32.mxu1 %vm424_vm3, %v1193_v29  ;;  %6361 = vmatpush1.bf16.msra.mxu1 %v6670_v45 }
 0x165   :  { %6349 = vmatprep.subr.bf16.mxu1 %v6669_v44  ;;  %5814 = vmatmul.mubr.msk.bf16.gmra.mrb[120].mxu0 %vm424_vm3, %v94_v20 }
 0x166   :  { %909 = vmatprep.mubr.bf16.mxu0 %v6667_v0 }
 0x167   :  { %6181 = vmatmul.mubr.msk.f32.gmra.mrb[50].mxu1 %vm424_vm3, %v1194_v47  ;;  %v104_v47 = vld [vmem:[%s10672_s1 + $0x118] sm:$0xff]  }
 0x168   :  { %6183 = vmatprep.mubr.msk.f32.mxu1 %vm424_vm3, %v1195_v30  ;;  %6362 = vmatpush1.bf16.msra.mxu1 %v6670_v45  ;;  %v1245_v48 = vunpack.c.l.bf16 %v104_v47 }
 0x169   :  { %6350 = vmatprep.subr.bf16.mxu1 %v6669_v44 }
 0x16b   :  { %6184 = vmatmul.mubr.msk.f32.gmra.mrb[52].mxu1 %vm424_vm3, %v1196_v49  ;;  %v106_v49 = vld [vmem:[%s10672_s1 + $0x120] sm:$0xff]  }
 0x16c   :  { %6186 = vmatprep.mubr.msk.f32.mxu1 %vm424_vm3, %v1197_v31  ;;  %6363 = vmatpush1.bf16.msra.mxu1 %v6670_v45  ;;  %v1246_v31 = vunpack.c.h.bf16 %v104_v47  ;;  %v1248_v51 = vunpack.c.h.bf16 %v106_v49 }
 0x16d   :  { %6351 = vmatprep.subr.bf16.mxu1 %v6669_v44  ;;  %v1203_v44 = vunpack.c.l.bf16 %v6897_v58  ;;  %5815 = vmatmul.mubr.msk.bf16.gmra.mrb[124].mxu0 %vm424_vm3, %v96_v34 }
 0x16e   :  { %919 = vmatprep.mubr.bf16.mxu0 %v6667_v0 }
 0x16f   :  { %6187 = vmatmul.mubr.msk.f32.gmra.mrb[54].mxu1 %vm424_vm3, %v1198_v50  ;;  %v1247_v50 = vunpack.c.l.bf16 %v106_v49 }
 0x170   :  { %6189 = vmatprep.mubr.msk.f32.mxu1 %vm424_vm3, %v1199_v32  ;;  %6364 = vmatpush1.bf16.msra.mxu1 %v6670_v45  ;;  %v1204_v45 = vunpack.c.h.bf16 %v6897_v58  ;;  %v1208_v58 = vunpack.c.h.bf16 %v6921_v7  ;;  %v1218_v7 = vunpack.c.h.bf16 %v7010_v42  ;;  %v102_v42 = vld [vmem:[%s10672_s1 + $0x110] sm:$0xff]   ;;  %v108_v32 = vld [vmem:[%s10672_s1 + $0x128] sm:$0xff]  }
 0x171   :  { %v1243_v29 = vunpack.c.l.bf16 %v102_v42  ;;  %v1244_v30 = vunpack.c.h.bf16 %v102_v42 }
 0x173   :  { %6190 = vmatmul.mubr.msk.f32.gmra.mrb[56].mxu1 %vm424_vm3, %v1200_v53  ;;  %v1249_v53 = vunpack.c.l.bf16 %v108_v32 }
 0x174   :  { %6192 = vmatprep.mubr.msk.f32.mxu1 %vm424_vm3, %v1201_v38  ;;  %v110_v38 = vld [vmem:[%s10672_s1 + $0x130] sm:$0xff]  }
 0x175   :  { %5816 = vmatmul.mubr.msk.bf16.gmra.mrb[128].mxu0 %vm424_vm3, %v98_v37 }
 0x176   :  { %929 = vmatprep.mubr.bf16.mxu0 %v6667_v0 }
 0x177   :  { %6193 = vmatmul.mubr.msk.f32.gmra.mrb[58].mxu1 %vm424_vm3, %v1202_v54  ;;  %v1250_v54 = vunpack.c.h.bf16 %v108_v32 }
 0x178   :  { %6195 = vmatprep.mubr.msk.f32.mxu1 %vm424_vm3, %v1203_v44  ;;  %v1251_v44 = vunpack.c.l.bf16 %v110_v38 }
 0x17b   :  { %6196 = vmatmul.mubr.msk.f32.gmra.mrb[60].mxu1 %vm424_vm3, %v1204_v45  ;;  %v112_v45 = vld [vmem:[%s10672_s1 + $0x138] sm:$0xff]  }
 0x17c   :  { %6198 = vmatprep.mubr.msk.f32.mxu1 %vm424_vm3, %v1205_v55  ;;  %v7207_v55 = vpop.f32.mrb[1].mxu0 }
 0x17d   :  { %5817 = vmatmul.mubr.msk.bf16.gmra.mrb[132].mxu0 %vm424_vm3, %v100_v27 }
 0x17e   :  { %939 = vmatprep.mubr.bf16.mxu0 %v6667_v0 }
 0x17f   :  { %6199 = vmatmul.mubr.msk.f32.gmra.mrb[62].mxu1 %vm424_vm3, %v1206_v52  ;;  %v7209_v52 = vpop.f32.mrb[2].mxu0 }
 0x180   :  { %6201 = vmatprep.mubr.msk.f32.mxu1 %vm424_vm3, %v1207_v56  ;;  %v1252_v56 = vunpack.c.h.bf16 %v110_v38  ;;  %v7212_v57 = vpop.f32.mrb[3].mxu0 }
 0x181   :  { %v7222_v62 = vpop.f32.mrb[4].mxu0 }
 0x183   :  { %6202 = vmatmul.mubr.msk.f32.gmra.mrb[64].mxu1 %vm424_vm3, %v1208_v58  ;;  %v1253_v58 = vunpack.c.l.bf16 %v112_v45 }
 0x184   :  { %6204 = vmatprep.mubr.msk.f32.mxu1 %vm424_vm3, %v1209_v59  ;;  %v114_v59 = vld [vmem:[%s10672_s1 + $0x140] sm:$0xff]  }
 0x185   :  { %5818 = vmatmul.mubr.msk.bf16.gmra.mrb[136].mxu0 %vm424_vm3, %v102_v42 }
 0x186   :  { %949 = vmatprep.mubr.bf16.mxu0 %v6667_v0 }
 0x187   :  { %6205 = vmatmul.mubr.msk.f32.gmra.mrb[66].mxu1 %vm424_vm3, %v1210_v60  ;;  %v1254_v60 = vunpack.c.h.bf16 %v112_v45 }
 0x188   :  { %6207 = vmatprep.mubr.msk.f32.mxu1 %vm424_vm3, %v1211_v61  ;;  %v1255_v61 = vunpack.c.l.bf16 %v114_v59 }
 0x18b   :  { %6208 = vmatmul.mubr.msk.f32.gmra.mrb[68].mxu1 %vm424_vm3, %v1212_v63  ;;  %v116_v63 = vld [vmem:[%s10672_s1 + $0x148] sm:$0xff]  }
 0x18c   :  { %6210 = vmatprep.mubr.msk.f32.mxu1 %vm424_vm3, %v1213_v1  ;;  %v7227_v1 = vpop.f32.mrb[5].mxu0 }
 0x18d   :  { %5819 = vmatmul.mubr.msk.bf16.gmra.mrb[140].mxu0 %vm424_vm3, %v104_v47 }
 0x18e   :  { %959 = vmatprep.mubr.bf16.mxu0 %v6667_v0 }
 0x18f   :  { %6211 = vmatmul.mubr.msk.f32.gmra.mrb[70].mxu1 %vm424_vm3, %v1214_v2  ;;  %v7229_v2 = vpop.f32.mrb[6].mxu0 }
 0x190   :  { %6213 = vmatprep.mubr.msk.f32.mxu1 %vm424_vm3, %v1215_v3  ;;  %v1256_v3 = vunpack.c.h.bf16 %v114_v59  ;;  %v7232_v4 = vpop.f32.mrb[7].mxu0 }
 0x193   :  { %6214 = vmatmul.mubr.msk.f32.gmra.mrb[72].mxu1 %vm424_vm3, %v1216_v5  ;;  %v1257_v5 = vunpack.c.l.bf16 %v116_v63 }
 0x194   :  { %6216 = vmatprep.mubr.msk.f32.mxu1 %vm424_vm3, %v1217_v6  ;;  %v118_v6 = vld [vmem:[%s10672_s1 + $0x150] sm:$0xff]  }
 0x195   :  { %5820 = vmatmul.mubr.msk.bf16.gmra.mrb[144].mxu0 %vm424_vm3, %v106_v49 }
 0x196   :  { %969 = vmatprep.mubr.bf16.mxu0 %v6667_v0 }
 0x197   :  { %6217 = vmatmul.mubr.msk.f32.gmra.mrb[74].mxu1 %vm424_vm3, %v1218_v7  ;;  %v1258_v7 = vunpack.c.h.bf16 %v116_v63 }
 0x198   :  { %6219 = vmatprep.mubr.msk.f32.mxu1 %vm424_vm3, %v1219_v8  ;;  %v1259_v8 = vunpack.c.l.bf16 %v118_v6 }
 0x19b   :  { %6220 = vmatmul.mubr.msk.f32.gmra.mrb[76].mxu1 %vm424_vm3, %v1220_v9  ;;  %v7242_v9 = vpop.f32.mrb[8].mxu0 }
 0x19c   :  { %6222 = vmatprep.mubr.msk.f32.mxu1 %vm424_vm3, %v1221_v11  ;;  %v7247_v11 = vpop.f32.mrb[9].mxu0 }
 0x19d   :  { %5821 = vmatmul.mubr.msk.bf16.gmra.mrb[148].mxu0 %vm424_vm3, %v108_v32 }
 0x19e   :  { %979 = vmatprep.mubr.bf16.mxu0 %v6667_v0 }
 0x19f   :  { %6223 = vmatmul.mubr.msk.f32.gmra.mrb[78].mxu1 %vm424_vm3, %v1222_v12  ;;  %v7249_v12 = vpop.f32.mrb[10].mxu0 }
 0x1a0   :  { %6225 = vmatprep.mubr.msk.f32.mxu1 %vm424_vm3, %v1223_v13  ;;  %v1260_v13 = vunpack.c.h.bf16 %v118_v6 }
 0x1a3   :  { %6226 = vmatmul.mubr.msk.f32.gmra.mrb[80].mxu1 %vm424_vm3, %v1224_v14  ;;  %v7252_v14 = vpop.f32.mrb[11].mxu0 }
 0x1a4   :  { %6228 = vmatprep.mubr.msk.f32.mxu1 %vm424_vm3, %v1225_v16  ;;  %v122_v16 = vld [vmem:[%s10672_s1 + $0x160] sm:$0xff]  }
 0x1a5   :  { %5822 = vmatmul.mubr.msk.bf16.gmra.mrb[152].mxu0 %vm424_vm3, %v110_v38 }
 0x1a6   :  { %989 = vmatprep.mubr.bf16.mxu0 %v6667_v0 }
 0x1a7   :  { %6229 = vmatmul.mubr.msk.f32.gmra.mrb[82].mxu1 %vm424_vm3, %v1226_v17  ;;  %v1262_v17 = vunpack.c.h.bf16 %v120_v10 }
 0x1a8   :  { %6231 = vmatprep.mubr.msk.f32.mxu1 %vm424_vm3, %v1227_v18  ;;  %v1263_v18 = vunpack.c.l.bf16 %v122_v16 }
 0x1ab   :  { %6232 = vmatmul.mubr.msk.f32.gmra.mrb[84].mxu1 %vm424_vm3, %v1228_v19  ;;  %v7262_v19 = vpop.f32.mrb[12].mxu0 }
 0x1ac   :  { %6234 = vmatprep.mubr.msk.f32.mxu1 %vm424_vm3, %v1229_v21  ;;  %v7264_v20 = vpop.f32.mrb[13].mxu0 }
 0x1ad   :  { %v7266_v21 = vpop.f32.mrb[14].mxu0  ;;  %5823 = vmatmul.mubr.msk.bf16.gmra.mrb[156].mxu0 %vm424_vm3, %v112_v45 }
 0x1ae   :  { %999 = vmatprep.mubr.bf16.mxu0 %v6667_v0 }
 0x1af   :  { %6235 = vmatmul.mubr.msk.f32.gmra.mrb[86].mxu1 %vm424_vm3, %v1230_v23  ;;  %v1264_v23 = vunpack.c.h.bf16 %v122_v16 }
 0x1b0   :  { %6237 = vmatprep.mubr.msk.f32.mxu1 %vm424_vm3, %v1231_v22  ;;  %v7269_v22 = vpop.f32.mrb[15].mxu0 }
 0x1b3   :  { %6238 = vmatmul.mubr.msk.f32.gmra.mrb[88].mxu1 %vm424_vm3, %v1232_v33  ;;  %v7275_v33 = vpop.f32.mrb[16].mxu0 }
 0x1b4   :  { %6240 = vmatprep.mubr.msk.f32.mxu1 %vm424_vm3, %v1233_v24  ;;  %v7277_v34 = vpop.f32.mrb[17].mxu0 }
 0x1b5   :  { %v7279_v24 = vpop.f32.mrb[18].mxu0  ;;  %5824 = vmatmul.mubr.msk.bf16.gmra.mrb[160].mxu0 %vm424_vm3, %v114_v59 }
 0x1b6   :  { %1009 = vmatprep.mubr.bf16.mxu0 %v6667_v0 }
 0x1b7   :  { %6241 = vmatmul.mubr.msk.f32.gmra.mrb[90].mxu1 %vm424_vm3, %v1234_v35  ;;  %v7281_v35 = vpop.f32.mrb[19].mxu0 }
 0x1b8   :  { %6243 = vmatprep.mubr.msk.f32.mxu1 %vm424_vm3, %v1235_v36  ;;  %v7285_v36 = vpop.f32.mrb[20].mxu0 }
 0x1bb   :  { %6244 = vmatmul.mubr.msk.f32.gmra.mrb[92].mxu1 %vm424_vm3, %v1236_v25  ;;  %v7287_v25 = vpop.f32.mrb[21].mxu0 }
 0x1bc   :  { %6246 = vmatprep.mubr.msk.f32.mxu1 %vm424_vm3, %v1237_v26  ;;  %v7289_v37 = vpop.f32.mrb[22].mxu0 }
 0x1bd   :  { %v7291_v26 = vpop.f32.mrb[23].mxu0  ;;  %5825 = vmatmul.mubr.msk.bf16.gmra.mrb[164].mxu0 %vm424_vm3, %v116_v63  ;;  %v6671_v63 = vmov 0.0  }
 0x1be   :  { %1019 = vmatprep.mubr.bf16.mxu0 %v6667_v0  ;;  %3271 = vmatprep.subr.mxu0 %v6671_v63 }
 0x1bf   :  { %6247 = vmatmul.mubr.msk.f32.gmra.mrb[94].mxu1 %vm424_vm3, %v1238_v39  ;;  %v7295_v39 = vpop.f32.mrb[24].mxu0  ;;  %6352 = vmatprep.subr.mxu1 %v6671_v63 }
 0x1c0   :  { %6249 = vmatprep.mubr.msk.f32.mxu1 %vm424_vm3, %v1239_v40  ;;  %v7297_v40 = vpop.f32.mrb[25].mxu0 }
 0x1c1   :  { %v7299_v27 = vpop.f32.mrb[26].mxu0 }
 0x1c3   :  { %6250 = vmatmul.mubr.msk.f32.gmra.mrb[96].mxu1 %vm424_vm3, %v1240_v41  ;;  %v7301_v41 = vpop.f32.mrb[27].mxu0 }
 0x1c4   :  { %6252 = vmatprep.mubr.msk.f32.mxu1 %vm424_vm3, %v1241_v28  ;;  %v7305_v28 = vpop.f32.mrb[28].mxu0 }
 0x1c5   :  { %5826 = vmatmul.mubr.msk.bf16.gmra.mrb[168].mxu0 %vm424_vm3, %v118_v6  ;;  %v7307_v42 = vpop.f32.mrb[29].mxu0 }
 0x1c6   :  { %1029 = vmatprep.mubr.bf16.mxu0 %v6667_v0 }
 0x1c7   :  { %6253 = vmatmul.mubr.msk.f32.gmra.mrb[98].mxu1 %vm424_vm3, %v1242_v43  ;;  %v7309_v43 = vpop.f32.mrb[30].mxu0 }
 0x1c8   :  { %6255 = vmatprep.mubr.msk.f32.mxu1 %vm424_vm3, %v1243_v29  ;;  %v7311_v29 = vpop.f32.mrb[31].mxu0 }
 0x1c9   :  { %v7315_v47 = vpop.f32.mrb[32].mxu0 }
 0x1cb   :  { %6256 = vmatmul.mubr.msk.f32.gmra.mrb[100].mxu1 %vm424_vm3, %v1244_v30  ;;  %v7317_v30 = vpop.f32.mrb[33].mxu0 }
 0x1cc   :  { %6258 = vmatprep.mubr.msk.f32.mxu1 %vm424_vm3, %v1245_v48  ;;  %v7319_v49 = vpop.f32.mrb[34].mxu0 }
 0x1cd   :  { %5827 = vmatmul.mubr.msk.bf16.gmra.mrb[172].mxu0 %vm424_vm3, %v120_v10  ;;  %v7321_v32 = vpop.f32.mrb[35].mxu0 }
 0x1ce   :  { %1039 = vmatprep.mubr.bf16.mxu0 %v6667_v0 }
 0x1cf   :  { %6259 = vmatmul.mubr.msk.f32.gmra.mrb[102].mxu1 %vm424_vm3, %v1246_v31 }
 0x1d0   :  { %6261 = vmatprep.mubr.msk.f32.mxu1 %vm424_vm3, %v1247_v50 }
 0x1d3   :  { %6262 = vmatmul.mubr.msk.f32.gmra.mrb[104].mxu1 %vm424_vm3, %v1248_v51 }
 0x1d4   :  { %6264 = vmatprep.mubr.msk.f32.mxu1 %vm424_vm3, %v1249_v53 }
 0x1d5   :  { %5828 = vmatmul.mubr.msk.bf16.gmra.mrb[176].mxu0 %vm424_vm3, %v122_v16 }
 0x1d7   :  { %6265 = vmatmul.mubr.msk.f32.gmra.mrb[106].mxu1 %vm424_vm3, %v1250_v54 }
 0x1d8   :  { %6267 = vmatprep.mubr.msk.f32.mxu1 %vm424_vm3, %v1251_v44  ;;  %v7324_v44 = vpop.f32.mrb[36].mxu0 }
 0x1d9   :  { %v7326_v0 = vpop.f32.mrb[37].mxu0 }
 0x1db   :  { %6268 = vmatmul.mubr.msk.f32.gmra.mrb[108].mxu1 %vm424_vm3, %v1252_v56  ;;  %v7328_v56 = vpop.f32.mrb[38].mxu0 }
 0x1dc   :  { %6270 = vmatprep.mubr.msk.f32.mxu1 %vm424_vm3, %v1253_v58 }
 0x1df   :  { %6271 = vmatmul.mubr.msk.f32.gmra.mrb[110].mxu1 %vm424_vm3, %v1254_v60  ;;  %v7330_v60 = vpop.f32.mrb[39].mxu0 }
 0x1e0   :  { %6273 = vmatprep.mubr.msk.f32.mxu1 %vm424_vm3, %v1255_v61 }
 0x1e3   :  { %6274 = vmatmul.mubr.msk.f32.gmra.mrb[112].mxu1 %vm424_vm3, %v1256_v3 }
 0x1e4   :  { %6276 = vmatprep.mubr.msk.f32.mxu1 %vm424_vm3, %v1257_v5  ;;  %v6672_v5 = vmov 1.0  }
 0x1e5   :  { %5927 = vmatpush1.msk.msra.mxu0 %vm560_vm2, %v6672_v5  ;;  %6365 = vmatpush1.msk.msra.mxu1 %vm560_vm2, %v6672_v5 }
 0x1e7   :  { %6277 = vmatmul.mubr.msk.f32.gmra.mrb[114].mxu1 %vm424_vm3, %v1258_v7 }
 0x1e8   :  { %6279 = vmatprep.mubr.msk.f32.mxu1 %vm424_vm3, %v1259_v8 }
 0x1eb   :  { %6280 = vmatmul.mubr.msk.f32.gmra.mrb[116].mxu1 %vm424_vm3, %v1260_v13  ;;  %v7334_v13 = vpop.f32.mrb[40].mxu0 }
 0x1ec   :  { %6282 = vmatprep.mubr.msk.f32.mxu1 %vm424_vm3, %v1261_v15  ;;  %10899 = vst [vmem:[#allocation2_spill] sm:$0xff] %v7334_v13  ;;  %v7336_v16 = vpop.f32.mrb[41].mxu0 }
 0x1ed   :  { %10900 = vst [vmem:[#allocation3_spill] sm:$0xff] %v7336_v16 }
 0x1ef   :  { %6283 = vmatmul.mubr.msk.f32.gmra.mrb[118].mxu1 %vm424_vm3, %v1262_v17 }
 0x1f0   :  { %6285 = vmatprep.mubr.msk.f32.mxu1 %vm424_vm3, %v1263_v18  ;;  %v7338_v18 = vpop.f32.mrb[42].mxu0 }
 0x1f1   :  { %10901 = vst [vmem:[#allocation4_spill] sm:$0xff] %v7338_v18 }
 0x1f3   :  { %6286 = vmatmul.mubr.msk.f32.gmra.mrb[120].mxu1 %vm424_vm3, %v1264_v23 }
 0x216   :  { %v6155_v48 = vpop.f32.mrb[32].mxu1 }
 0x217   :  { %v2051_v31 = vmul.f32 0.0051020407, %v6155_v48  ;;  %v1601_v50 = vpop.f32.mrb[33].mxu1  ;;  %v7340_v48 = vpop.f32.mrb[43].mxu0 }
 0x218   :  { %v2050_v53 = vmul.f32 0.0051020407, %v1601_v50  ;;  %10902 = vst [vmem:[#allocation5_spill] sm:$0xff] %v7340_v48 }
 0x219   :  { %2147 = vperm.xlu0 %6372, %v2051_v31  }
 0x21a   :  { %v6158_v51 = vpop.f32.mrb[34].mxu1 }
 0x21b   :  { %v2053_v38 = vmul.f32 0.0051020407, %v6158_v51  ;;  %v1611_v54 = vpop.f32.mrb[35].mxu1 }
 0x21c   :  { %v2052_v58 = vmul.f32 0.0051020407, %v1611_v54  ;;  %v7342_v54 = vpop.f32.mrb[44].mxu0 }
 0x21d   :  { %2142 = vperm.xlu0 %6372, %v2050_v53   ;;  %2157 = vperm.xlu1 %6373, %v2053_v38   ;;  %10903 = vst [vmem:[#allocation6_spill] sm:$0xff] %v7342_v54 }
 0x21e   :  { %v6161_v45 = vpop.f32.mrb[36].mxu1 }
 0x21f   :  { %v1621_v59 = vpop.f32.mrb[37].mxu1  ;;  %v2055_v3 = vmul.f32 0.0051020407, %v6161_v45 }
 0x220   :  { %v2054_v61 = vmul.f32 0.0051020407, %v1621_v59 }
 0x221   :  { %2152 = vperm.xlu1 %6373, %v2052_v58   ;;  %v7344_v58 = vpop.f32.mrb[45].mxu0 }
 0x222   :  { %2162 = vperm.xlu0 %6372, %v2054_v61   ;;  %v6164_v6 = vpop.f32.mrb[38].mxu1  ;;  %10904 = vst [vmem:[#allocation7_spill] sm:$0xff] %v7344_v58  ;;  %v7346_v61 = vpop.f32.mrb[46].mxu0 }
 0x223   :  { %v1631_v7 = vpop.f32.mrb[39].mxu1  ;;  %v2057_v10 = vmul.f32 0.0051020407, %v6164_v6  ;;  %10905 = vst [vmem:[#allocation8_spill] sm:$0xff] %v7346_v61 }
 0x224   :  { %v2056_v8 = vmul.f32 0.0051020407, %v1631_v7 }
 0x225   :  { %2167 = vperm.xlu1 %6373, %v2055_v3   ;;  %v7348_v3 = vpop.f32.mrb[47].mxu0 }
 0x226   :  { %2172 = vperm.xlu0 %6372, %v2056_v8   ;;  %v6167_v15 = vpop.f32.mrb[40].mxu1  ;;  %10906 = vst [vmem:[#allocation9_spill] sm:$0xff] %v7348_v3 }
 0x227   :  { %v1641_v17 = vpop.f32.mrb[41].mxu1  ;;  %v2059_v31 = vmul.f32 0.0051020407, %v6167_v15  ;;  %v7350_v15 = vpop.f32.mrb[48].mxu0 }
 0x228   :  { %v2058_v23 = vmul.f32 0.0051020407, %v1641_v17  ;;  %10907 = vst [vmem:[#allocation10_spill] sm:$0xff] %v7350_v15 }
 0x229   :  { %2177 = vperm.xlu1 %6373, %v2057_v10  }
 0x22a   :  { %2182 = vperm.xlu0 %6372, %v2058_v23   ;;  %v6170_v50 = vpop.f32.mrb[42].mxu1  ;;  %v7352_v23 = vpop.f32.mrb[49].mxu0 }
 0x22b   :  { %v1651_v51 = vpop.f32.mrb[43].mxu1  ;;  %v2061_v38 = vmul.f32 0.0051020407, %v6170_v50  ;;  %10908 = vst [vmem:[#allocation11_spill] sm:$0xff] %v7352_v23  ;;  %v7354_v50 = vpop.f32.mrb[50].mxu0 }
 0x22c   :  { %v2060_v53 = vmul.f32 0.0051020407, %v1651_v51  ;;  %10909 = vst [vmem:[#allocation12_spill] sm:$0xff] %v7354_v50 }
 0x22d   :  { %2187 = vperm.xlu1 %6373, %v2059_v31  }
 0x22e   :  { %2192 = vperm.xlu0 %6372, %v2060_v53   ;;  %v6173_v45 = vpop.f32.mrb[44].mxu1  ;;  %v7356_v53 = vpop.f32.mrb[51].mxu0 }
 0x22f   :  { %v1661_v59 = vpop.f32.mrb[45].mxu1  ;;  %v2063_v5 = vmul.f32 0.0051020407, %v6173_v45  ;;  %10910 = vst [vmem:[#allocation13_spill] sm:$0xff] %v7356_v53 }
 0x230   :  { %v2062_v63 = vmul.f32 0.0051020407, %v1661_v59 }
 0x231   :  { %2197 = vperm.xlu1 %6373, %v2061_v38  }
 0x232   :  { %2202 = vperm.xlu0 %6372, %v2062_v63   ;;  %v6176_v6 = vpop.f32.mrb[46].mxu1 }
 0x233   :  { %v1671_v7 = vpop.f32.mrb[47].mxu1  ;;  %v2065_v10 = vmul.f32 0.0051020407, %v6176_v6 }
 0x234   :  { %v2064_v8 = vmul.f32 0.0051020407, %v1671_v7 }
 0x235   :  { %2207 = vperm.xlu1 %6373, %v2063_v5   ;;  %v7358_v5 = vpop.f32.mrb[52].mxu0 }
 0x236   :  { %2212 = vperm.xlu0 %6372, %v2064_v8   ;;  %v6179_v17 = vpop.f32.mrb[48].mxu1  ;;  %10911 = vst [vmem:[#allocation14_spill] sm:$0xff] %v7358_v5  ;;  %v7360_v8 = vpop.f32.mrb[53].mxu0 }
 0x237   :  { %v1681_v31 = vpop.f32.mrb[49].mxu1  ;;  %v2067_v45 = vmul.f32 0.0051020407, %v6179_v17  ;;  %10912 = vst [vmem:[#allocation15_spill] sm:$0xff] %v7360_v8  ;;  %v7362_v23 = vpop.f32.mrb[54].mxu0 }
 0x238   :  { %v2066_v51 = vmul.f32 0.0051020407, %v1681_v31  ;;  %10913 = vst [vmem:[#allocation16_spill] sm:$0xff] %v7362_v23  ;;  %v7364_v50 = vpop.f32.mrb[55].mxu0 }
 0x239   :  { %2217 = vperm.xlu1 %6373, %v2065_v10   ;;  %10914 = vst [vmem:[#allocation17_spill] sm:$0xff] %v7364_v50 }
 0x23a   :  { %2222 = vperm.xlu0 %6372, %v2066_v51   ;;  %v6182_v38 = vpop.f32.mrb[50].mxu1 }
 0x23b   :  { %v1691_v59 = vpop.f32.mrb[51].mxu1  ;;  %v2069_v6 = vmul.f32 0.0051020407, %v6182_v38 }
 0x23c   :  { %v2068_v63 = vmul.f32 0.0051020407, %v1691_v59 }
 0x23d   :  { %2227 = vperm.xlu1 %6373, %v2067_v45   ;;  %v7366_v45 = vpop.f32.mrb[56].mxu0 }
 0x23e   :  { %2232 = vperm.xlu0 %6372, %v2068_v63   ;;  %v6185_v7 = vpop.f32.mrb[52].mxu1  ;;  %10915 = vst [vmem:[#allocation18_spill] sm:$0xff] %v7366_v45  ;;  %v7368_v5 = vpop.f32.mrb[57].mxu0 }
 0x23f   :  { %v1701_v15 = vpop.f32.mrb[53].mxu1  ;;  %v2071_v17 = vmul.f32 0.0051020407, %v6185_v7  ;;  %10916 = vst [vmem:[#allocation19_spill] sm:$0xff] %v7368_v5  ;;  %v7370_v53 = vpop.f32.mrb[58].mxu0 }
 0x240   :  { %v2070_v31 = vmul.f32 0.0051020407, %v1701_v15  ;;  %10917 = vst [vmem:[#allocation20_spill] sm:$0xff] %v7370_v53  ;;  %v7372_v23 = vpop.f32.mrb[59].mxu0 }
 0x241   :  { %2237 = vperm.xlu1 %6373, %v2069_v6   ;;  %10918 = vst [vmem:[#allocation21_spill] sm:$0xff] %v7372_v23 }
 0x242   :  { %2242 = vperm.xlu0 %6372, %v2070_v31   ;;  %v6188_v10 = vpop.f32.mrb[54].mxu1 }
 0x243   :  { %v1711_v51 = vpop.f32.mrb[55].mxu1  ;;  %v2073_v38 = vmul.f32 0.0051020407, %v6188_v10 }
 0x244   :  { %v2072_v59 = vmul.f32 0.0051020407, %v1711_v51 }
 0x245   :  { %2247 = vperm.xlu1 %6373, %v2071_v17   ;;  %v7374_v17 = vpop.f32.mrb[60].mxu0 }
 0x246   :  { %2252 = vperm.xlu0 %6372, %v2072_v59   ;;  %v6191_v63 = vpop.f32.mrb[56].mxu1  ;;  %10919 = vst [vmem:[#allocation22_spill] sm:$0xff] %v7374_v17  ;;  %v7376_v45 = vpop.f32.mrb[61].mxu0 }
 0x247   :  { %v1721_v8 = vpop.f32.mrb[57].mxu1  ;;  %v2075_v7 = vmul.f32 0.0051020407, %v6191_v63  ;;  %10920 = vst [vmem:[#allocation23_spill] sm:$0xff] %v7376_v45  ;;  %v7378_v50 = vpop.f32.mrb[62].mxu0 }
 0x248   :  { %v2074_v15 = vmul.f32 0.0051020407, %v1721_v8  ;;  %10921 = vst [vmem:[#allocation24_spill] sm:$0xff] %v7378_v50  ;;  %v7380_v53 = vpop.f32.mrb[63].mxu0 }
 0x249   :  { %2257 = vperm.xlu1 %6373, %v2073_v38   ;;  %10922 = vst [vmem:[#allocation25_spill] sm:$0xff] %v7380_v53 }
 0x24a   :  { %2262 = vperm.xlu0 %6372, %v2074_v15   ;;  %v6194_v6 = vpop.f32.mrb[58].mxu1 }
 0x24b   :  { %v1731_v31 = vpop.f32.mrb[59].mxu1  ;;  %v2077_v10 = vmul.f32 0.0051020407, %v6194_v6 }
 0x24c   :  { %v2076_v51 = vmul.f32 0.0051020407, %v1731_v31 }
 0x24d   :  { %2267 = vperm.xlu1 %6373, %v2075_v7   ;;  %v7382_v7 = vpop.f32.mrb[64].mxu0 }
 0x24e   :  { %2272 = vperm.xlu0 %6372, %v2076_v51   ;;  %v6197_v59 = vpop.f32.mrb[60].mxu1  ;;  %v7384_v17 = vpop.f32.mrb[65].mxu0 }
 0x24f   :  { %v1741_v5 = vpop.f32.mrb[61].mxu1  ;;  %v2079_v63 = vmul.f32 0.0051020407, %v6197_v59  ;;  %10923 = vst [vmem:[#allocation26_spill] sm:$0xff] %v7384_v17  ;;  %v7386_v23 = vpop.f32.mrb[66].mxu0 }
 0x250   :  { %v2078_v8 = vmul.f32 0.0051020407, %v1741_v5  ;;  %v7388_v50 = vpop.f32.mrb[67].mxu0 }
 0x251   :  { %2277 = vperm.xlu1 %6373, %v2077_v10  }
 0x252   :  { %2282 = vperm.xlu0 %6372, %v2078_v8   ;;  %v6200_v38 = vpop.f32.mrb[62].mxu1 }
 0x253   :  { %v1751_v15 = vpop.f32.mrb[63].mxu1  ;;  %v2081_v6 = vmul.f32 0.0051020407, %v6200_v38 }
 0x254   :  { %v2080_v31 = vmul.f32 0.0051020407, %v1751_v15 }
 0x255   :  { %2287 = vperm.xlu1 %6373, %v2079_v63   ;;  %v7390_v63 = vpop.f32.mrb[68].mxu0 }
 0x256   :  { %2292 = vperm.xlu0 %6372, %v2080_v31   ;;  %v6203_v51 = vpop.f32.mrb[64].mxu1  ;;  %v7392_v53 = vpop.f32.mrb[69].mxu0 }
 0x257   :  { %v1761_v45 = vpop.f32.mrb[65].mxu1  ;;  %v2083_v59 = vmul.f32 0.0051020407, %v6203_v51  ;;  %v7394_v61 = vpop.f32.mrb[70].mxu0 }
 0x258   :  { %v2082_v5 = vmul.f32 0.0051020407, %v1761_v45  ;;  %v7396_v3 = vpop.f32.mrb[71].mxu0 }
 0x259   :  { %2297 = vperm.xlu1 %6373, %v2081_v6   ;;  %v7398_v6 = vpop.f32.mrb[72].mxu0 }
 0x25a   :  { %2302 = vperm.xlu0 %6372, %v2082_v5   ;;  %v6206_v10 = vpop.f32.mrb[66].mxu1  ;;  %10924 = vst [vmem:[#allocation27_spill] sm:$0xff] %v7398_v6 }
 0x25b   :  { %v1771_v8 = vpop.f32.mrb[67].mxu1  ;;  %v2085_v38 = vmul.f32 0.0051020407, %v6206_v10  ;;  %v7400_v10 = vpop.f32.mrb[73].mxu0 }
 0x25c   :  { %v2084_v15 = vmul.f32 0.0051020407, %v1771_v8  ;;  %v7402_v8 = vpop.f32.mrb[74].mxu0 }
 0x25d   :  { %2307 = vperm.xlu1 %6373, %v2083_v59   ;;  %10925 = vst [vmem:[#allocation28_spill] sm:$0xff] %v7402_v8  ;;  %v7404_v54 = vpop.f32.mrb[75].mxu0 }
 0x25e   :  { %2312 = vperm.xlu0 %6372, %v2084_v15   ;;  %v6209_v31 = vpop.f32.mrb[68].mxu1  ;;  %10926 = vst [vmem:[#allocation29_spill] sm:$0xff] %v7404_v54  ;;  %v7406_v18 = vpop.f32.mrb[76].mxu0 }
 0x25f   :  { %v1781_v17 = vpop.f32.mrb[69].mxu1  ;;  %v2087_v51 = vmul.f32 0.0051020407, %v6209_v31  ;;  %10927 = vst [vmem:[#allocation30_spill] sm:$0xff] %v7406_v18  ;;  %v7408_v31 = vpop.f32.mrb[77].mxu0 }
 0x260   :  { %v2086_v45 = vmul.f32 0.0051020407, %v1781_v17  ;;  %10928 = vst [vmem:[#allocation31_spill] sm:$0xff] %v7408_v31  ;;  %v7410_v48 = vpop.f32.mrb[78].mxu0 }
 0x261   :  { %2317 = vperm.xlu1 %6373, %v2085_v38   ;;  %10929 = vst [vmem:[#allocation32_spill] sm:$0xff] %v7410_v48  ;;  %v7412_v13 = vpop.f32.mrb[79].mxu0 }
 0x262   :  { %2322 = vperm.xlu0 %6372, %v2086_v45   ;;  %v6212_v5 = vpop.f32.mrb[70].mxu1  ;;  %10930 = vst [vmem:[#allocation33_spill] sm:$0xff] %v7412_v13  ;;  %v7414_v8 = vpop.f32.mrb[80].mxu0 }
 0x263   :  { %v1791_v59 = vpop.f32.mrb[71].mxu1  ;;  %v2089_v58 = vmul.f32 0.0051020407, %v6212_v5  ;;  %10931 = vst [vmem:[#allocation34_spill] sm:$0xff] %v7414_v8  ;;  %v7416_v5 = vpop.f32.mrb[81].mxu0 }
 0x264   :  { %v2088_v15 = vmul.f32 0.0051020407, %v1791_v59  ;;  %10932 = vst [vmem:[#allocation35_spill] sm:$0xff] %v7416_v5  ;;  %v7418_v18 = vpop.f32.mrb[82].mxu0 }
 0x265   :  { %2327 = vperm.xlu1 %6373, %v2087_v51   ;;  %10933 = vst [vmem:[#allocation36_spill] sm:$0xff] %v7418_v18  ;;  %v7420_v54 = vpop.f32.mrb[83].mxu0 }
 0x266   :  { %2332 = vperm.xlu0 %6372, %v2088_v15   ;;  %v6215_v17 = vpop.f32.mrb[72].mxu1  ;;  %10934 = vst [vmem:[#allocation37_spill] sm:$0xff] %v7420_v54  ;;  %v7422_v48 = vpop.f32.mrb[84].mxu0 }
 0x267   :  { %v1801_v38 = vpop.f32.mrb[73].mxu1  ;;  %v2091_v6 = vmul.f32 0.0051020407, %v6215_v17  ;;  %10935 = vst [vmem:[#allocation38_spill] sm:$0xff] %v7422_v48  ;;  %v7424_v17 = vpop.f32.mrb[85].mxu0 }
 0x268   :  { %v2090_v45 = vmul.f32 0.0051020407, %v1801_v38  ;;  %10936 = vst [vmem:[#allocation39_spill] sm:$0xff] %v7424_v17  ;;  %v7426_v8 = vpop.f32.mrb[86].mxu0 }
 0x269   :  { %2337 = vperm.xlu1 %6373, %v2089_v58   ;;  %10937 = vst [vmem:[#allocation40_spill] sm:$0xff] %v7426_v8  ;;  %v7428_v13 = vpop.f32.mrb[87].mxu0 }
 0x26a   :  { %2342 = vperm.xlu0 %6372, %v2090_v45   ;;  %v6218_v59 = vpop.f32.mrb[74].mxu1  ;;  %10938 = vst [vmem:[#allocation41_spill] sm:$0xff] %v7428_v13  ;;  %v7430_v18 = vpop.f32.mrb[88].mxu0 }
 0x26b   :  { %v1811_v51 = vpop.f32.mrb[75].mxu1  ;;  %v2093_v31 = vmul.f32 0.0051020407, %v6218_v59  ;;  %10939 = vst [vmem:[#allocation42_spill] sm:$0xff] %v7430_v18  ;;  %v7432_v59 = vpop.f32.mrb[89].mxu0 }
 0x26c   :  { %v2092_v15 = vmul.f32 0.0051020407, %v1811_v51  ;;  %10940 = vst [vmem:[#allocation43_spill] sm:$0xff] %v7432_v59  ;;  %v7434_v48 = vpop.f32.mrb[90].mxu0 }
 0x26d   :  { %2347 = vperm.xlu1 %6373, %v2091_v6   ;;  %10941 = vst [vmem:[#allocation44_spill] sm:$0xff] %v7434_v48  ;;  %v7436_v54 = vpop.f32.mrb[91].mxu0 }
 0x26e   :  { %2352 = vperm.xlu0 %6372, %v2092_v15   ;;  %v6221_v38 = vpop.f32.mrb[76].mxu1  ;;  %10942 = vst [vmem:[#allocation45_spill] sm:$0xff] %v7436_v54  ;;  %v7438_v8 = vpop.f32.mrb[92].mxu0 }
 0x26f   :  { %v1821_v58 = vpop.f32.mrb[77].mxu1  ;;  %v2095_v5 = vmul.f32 0.0051020407, %v6221_v38  ;;  %10943 = vst [vmem:[#allocation46_spill] sm:$0xff] %v7438_v8  ;;  %v7440_v38 = vpop.f32.mrb[93].mxu0 }
 0x270   :  { %v2094_v45 = vmul.f32 0.0051020407, %v1821_v58  ;;  %10944 = vst [vmem:[#allocation47_spill] sm:$0xff] %v7440_v38  ;;  %v7442_v18 = vpop.f32.mrb[94].mxu0 }
 0x271   :  { %2357 = vperm.xlu1 %6373, %v2093_v31   ;;  %10945 = vst [vmem:[#allocation48_spill] sm:$0xff] %v7442_v18  ;;  %v7444_v13 = vpop.f32.mrb[95].mxu0 }
 0x272   :  { %2362 = vperm.xlu0 %6372, %v2094_v45   ;;  %v6224_v51 = vpop.f32.mrb[78].mxu1  ;;  %10946 = vst [vmem:[#allocation49_spill] sm:$0xff] %v7444_v13  ;;  %v7446_v48 = vpop.f32.mrb[96].mxu0 }
 0x273   :  { %v1831_v6 = vpop.f32.mrb[79].mxu1  ;;  %v2097_v17 = vmul.f32 0.0051020407, %v6224_v51  ;;  %10947 = vst [vmem:[#allocation50_spill] sm:$0xff] %v7446_v48  ;;  %v7448_v51 = vpop.f32.mrb[97].mxu0 }
 0x274   :  { %v2096_v15 = vmul.f32 0.0051020407, %v1831_v6  ;;  %10948 = vst [vmem:[#allocation51_spill] sm:$0xff] %v7448_v51  ;;  %v7450_v8 = vpop.f32.mrb[98].mxu0 }
 0x275   :  { %2367 = vperm.xlu1 %6373, %v2095_v5   ;;  %10949 = vst [vmem:[#allocation52_spill] sm:$0xff] %v7450_v8  ;;  %v7452_v54 = vpop.f32.mrb[99].mxu0 }
 0x276   :  { %2372 = vperm.xlu0 %6372, %v2096_v15   ;;  %v6227_v58 = vpop.f32.mrb[80].mxu1  ;;  %10950 = vst [vmem:[#allocation53_spill] sm:$0xff] %v7452_v54  ;;  %v7454_v18 = vpop.f32.mrb[100].mxu0 }
 0x277   :  { %v1841_v31 = vpop.f32.mrb[81].mxu1  ;;  %v2099_v59 = vmul.f32 0.0051020407, %v6227_v58  ;;  %10951 = vst [vmem:[#allocation54_spill] sm:$0xff] %v7454_v18  ;;  %v7456_v58 = vpop.f32.mrb[101].mxu0 }
 0x278   :  { %v2098_v45 = vmul.f32 0.0051020407, %v1841_v31  ;;  %10952 = vst [vmem:[#allocation55_spill] sm:$0xff] %v7456_v58  ;;  %v7458_v48 = vpop.f32.mrb[102].mxu0 }
 0x279   :  { %2377 = vperm.xlu1 %6373, %v2097_v17   ;;  %10953 = vst [vmem:[#allocation56_spill] sm:$0xff] %v7458_v48  ;;  %v7460_v13 = vpop.f32.mrb[103].mxu0 }
 0x27a   :  { %2382 = vperm.xlu0 %6372, %v2098_v45   ;;  %v6230_v6 = vpop.f32.mrb[82].mxu1  ;;  %10954 = vst [vmem:[#allocation57_spill] sm:$0xff] %v7460_v13  ;;  %v7462_v8 = vpop.f32.mrb[104].mxu0 }
 0x27b   :  { %v1851_v5 = vpop.f32.mrb[83].mxu1  ;;  %v2101_v38 = vmul.f32 0.0051020407, %v6230_v6  ;;  %10955 = vst [vmem:[#allocation58_spill] sm:$0xff] %v7462_v8  ;;  %v7464_v6 = vpop.f32.mrb[105].mxu0 }
 0x27c   :  { %v2100_v15 = vmul.f32 0.0051020407, %v1851_v5  ;;  %10956 = vst [vmem:[#allocation59_spill] sm:$0xff] %v7464_v6  ;;  %v7466_v18 = vpop.f32.mrb[106].mxu0 }
 0x27d   :  { %2387 = vperm.xlu1 %6373, %v2099_v59   ;;  %10957 = vst [vmem:[#allocation60_spill] sm:$0xff] %v7466_v18  ;;  %v7468_v54 = vpop.f32.mrb[107].mxu0 }
 0x27e   :  { %2392 = vperm.xlu0 %6372, %v2100_v15   ;;  %v6233_v31 = vpop.f32.mrb[84].mxu1  ;;  %10958 = vst [vmem:[#allocation61_spill] sm:$0xff] %v7468_v54  ;;  %v7470_v48 = vpop.f32.mrb[108].mxu0 }
 0x27f   :  { %v1861_v17 = vpop.f32.mrb[85].mxu1  ;;  %v2103_v51 = vmul.f32 0.0051020407, %v6233_v31  ;;  %10959 = vst [vmem:[#allocation62_spill] sm:$0xff] %v7470_v48  ;;  %v7472_v31 = vpop.f32.mrb[109].mxu0 }
 0x280   :  { %v2102_v45 = vmul.f32 0.0051020407, %v1861_v17  ;;  %10960 = vst [vmem:[#allocation63_spill] sm:$0xff] %v7472_v31  ;;  %v7474_v8 = vpop.f32.mrb[110].mxu0 }
 0x281   :  { %2397 = vperm.xlu1 %6373, %v2101_v38   ;;  %10961 = vst [vmem:[#allocation64_spill] sm:$0xff] %v7474_v8  ;;  %v7476_v13 = vpop.f32.mrb[111].mxu0 }
 0x282   :  { %2402 = vperm.xlu0 %6372, %v2102_v45   ;;  %v6236_v5 = vpop.f32.mrb[86].mxu1  ;;  %10962 = vst [vmem:[#allocation65_spill] sm:$0xff] %v7476_v13  ;;  %v7478_v18 = vpop.f32.mrb[112].mxu0 }
 0x283   :  { %v1871_v59 = vpop.f32.mrb[87].mxu1  ;;  %v2105_v58 = vmul.f32 0.0051020407, %v6236_v5  ;;  %10963 = vst [vmem:[#allocation66_spill] sm:$0xff] %v7478_v18  ;;  %v7480_v5 = vpop.f32.mrb[113].mxu0 }
 0x284   :  { %v2104_v15 = vmul.f32 0.0051020407, %v1871_v59  ;;  %10964 = vst [vmem:[#allocation67_spill] sm:$0xff] %v7480_v5  ;;  %v7482_v48 = vpop.f32.mrb[114].mxu0 }
 0x285   :  { %2407 = vperm.xlu1 %6373, %v2103_v51   ;;  %10965 = vst [vmem:[#allocation68_spill] sm:$0xff] %v7482_v48  ;;  %v7484_v54 = vpop.f32.mrb[115].mxu0 }
 0x286   :  { %2412 = vperm.xlu0 %6372, %v2104_v15   ;;  %v6239_v17 = vpop.f32.mrb[88].mxu1  ;;  %10966 = vst [vmem:[#allocation69_spill] sm:$0xff] %v7484_v54  ;;  %v7486_v8 = vpop.f32.mrb[116].mxu0 }
 0x287   :  { %v1881_v38 = vpop.f32.mrb[89].mxu1  ;;  %v2107_v6 = vmul.f32 0.0051020407, %v6239_v17  ;;  %10967 = vst [vmem:[#allocation70_spill] sm:$0xff] %v7486_v8  ;;  %v7488_v17 = vpop.f32.mrb[117].mxu0 }
 0x288   :  { %v2106_v45 = vmul.f32 0.0051020407, %v1881_v38  ;;  %10968 = vst [vmem:[#allocation71_spill] sm:$0xff] %v7488_v17  ;;  %v7490_v18 = vpop.f32.mrb[118].mxu0 }
 0x289   :  { %2417 = vperm.xlu1 %6373, %v2105_v58   ;;  %10969 = vst [vmem:[#allocation72_spill] sm:$0xff] %v7490_v18  ;;  %v7492_v13 = vpop.f32.mrb[119].mxu0 }
 0x28a   :  { %2422 = vperm.xlu0 %6372, %v2106_v45   ;;  %v6242_v59 = vpop.f32.mrb[90].mxu1  ;;  %10970 = vst [vmem:[#allocation73_spill] sm:$0xff] %v7492_v13  ;;  %v7494_v48 = vpop.f32.mrb[120].mxu0 }
 0x28b   :  { %v1891_v51 = vpop.f32.mrb[91].mxu1  ;;  %v2109_v31 = vmul.f32 0.0051020407, %v6242_v59  ;;  %10971 = vst [vmem:[#allocation74_spill] sm:$0xff] %v7494_v48  ;;  %v7496_v59 = vpop.f32.mrb[121].mxu0 }
 0x28c   :  { %v2108_v15 = vmul.f32 0.0051020407, %v1891_v51  ;;  %10972 = vst [vmem:[#allocation75_spill] sm:$0xff] %v7496_v59  ;;  %v7498_v8 = vpop.f32.mrb[122].mxu0 }
 0x28d   :  { %2427 = vperm.xlu1 %6373, %v2107_v6   ;;  %10973 = vst [vmem:[#allocation76_spill] sm:$0xff] %v7498_v8  ;;  %v7500_v54 = vpop.f32.mrb[123].mxu0 }
 0x28e   :  { %2432 = vperm.xlu0 %6372, %v2108_v15   ;;  %v6245_v38 = vpop.f32.mrb[92].mxu1  ;;  %10974 = vst [vmem:[#allocation77_spill] sm:$0xff] %v7500_v54  ;;  %v7502_v18 = vpop.f32.mrb[124].mxu0 }
 0x28f   :  { %v1901_v58 = vpop.f32.mrb[93].mxu1  ;;  %v2111_v5 = vmul.f32 0.0051020407, %v6245_v38  ;;  %10975 = vst [vmem:[#allocation78_spill] sm:$0xff] %v7502_v18  ;;  %v7504_v38 = vpop.f32.mrb[125].mxu0 }
 0x290   :  { %v2110_v45 = vmul.f32 0.0051020407, %v1901_v58  ;;  %10976 = vst [vmem:[#allocation79_spill] sm:$0xff] %v7504_v38  ;;  %v7509_v59 = vpop.f32.mrb[126].mxu0 }
 0x291   :  { %2437 = vperm.xlu1 %6373, %v2109_v31   ;;  %v4818_v31 = vld [vmem:[%s10673_s3] sm:$0xff]  ;;  %10977 = vst [vmem:[#allocation80_spill] sm:$0xff] %v7509_v59 }
 0x292   :  { %2442 = vperm.xlu0 %6372, %v2110_v45   ;;  %v6248_v51 = vpop.f32.mrb[94].mxu1 }
 0x293   :  { %v1911_v6 = vpop.f32.mrb[95].mxu1  ;;  %v2113_v17 = vmul.f32 0.0051020407, %v6248_v51 }
 0x294   :  { %v2112_v15 = vmul.f32 0.0051020407, %v1911_v6  ;;  %v7511_v6 = vpop.f32.mrb[127].mxu0 }
 0x295   :  { %2447 = vperm.xlu1 %6373, %v2111_v5   ;;  %10978 = vst [vmem:[#allocation81_spill] sm:$0xff] %v7511_v6  ;;  %v4819_v5 = vld [vmem:[%s10673_s3 + $0x8] sm:$0xff] }
 0x296   :  { %2452 = vperm.xlu0 %6372, %v2112_v15   ;;  %v6251_v58 = vpop.f32.mrb[96].mxu1 }
 0x297   :  { %v1921_v45 = vpop.f32.mrb[97].mxu1  ;;  %v2115_v13 = vmul.f32 0.0051020407, %v6251_v58 }
 0x298   :  { %v2148_v48 = vpop.permute.xlu0 %2147  ;;  %v2114_v51 = vmul.f32 0.0051020407, %v1921_v45 }
 0x299   :  { %2457 = vperm.xlu1 %6373, %v2113_v17   ;;  %v7517_v54 = vsub.f32 %v7212_v57, %v2148_v48 }
 0x29a   :  { %4910 = vperm.xlu0 %6372, %v4818_v31   ;;  %v6254_v15 = vpop.f32.mrb[98].mxu1  ;;  %v7525_v31 = vpop.f32.mrb[128].mxu0 }
 0x29b   :  { %v1931_v18 = vpop.f32.mrb[99].mxu1  ;;  %10979 = vst [vmem:[#allocation82_spill] sm:$0xff] %v7517_v54  ;;  %10982 = vst [vmem:[#allocation85_spill] sm:$0xff] %v7525_v31  ;;  %v7527_v59 = vpop.f32.mrb[129].mxu0 }
 0x29c   :  { %v2143_v38 = vpop.permute.xlu0 %2142  ;;  %v2158_v8 = vpop.permute.xlu1 %2157  ;;  %10983 = vst [vmem:[#allocation86_spill] sm:$0xff] %v7527_v59  ;;  %v2116_v59 = vmul.f32 0.0051020407, %v1931_v18 }
 0x29d   :  { %v7520_v16 = vsub.f32 %v7202_v46, %v2143_v38  ;;  %v7523_v17 = vsub.f32 %v7207_v55, %v2143_v38  ;;  %4915 = vperm.xlu1 %6373, %v4819_v5   ;;  %v4820_v46 = vld [vmem:[%s10673_s3 + $0x10] sm:$0xff]  ;;  %v7537_v55 = vsub.f32 %v7209_v52, %v2148_v48  ;;  %v7539_v5 = vpop.f32.mrb[130].mxu0  ;;  %v4821_v52 = vld [vmem:[%s10673_s3 + $0x18] sm:$0xff]  ;;  %v7563_v18 = vsub.f32 %v7232_v4, %v2158_v8 }
 0x29e   :  { %2462 = vperm.xlu0 %6372, %v2114_v51   ;;  %v6257_v45 = vpop.f32.mrb[100].mxu1  ;;  %10985 = vst [vmem:[#allocation88_spill] sm:$0xff] %v7539_v5  ;;  %v2773_v51 = vmul.f32 %v7517_v54, %v7517_v54 }
 0x29f   :  { %10980 = vst [vmem:[#allocation83_spill] sm:$0xff] %v7520_v16  ;;  %10981 = vst [vmem:[#allocation84_spill] sm:$0xff] %v7523_v17  ;;  %v2770_v6 = vmul.f32 %v7520_v16, %v7520_v16  ;;  %v2771_v57 = vmul.f32 %v7523_v17, %v7523_v17  ;;  %v1941_v58 = vpop.f32.mrb[101].mxu1  ;;  %v7547_v17 = vpop.f32.mrb[131].mxu0 }
 0x2a0   :  { %10984 = vst [vmem:[#allocation87_spill] sm:$0xff] %v7537_v55  ;;  %v2153_v38 = vpop.permute.xlu1 %2152  ;;  %10987 = vst [vmem:[#allocation90_spill] sm:$0xff] %v7547_v17  ;;  %v7560_v5 = vpop.f32.mrb[132].mxu0 }
 0x2a1   :  { %v7544_v31 = vsub.f32 %v7227_v1, %v2153_v38  ;;  %v2163_v16 = vpop.permute.xlu0 %2162  ;;  %2467 = vperm.xlu1 %6373, %v2115_v13   ;;  %5928 = vmatprep.mubr.msk.f32.mxu0 %vm1051_vm0, %v2771_v57  ;;  %v7556_v1 = vsub.f32 %v7222_v62, %v2153_v38  ;;  %v2772_v57 = vmul.f32 %v7537_v55, %v7537_v55  ;;  %v7569_v62 = vpop.f32.mrb[133].mxu0  ;;  %v4822_v38 = vld [vmem:[%s10673_s3 + $0x20] sm:$0xff] }
 0x2a2   :  { %4920 = vperm.xlu0 %6372, %v4820_v46   ;;  %3288 = vmatmul.mubr.f32.vlgmr.msra.gmra.mrb[180].mxu0 %v2770_v6  ;;  %v7552_v48 = vpop.f32.mrb[102].mxu1  ;;  %10989 = vst [vmem:[#allocation92_spill] sm:$0xff] %v7560_v5  ;;  %10990 = vst [vmem:[#allocation93_spill] sm:$0xff] %v7563_v18  ;;  %v2117_v46 = vmul.f32 0.0051020407, %v6254_v15  ;;  %v7578_v55 = vsub.f32 %v7229_v2, %v2158_v8  ;;  %v4823_v8 = vld [vmem:[%s10673_s3 + $0x28] sm:$0xff] }
 0x2a3   :  { %10986 = vst [vmem:[#allocation89_spill] sm:$0xff] %v7544_v31  ;;  %5929 = vmatprep.mubr.msk.f32.mxu0 %vm1051_vm0, %v2773_v51  ;;  %v1951_v54 = vpop.f32.mrb[103].mxu1  ;;  %10988 = vst [vmem:[#allocation91_spill] sm:$0xff] %v7556_v1  ;;  %v2775_v6 = vmul.f32 %v7544_v31, %v7544_v31  ;;  %v2118_v2 = vmul.f32 0.0051020407, %v1941_v58 }
 0x2a4   :  { %v2168_v13 = vpop.permute.xlu1 %2167  ;;  %10991 = vst [vmem:[#allocation94_spill] sm:$0xff] %v7578_v55 }
 0x2a5   :  { %v2173_v17 = vpop.permute.xlu0 %2172  ;;  %4925 = vperm.xlu1 %6373, %v4821_v52   ;;  %v7584_v52 = vpop.f32.mrb[134].mxu0 }
 0x2a6   :  { %2472 = vperm.xlu0 %6372, %v2116_v59   ;;  %3293 = vmatmul.mubr.f32.gmra.mrb[182].mxu0 %v2772_v57  ;;  %v7567_v51 = vpop.f32.mrb[104].mxu1  ;;  %v2774_v59 = vmul.f32 %v7556_v1, %v7556_v1  ;;  %10992 = vst [vmem:[#allocation95_spill] sm:$0xff] %v7584_v52  ;;  %v2777_v57 = vmul.f32 %v7563_v18, %v7563_v18  ;;  %v7593_v5 = vpop.f32.mrb[135].mxu0 }
 0x2a7   :  { %5930 = vmatprep.mubr.msk.f32.mxu0 %vm1051_vm0, %v2775_v6  ;;  %v7575_v4 = vpop.f32.mrb[105].mxu1  ;;  %v7589_v6 = vsub.f32 %v7247_v11, %v2163_v16  ;;  %10994 = vst [vmem:[#allocation97_spill] sm:$0xff] %v7593_v5  ;;  %v7604_v11 = vsub.f32 %v7242_v9, %v2163_v16  ;;  %v2119_v5 = vmul.f32 0.0051020407, %v6257_v45 }
 0x2a8   :  { %v7580_v15 = vpop.permute.xlu1 %2177 }
 0x2a9   :  { %10993 = vst [vmem:[#allocation96_spill] sm:$0xff] %v7589_v6  ;;  %v7591_v31 = vpop.permute.xlu0 %2182  ;;  %2477 = vperm.xlu1 %6373, %v2117_v46   ;;  %10995 = vst [vmem:[#allocation98_spill] sm:$0xff] %v7604_v11  ;;  %v2776_v46 = vmul.f32 %v7578_v55, %v7578_v55  ;;  %v2779_v58 = vmul.f32 %v7589_v6, %v7589_v6  ;;  %v4824_v55 = vld [vmem:[%s10673_s3 + $0x30] sm:$0xff] }
 0x2aa   :  { %4930 = vperm.xlu0 %6372, %v4822_v38   ;;  %3298 = vmatmul.mubr.f32.gmra.mrb[184].mxu0 %v2774_v59  ;;  %v7598_v1 = vpop.f32.mrb[106].mxu1  ;;  %v7610_v38 = vpop.f32.mrb[136].mxu0  ;;  %v7615_v59 = vsub.f32 %v7252_v14, %v2168_v13  ;;  %v7630_v14 = vsub.f32 %v7249_v12, %v2168_v13  ;;  %v2120_v12 = vmul.f32 0.0051020407, %v1951_v54  ;;  %v4825_v13 = vld [vmem:[%s10673_s3 + $0x38] sm:$0xff] }
 0x2ab   :  { %5931 = vmatprep.mubr.msk.f32.mxu0 %vm1051_vm0, %v2777_v57  ;;  %v7601_v18 = vpop.f32.mrb[107].mxu1  ;;  %10996 = vst [vmem:[#allocation99_spill] sm:$0xff] %v7610_v38  ;;  %v7621_v16 = vpop.f32.mrb[137].mxu0 }
 0x2ac   :  { %v7606_v52 = vpop.permute.xlu1 %2187  ;;  %10997 = vst [vmem:[#allocation100_spill] sm:$0xff] %v7615_v59  ;;  %10998 = vst [vmem:[#allocation101_spill] sm:$0xff] %v7621_v16 }
 0x2ad   :  { %v7617_v57 = vpop.permute.xlu0 %2192  ;;  %4935 = vperm.xlu1 %6373, %v4823_v8   ;;  %10999 = vst [vmem:[#allocation102_spill] sm:$0xff] %v7630_v14  ;;  %v7636_v8 = vpop.f32.mrb[138].mxu0 }
 0x2ae   :  { %2482 = vperm.xlu0 %6372, %v2118_v2   ;;  %3303 = vmatmul.mubr.f32.gmra.mrb[186].mxu0 %v2776_v46  ;;  %v7619_v9 = vpop.f32.mrb[108].mxu1  ;;  %v2778_v2 = vmul.f32 %v7604_v11, %v7604_v11  ;;  %11000 = vst [vmem:[#allocation103_spill] sm:$0xff] %v7636_v8  ;;  %v2781_v46 = vmul.f32 %v7615_v59, %v7615_v59  ;;  %v7645_v16 = vpop.f32.mrb[139].mxu0 }
 0x2af   :  { %5932 = vmatprep.mubr.msk.f32.mxu0 %vm1051_vm0, %v2779_v58  ;;  %v7627_v6 = vpop.f32.mrb[109].mxu1  ;;  %v7641_v58 = vsub.f32 %v7264_v20, %v2173_v17  ;;  %11002 = vst [vmem:[#allocation105_spill] sm:$0xff] %v7645_v16  ;;  %v7656_v20 = vsub.f32 %v7262_v19, %v2173_v17 }
 0x2b0   :  { %v7632_v45 = vpop.permute.xlu1 %2197 }
 0x2b1   :  { %11001 = vst [vmem:[#allocation104_spill] sm:$0xff] %v7641_v58  ;;  %v7643_v38 = vpop.permute.xlu0 %2202  ;;  %2487 = vperm.xlu1 %6373, %v2119_v5   ;;  %11003 = vst [vmem:[#allocation106_spill] sm:$0xff] %v7656_v20  ;;  %v7662_v5 = vpop.f32.mrb[140].mxu0  ;;  %v2783_v54 = vmul.f32 %v7641_v58, %v7641_v58  ;;  %v4826_v58 = vld [vmem:[%s10673_s3 + $0x40] sm:$0xff] }
 0x2b2   :  { %4940 = vperm.xlu0 %6372, %v4824_v55   ;;  %3308 = vmatmul.mubr.f32.gmra.mrb[188].mxu0 %v2778_v2  ;;  %v7650_v11 = vpop.f32.mrb[110].mxu1  ;;  %v2780_v55 = vmul.f32 %v7630_v14, %v7630_v14  ;;  %11004 = vst [vmem:[#allocation107_spill] sm:$0xff] %v7662_v5  ;;  %v7668_v2 = vsub.f32 %v7269_v22, %v7580_v15  ;;  %v7675_v17 = vpop.f32.mrb[141].mxu0 }
 0x2b3   :  { %5933 = vmatprep.mubr.msk.f32.mxu0 %vm1051_vm0, %v2781_v46  ;;  %v7653_v59 = vpop.f32.mrb[111].mxu1  ;;  %v2121_v46 = vmul.f32 0.0051020407, %v7552_v48  ;;  %11006 = vst [vmem:[#allocation109_spill] sm:$0xff] %v7675_v17  ;;  %v7685_v22 = vsub.f32 %v7266_v21, %v7580_v15  ;;  %v2122_v21 = vmul.f32 0.0051020407, %v7575_v4 }
 0x2b4   :  { %v7658_v8 = vpop.permute.xlu1 %2207  ;;  %11005 = vst [vmem:[#allocation108_spill] sm:$0xff] %v7668_v2  ;;  %v4827_v15 = vld [vmem:[%s10673_s3 + $0x48] sm:$0xff] }
 0x2b5   :  { %v7671_v16 = vpop.permute.xlu0 %2212  ;;  %4945 = vperm.xlu1 %6373, %v4825_v13   ;;  %11007 = vst [vmem:[#allocation110_spill] sm:$0xff] %v7685_v22  ;;  %v7691_v13 = vpop.f32.mrb[142].mxu0 }
 0x2b6   :  { %2492 = vperm.xlu0 %6372, %v2120_v12   ;;  %3313 = vmatmul.mubr.f32.gmra.mrb[190].mxu0 %v2780_v55  ;;  %v7673_v19 = vpop.f32.mrb[112].mxu1  ;;  %v2782_v12 = vmul.f32 %v7656_v20, %v7656_v20  ;;  %11008 = vst [vmem:[#allocation111_spill] sm:$0xff] %v7691_v13  ;;  %v2785_v55 = vmul.f32 %v7668_v2, %v7668_v2  ;;  %v7701_v17 = vpop.f32.mrb[143].mxu0 }
 0x2b7   :  { %5934 = vmatprep.mubr.msk.f32.mxu0 %vm1051_vm0, %v2783_v54  ;;  %v7681_v14 = vpop.f32.mrb[113].mxu1  ;;  %v7697_v54 = vsub.f32 %v7277_v34, %v7591_v31  ;;  %11010 = vst [vmem:[#allocation113_spill] sm:$0xff] %v7701_v17  ;;  %v7714_v34 = vsub.f32 %v7275_v33, %v7591_v31  ;;  %v7720_v4 = vpop.f32.mrb[144].mxu0  ;;  %v7726_v13 = vsub.f32 %v7281_v35, %v7606_v52 }
 0x2b8   :  { %v7687_v48 = vpop.permute.xlu1 %2217  ;;  %11012 = vst [vmem:[#allocation115_spill] sm:$0xff] %v7720_v4  ;;  %v7733_v31 = vpop.f32.mrb[145].mxu0  ;;  %v7743_v35 = vsub.f32 %v7279_v24, %v7606_v52  ;;  %v2124_v24 = vmul.f32 0.0051020407, %v7601_v18  ;;  %v4829_v52 = vld [vmem:[%s10673_s3 + $0x58] sm:$0xff] }
 0x2b9   :  { %11009 = vst [vmem:[#allocation112_spill] sm:$0xff] %v7697_v54  ;;  %v7699_v5 = vpop.permute.xlu0 %2222  ;;  %2497 = vperm.xlu1 %6373, %v2121_v46   ;;  %11011 = vst [vmem:[#allocation114_spill] sm:$0xff] %v7714_v34 }
 0x2ba   :  { %4950 = vperm.xlu0 %6372, %v4826_v58   ;;  %3318 = vmatmul.mubr.f32.gmra.mrb[192].mxu0 %v2782_v12  ;;  %v7707_v20 = vpop.f32.mrb[114].mxu1  ;;  %v2784_v58 = vmul.f32 %v7685_v22, %v7685_v22  ;;  %v2787_v12 = vmul.f32 %v7697_v54, %v7697_v54  ;;  %11013 = vst [vmem:[#allocation116_spill] sm:$0xff] %v7726_v13  ;;  %11014 = vst [vmem:[#allocation117_spill] sm:$0xff] %v7733_v31  ;;  %v4828_v54 = vld [vmem:[%s10673_s3 + $0x50] sm:$0xff] }
 0x2bb   :  { %5935 = vmatprep.mubr.msk.f32.mxu0 %vm1051_vm0, %v2785_v55  ;;  %v7710_v2 = vpop.f32.mrb[115].mxu1  ;;  %v2123_v55 = vmul.f32 0.0051020407, %v7567_v51  ;;  %11015 = vst [vmem:[#allocation118_spill] sm:$0xff] %v7743_v35 }
 0x2bc   :  { %v7716_v46 = vpop.permute.xlu1 %2227 }
 0x2bd   :  { %v7729_v17 = vpop.permute.xlu0 %2232  ;;  %4955 = vperm.xlu1 %6373, %v4827_v15   ;;  %v7749_v15 = vpop.f32.mrb[146].mxu0 }
 0x2be   :  { %2502 = vperm.xlu0 %6372, %v2122_v21   ;;  %3323 = vmatmul.mubr.f32.gmra.mrb[194].mxu0 %v2784_v58  ;;  %v7731_v33 = vpop.f32.mrb[116].mxu1  ;;  %v2786_v21 = vmul.f32 %v7714_v34, %v7714_v34  ;;  %11016 = vst [vmem:[#allocation119_spill] sm:$0xff] %v7749_v15  ;;  %v2789_v58 = vmul.f32 %v7726_v13, %v7726_v13  ;;  %v7759_v31 = vpop.f32.mrb[147].mxu0 }
 0x2bf   :  { %5936 = vmatprep.mubr.msk.f32.mxu0 %vm1051_vm0, %v2787_v12  ;;  %v7739_v22 = vpop.f32.mrb[117].mxu1  ;;  %v7755_v12 = vsub.f32 %v7287_v25, %v7617_v57  ;;  %11018 = vst [vmem:[#allocation121_spill] sm:$0xff] %v7759_v31  ;;  %v7772_v25 = vsub.f32 %v7285_v36, %v7617_v57  ;;  %v7778_v18 = vpop.f32.mrb[148].mxu0  ;;  %v7784_v15 = vsub.f32 %v7291_v26, %v7632_v45 }
 0x2c0   :  { %v7745_v51 = vpop.permute.xlu1 %2237  ;;  %11020 = vst [vmem:[#allocation123_spill] sm:$0xff] %v7778_v18  ;;  %v7791_v57 = vpop.f32.mrb[149].mxu0  ;;  %v7801_v26 = vsub.f32 %v7289_v37, %v7632_v45  ;;  %v2126_v37 = vmul.f32 0.0051020407, %v7627_v6  ;;  %v4831_v45 = vld [vmem:[%s10673_s3 + $0x68] sm:$0xff] }
 0x2c1   :  { %11017 = vst [vmem:[#allocation120_spill] sm:$0xff] %v7755_v12  ;;  %v7757_v4 = vpop.permute.xlu0 %2242  ;;  %2507 = vperm.xlu1 %6373, %v2123_v55   ;;  %11019 = vst [vmem:[#allocation122_spill] sm:$0xff] %v7772_v25 }
 0x2c2   :  { %4960 = vperm.xlu0 %6372, %v4828_v54   ;;  %3328 = vmatmul.mubr.f32.gmra.mrb[196].mxu0 %v2786_v21  ;;  %v7765_v34 = vpop.f32.mrb[118].mxu1  ;;  %v2788_v54 = vmul.f32 %v7743_v35, %v7743_v35  ;;  %v2791_v21 = vmul.f32 %v7755_v12, %v7755_v12  ;;  %11021 = vst [vmem:[#allocation124_spill] sm:$0xff] %v7784_v15  ;;  %11022 = vst [vmem:[#allocation125_spill] sm:$0xff] %v7791_v57  ;;  %v4830_v12 = vld [vmem:[%s10673_s3 + $0x60] sm:$0xff] }
 0x2c3   :  { %5937 = vmatprep.mubr.msk.f32.mxu0 %vm1051_vm0, %v2789_v58  ;;  %v7768_v13 = vpop.f32.mrb[119].mxu1  ;;  %v2125_v58 = vmul.f32 0.0051020407, %v7598_v1  ;;  %11023 = vst [vmem:[#allocation126_spill] sm:$0xff] %v7801_v26 }
 0x2c4   :  { %v7774_v55 = vpop.permute.xlu1 %2247 }
 0x2c5   :  { %v7787_v31 = vpop.permute.xlu0 %2252  ;;  %4965 = vperm.xlu1 %6373, %v4829_v52   ;;  %v7807_v52 = vpop.f32.mrb[150].mxu0 }
 0x2c6   :  { %2512 = vperm.xlu0 %6372, %v2124_v24   ;;  %3333 = vmatmul.mubr.f32.gmra.mrb[198].mxu0 %v2788_v54  ;;  %v7789_v36 = vpop.f32.mrb[120].mxu1  ;;  %v2790_v24 = vmul.f32 %v7772_v25, %v7772_v25  ;;  %v2793_v54 = vmul.f32 %v7784_v15, %v7784_v15  ;;  %v7817_v57 = vpop.f32.mrb[151].mxu0  ;;  %v7826_v15 = vsub.f32 %v7295_v39, %v7643_v38 }
 0x2c7   :  { %5938 = vmatprep.mubr.msk.f32.mxu0 %vm1051_vm0, %v2791_v21  ;;  %v7797_v35 = vpop.f32.mrb[121].mxu1  ;;  %v7813_v21 = vsub.f32 %v7297_v40, %v7643_v38  ;;  %v7832_v25 = vpop.f32.mrb[152].mxu0  ;;  %v4832_v38 = vld [vmem:[%s10673_s3 + $0x70] sm:$0xff] }
 0x2c8   :  { %v7803_v1 = vpop.permute.xlu1 %2257  ;;  %11025 = vst [vmem:[#allocation128_spill] sm:$0xff] %v7826_v15  ;;  %v7843_v39 = vpop.f32.mrb[153].mxu0 }
 0x2c9   :  { %11024 = vst [vmem:[#allocation127_spill] sm:$0xff] %v7813_v21  ;;  %v7815_v18 = vpop.permute.xlu0 %2262  ;;  %2517 = vperm.xlu1 %6373, %v2125_v58   ;;  %v2792_v58 = vmul.f32 %v7801_v26, %v7801_v26  ;;  %v2795_v6 = vmul.f32 %v7813_v21, %v7813_v21  ;;  %v7851_v21 = vsub.f32 %v7299_v27, %v7658_v8  ;;  %v2128_v27 = vmul.f32 0.0051020407, %v7653_v59 }
 0x2ca   :  { %4970 = vperm.xlu0 %6372, %v4830_v12   ;;  %3338 = vmatmul.mubr.f32.gmra.mrb[200].mxu0 %v2790_v24  ;;  %v7838_v12 = vsub.f32 %v7301_v41, %v7658_v8  ;;  %v2127_v24 = vmul.f32 0.0051020407, %v7619_v9  ;;  %v2794_v9 = vmul.f32 %v7826_v15, %v7826_v15  ;;  %v4833_v8 = vld [vmem:[%s10673_s3 + $0x78] sm:$0xff] }
 0x2cb   :  { %5939 = vmatprep.mubr.msk.f32.mxu0 %vm1051_vm0, %v2793_v54  ;;  %11027 = vst [vmem:[#allocation130_spill] sm:$0xff] %v7851_v21 }
 0x2cc   :  { %v7828_v40 = vpop.permute.xlu1 %2267  ;;  %11026 = vst [vmem:[#allocation129_spill] sm:$0xff] %v7838_v12 }
 0x2cd   :  { %v7841_v54 = vpop.permute.xlu0 %2272  ;;  %4975 = vperm.xlu1 %6373, %v4831_v45   ;;  %v7857_v45 = vpop.f32.mrb[154].mxu0 }
 0x2ce   :  { %2522 = vperm.xlu0 %6372, %v2126_v37   ;;  %3343 = vmatmul.mubr.f32.gmra.mrb[202].mxu0 %v2792_v58  ;;  %v2797_v37 = vmul.f32 %v7838_v12, %v7838_v12  ;;  %v7863_v58 = vsub.f32 %v7307_v42, %v7671_v16  ;;  %v7867_v26 = vpop.f32.mrb[155].mxu0  ;;  %v7876_v12 = vsub.f32 %v7305_v28, %v7671_v16  ;;  %v4834_v16 = vld [vmem:[%s10673_s3 + $0x80] sm:$0xff] }
 0x2cf   :  { %5940 = vmatprep.mubr.msk.f32.mxu0 %vm1051_vm0, %v2795_v6  ;;  %v7882_v15 = vpop.f32.mrb[156].mxu0 }
 0x2d0   :  { %v7853_v41 = vpop.permute.xlu1 %2277  ;;  %11028 = vst [vmem:[#allocation131_spill] sm:$0xff] %v7863_v58  ;;  %11029 = vst [vmem:[#allocation132_spill] sm:$0xff] %v7876_v12  ;;  %v2799_v59 = vmul.f32 %v7863_v58, %v7863_v58  ;;  %v7893_v28 = vpop.f32.mrb[157].mxu0  ;;  %v7901_v58 = vsub.f32 %v7309_v43, %v7687_v48 }
 0x2d1   :  { %v7865_v6 = vpop.permute.xlu0 %2282  ;;  %2527 = vperm.xlu1 %6373, %v2127_v24   ;;  %v2796_v24 = vmul.f32 %v7851_v21, %v7851_v21 }
 0x2d2   :  { %4980 = vperm.xlu0 %6372, %v4832_v38   ;;  %3348 = vmatmul.mubr.f32.gmra.mrb[204].mxu0 %v2794_v9  ;;  %v7888_v38 = vsub.f32 %v7311_v29, %v7687_v48  ;;  %v2129_v9 = vmul.f32 0.0051020407, %v7650_v11  ;;  %11031 = vst [vmem:[#allocation134_spill] sm:$0xff] %v7901_v58  ;;  %v2798_v11 = vmul.f32 %v7876_v12, %v7876_v12  ;;  %v2130_v48 = vmul.f32 0.0051020407, %v7681_v14 }
 0x2d3   :  { %5941 = vmatprep.mubr.msk.f32.mxu0 %vm1051_vm0, %v2797_v37 }
 0x2d4   :  { %v7878_v42 = vpop.permute.xlu1 %2287  ;;  %11030 = vst [vmem:[#allocation133_spill] sm:$0xff] %v7888_v38 }
 0x2d5   :  { %v7891_v37 = vpop.permute.xlu0 %2292  ;;  %4985 = vperm.xlu1 %6373, %v4833_v8   ;;  %v7907_v8 = vpop.f32.mrb[158].mxu0 }
 0x2d6   :  { %2532 = vperm.xlu0 %6372, %v2128_v27   ;;  %3353 = vmatmul.mubr.f32.gmra.mrb[206].mxu0 %v2796_v24  ;;  %v2801_v27 = vmul.f32 %v7888_v38, %v7888_v38  ;;  %v7913_v24 = vsub.f32 %v7317_v30, %v7699_v5  ;;  %v7917_v21 = vpop.f32.mrb[159].mxu0  ;;  %v4835_v38 = vld [vmem:[%s10673_s3 + $0x88] sm:$0xff]  ;;  %v7930_v30 = vsub.f32 %v7315_v47, %v7699_v5 }
 0x2d7   :  { %5942 = vmatprep.mubr.msk.f32.mxu0 %vm1051_vm0, %v2799_v59 }
 0x2d8   :  { %v7903_v29 = vpop.permute.xlu1 %2297  ;;  %11032 = vst [vmem:[#allocation135_spill] sm:$0xff] %v7913_v24  ;;  %11034 = vst [vmem:[#allocation137_spill] sm:$0xff] %v7930_v30  ;;  %v2803_v14 = vmul.f32 %v7913_v24, %v7913_v24 }
 0x2d9   :  { %v7915_v59 = vpop.permute.xlu0 %2302  ;;  %2537 = vperm.xlu1 %6373, %v2129_v9   ;;  %v2131_v9 = vmul.f32 0.0051020407, %v7673_v19 }
 0x2da   :  { %v7921_v43 = vsub.f32 %v7382_v7, %v7915_v59  ;;  %4990 = vperm.xlu0 %6372, %v4834_v16   ;;  %3358 = vmatmul.mubr.f32.gmra.mrb[208].mxu0 %v2798_v11  ;;  %v2800_v7 = vmul.f32 %v7901_v58, %v7901_v58  ;;  %v7935_v16 = vpop.f32.mrb[160].mxu0  ;;  %v7941_v11 = vsub.f32 %v7321_v32, %v7716_v46 }
 0x2db   :  { %5943 = vmatprep.mubr.msk.f32.mxu0 %vm1051_vm0, %v2801_v27  ;;  %v7952_v58 = vpop.f32.mrb[161].mxu0 }
 0x2dc   :  { %11033 = vst [vmem:[#allocation136_spill] sm:$0xff] %v7921_v43  ;;  %v2308_v12 = vpop.permute.xlu1 %2307  ;;  %11035 = vst [vmem:[#allocation138_spill] sm:$0xff] %v7941_v11 }
 0x2dd   :  { %v7944_v27 = vsub.f32 %v7386_v23, %v2308_v12  ;;  %v7947_v47 = vsub.f32 %v7388_v50, %v2308_v12  ;;  %v2313_v5 = vpop.permute.xlu0 %2312  ;;  %4995 = vperm.xlu1 %6373, %v4835_v38   ;;  %v4836_v23 = vld [vmem:[%s10673_s3 + $0x90] sm:$0xff]  ;;  %v7964_v50 = vsub.f32 %v7319_v49, %v7716_v46  ;;  %v2802_v38 = vmul.f32 %v7930_v30, %v7930_v30 }
 0x2de   :  { %v7950_v19 = vsub.f32 %v7392_v53, %v2313_v5  ;;  %2542 = vperm.xlu0 %6372, %v2130_v48   ;;  %3363 = vmatmul.mubr.f32.gmra.mrb[210].mxu0 %v2800_v7  ;;  %v7970_v48 = vpop.f32.mrb[162].mxu0  ;;  %v2805_v7 = vmul.f32 %v7941_v11, %v7941_v11  ;;  %v2132_v11 = vmul.f32 0.0051020407, %v7710_v2 }
 0x2df   :  { %11036 = vst [vmem:[#allocation139_spill] sm:$0xff] %v7944_v27  ;;  %11037 = vst [vmem:[#allocation140_spill] sm:$0xff] %v7947_v47  ;;  %v2836_v24 = vmul.f32 %v7944_v27, %v7944_v27  ;;  %v2837_v32 = vmul.f32 %v7947_v47, %v7947_v47  ;;  %5944 = vmatprep.mubr.msk.f32.mxu0 %vm1051_vm0, %v2803_v14  ;;  %v7976_v14 = vsub.f32 %v7326_v0, %v7729_v17  ;;  %v7982_v46 = vpop.f32.mrb[163].mxu0  ;;  %v4837_v0 = vld [vmem:[%s10673_s3 + $0x98] sm:$0xff]  ;;  %v11067_v27 = vld [vmem:[#allocation30_spill] sm:$0xff] }
 0x2e0   :  { %11038 = vst [vmem:[#allocation141_spill] sm:$0xff] %v7950_v19  ;;  %11039 = vst [vmem:[#allocation142_spill] sm:$0xff] %v7964_v50  ;;  %v2839_v53 = vmul.f32 %v7950_v19, %v7950_v19  ;;  %v2318_v12 = vpop.permute.xlu1 %2317  ;;  %v7979_v47 = vsub.f32 %v7390_v63, %v2313_v5  ;;  %v7994_v63 = vsub.f32 %v7324_v44, %v7729_v17  ;;  %v8000_v2 = vpop.f32.mrb[164].mxu0 }
 0x2e1   :  { %11040 = vst [vmem:[#allocation143_spill] sm:$0xff] %v7976_v14  ;;  %v2323_v49 = vpop.permute.xlu0 %2322  ;;  %2547 = vperm.xlu1 %6373, %v2131_v9   ;;  %5961 = vmatprep.mubr.msk.f32.mxu1 %vm1051_vm0, %v2837_v32  ;;  %v7985_v19 = vsub.f32 %v7396_v3, %v2318_v12  ;;  %v2133_v9 = vmul.f32 0.0051020407, %v7707_v20  ;;  %v2804_v5 = vmul.f32 %v7964_v50, %v7964_v50 }
 0x2e2   :  { %11041 = vst [vmem:[#allocation144_spill] sm:$0xff] %v7979_v47  ;;  %5000 = vperm.xlu0 %6372, %v4836_v23   ;;  %3368 = vmatmul.mubr.f32.gmra.mrb[212].mxu0 %v2802_v38  ;;  %11043 = vst [vmem:[#allocation146_spill] sm:$0xff] %v7994_v63  ;;  %v2807_v32 = vmul.f32 %v7976_v14, %v7976_v14  ;;  %v8009_v44 = vsub.f32 %v7394_v61, %v2318_v12  ;;  %v8018_v38 = vpop.f32.mrb[165].mxu0  ;;  %v11052_v14 = vld [vmem:[#allocation29_spill] sm:$0xff] }
 0x2e3   :  { %11042 = vst [vmem:[#allocation145_spill] sm:$0xff] %v7985_v19  ;;  %3453 = vmatmul.mubr.f32.vlgmr.msra.gmra.mrb[122].mxu1 %v2836_v24  ;;  %5945 = vmatprep.mubr.msk.f32.mxu0 %vm1051_vm0, %v2805_v7  ;;  %v8006_v24 = vsub.f32 %v7330_v60, %v7745_v51  ;;  %v2838_v20 = vmul.f32 %v7979_v47, %v7979_v47  ;;  %v4838_v60 = vld [vmem:[%s10673_s3 + $0xa0] sm:$0xff]  ;;  %v11060_v47 = vld [vmem:[#allocation31_spill] sm:$0xff] }
 0x2e4   :  { %5962 = vmatprep.mubr.msk.f32.mxu1 %vm1051_vm0, %v2839_v53  ;;  %v2328_v3 = vpop.permute.xlu1 %2327  ;;  %11045 = vst [vmem:[#allocation148_spill] sm:$0xff] %v8009_v44  ;;  %v2841_v23 = vmul.f32 %v7985_v19, %v7985_v19  ;;  %v8016_v53 = vsub.f32 %v7400_v10, %v2323_v49  ;;  %v8026_v61 = vsub.f32 %v7328_v56, %v7745_v51 }
 0x2e5   :  { %11044 = vst [vmem:[#allocation147_spill] sm:$0xff] %v8006_v24  ;;  %v2333_v17 = vpop.permute.xlu0 %2332  ;;  %5005 = vperm.xlu1 %6373, %v4837_v0   ;;  %v2806_v10 = vmul.f32 %v7994_v63, %v7994_v63  ;;  %v2809_v7 = vmul.f32 %v8006_v24, %v8006_v24  ;;  %v11048_v0 = vld [vmem:[#allocation3_spill] sm:$0xff]  ;;  %v2840_v51 = vmul.f32 %v8009_v44, %v8009_v44 }
 0x2e6   :  { %11046 = vst [vmem:[#allocation149_spill] sm:$0xff] %v8016_v53  ;;  %2552 = vperm.xlu0 %6372, %v2132_v11   ;;  %3373 = vmatmul.mubr.f32.gmra.mrb[214].mxu0 %v2804_v5  ;;  %11047 = vst [vmem:[#allocation150_spill] sm:$0xff] %v8026_v61  ;;  %v8033_v11 = vpop.f32.mrb[166].mxu0  ;;  %v8039_v5 = vsub.f32 %v11048_v0, %v7757_v4  ;;  %v2843_v19 = vmul.f32 %v8016_v53, %v8016_v53  ;;  %v2134_v0 = vmul.f32 0.0051020407, %v7739_v22  ;;  %v11054_v53 = vld [vmem:[#allocation2_spill] sm:$0xff] }
 0x2e7   :  { %3458 = vmatmul.mubr.f32.gmra.mrb[124].mxu1 %v2838_v20  ;;  %5946 = vmatprep.mubr.msk.f32.mxu0 %vm1051_vm0, %v2807_v32  ;;  %v11050_v32 = vld [vmem:[#allocation27_spill] sm:$0xff]  ;;  %v8053_v24 = vsub.f32 %v11052_v14, %v2328_v3  ;;  %v8066_v44 = vsub.f32 %v11054_v53, %v7757_v4  ;;  %v2135_v14 = vmul.f32 0.0051020407, %v7731_v33  ;;  %v11058_v4 = vld [vmem:[#allocation28_spill] sm:$0xff]  ;;  %v8122_v30 = vsub.f32 %v11067_v27, %v2333_v17 }
 0x2e8   :  { %5963 = vmatprep.mubr.msk.f32.mxu1 %vm1051_vm0, %v2841_v23  ;;  %v8029_v12 = vpop.permute.xlu1 %2337  ;;  %11049 = vst [vmem:[#allocation3_spill] sm:$0xff] %v8039_v5  ;;  %v8042_v20 = vsub.f32 %v11050_v32, %v2323_v49  ;;  %v8048_v23 = vpop.f32.mrb[167].mxu0  ;;  %v4839_v49 = vld [vmem:[%s10673_s3 + $0xa8] sm:$0xff]  ;;  %v8083_v53 = vsub.f32 %v11058_v4, %v2328_v3  ;;  %v4840_v3 = vld [vmem:[%s10673_s3 + $0xb0] sm:$0xff]  ;;  %v2136_v27 = vmul.f32 0.0051020407, %v7768_v13 }
 0x2e9   :  { %v8044_v56 = vpop.permute.xlu0 %2342  ;;  %2557 = vperm.xlu1 %6373, %v2133_v9   ;;  %11053 = vst [vmem:[#allocation29_spill] sm:$0xff] %v8053_v24  ;;  %v8059_v9 = vpop.f32.mrb[168].mxu0  ;;  %11055 = vst [vmem:[#allocation2_spill] sm:$0xff] %v8066_v44  ;;  %v11062_v4 = vld [vmem:[#allocation4_spill] sm:$0xff] }
 0x2ea   :  { %11051 = vst [vmem:[#allocation27_spill] sm:$0xff] %v8042_v20  ;;  %5010 = vperm.xlu0 %6372, %v4838_v60   ;;  %3378 = vmatmul.mubr.f32.gmra.mrb[216].mxu0 %v2806_v10  ;;  %v8062_v32 = vpop.f32.mrb[169].mxu0  ;;  %v2808_v60 = vmul.f32 %v8026_v61, %v8026_v61  ;;  %11059 = vst [vmem:[#allocation28_spill] sm:$0xff] %v8083_v53  ;;  %v2845_v61 = vmul.f32 %v8053_v24, %v8053_v24 }
 0x2eb   :  { %3463 = vmatmul.mubr.f32.gmra.mrb[126].mxu1 %v2840_v51  ;;  %5947 = vmatprep.mubr.msk.f32.mxu0 %vm1051_vm0, %v2809_v7  ;;  %v8074_v10 = vpop.f32.mrb[170].mxu0  ;;  %v2811_v7 = vmul.f32 %v8039_v5, %v8039_v5  ;;  %v11056_v51 = vld [vmem:[#allocation5_spill] sm:$0xff]  ;;  %v8094_v5 = vsub.f32 %v11060_v47, %v2333_v17  ;;  %11068 = vst [vmem:[#allocation30_spill] sm:$0xff] %v8122_v30 }
 0x2ec   :  { %5964 = vmatprep.mubr.msk.f32.mxu1 %vm1051_vm0, %v2843_v19  ;;  %v8070_v22 = vpop.permute.xlu1 %2347  ;;  %v8080_v63 = vsub.f32 %v11056_v51, %v7774_v55  ;;  %v2842_v19 = vmul.f32 %v8042_v20, %v8042_v20  ;;  %v8089_v50 = vpop.f32.mrb[171].mxu0  ;;  %v8106_v20 = vsub.f32 %v11062_v4, %v7774_v55  ;;  %v4841_v17 = vld [vmem:[%s10673_s3 + $0xb8] sm:$0xff] }
 0x2ed   :  { %v8085_v33 = vpop.permute.xlu0 %2352  ;;  %5015 = vperm.xlu1 %6373, %v4839_v49   ;;  %11061 = vst [vmem:[#allocation31_spill] sm:$0xff] %v8094_v5  ;;  %v8096_v51 = vpop.f32.mrb[172].mxu0 }
 0x2ee   :  { %11057 = vst [vmem:[#allocation5_spill] sm:$0xff] %v8080_v63  ;;  %2562 = vperm.xlu0 %6372, %v2134_v0   ;;  %3383 = vmatmul.mubr.f32.gmra.mrb[218].mxu0 %v2808_v60  ;;  %v8102_v49 = vpop.f32.mrb[173].mxu0  ;;  %11063 = vst [vmem:[#allocation4_spill] sm:$0xff] %v8106_v20  ;;  %v2810_v0 = vmul.f32 %v8066_v44, %v8066_v44  ;;  %v2847_v44 = vmul.f32 %v8094_v5, %v8094_v5  ;;  %v11073_v5 = vld [vmem:[#allocation6_spill] sm:$0xff] }
 0x2ef   :  { %3468 = vmatmul.mubr.f32.gmra.mrb[128].mxu1 %v2842_v19  ;;  %5948 = vmatprep.mubr.msk.f32.mxu0 %vm1051_vm0, %v2811_v7  ;;  %v8113_v60 = vpop.f32.mrb[174].mxu0  ;;  %v2813_v7 = vmul.f32 %v8080_v63, %v8080_v63  ;;  %v11065_v19 = vld [vmem:[#allocation7_spill] sm:$0xff]  ;;  %v11069_v63 = vld [vmem:[#allocation33_spill] sm:$0xff] }
 0x2f0   :  { %5965 = vmatprep.mubr.msk.f32.mxu1 %vm1051_vm0, %v2845_v61  ;;  %v8109_v47 = vpop.permute.xlu1 %2357  ;;  %11064 = vst [vmem:[#allocation151_spill] sm:$0xff] %v8113_v60  ;;  %v8119_v24 = vsub.f32 %v11065_v19, %v7787_v31  ;;  %v2844_v61 = vmul.f32 %v8083_v53, %v8083_v53  ;;  %v8128_v4 = vpop.f32.mrb[175].mxu0  ;;  %v8134_v60 = vsub.f32 %v11069_v63, %v8029_v12  ;;  %v2137_v63 = vmul.f32 0.0051020407, %v7765_v34 }
 0x2f1   :  { %v8124_v55 = vpop.permute.xlu0 %2362  ;;  %2567 = vperm.xlu1 %6373, %v2135_v14   ;;  %v8140_v14 = vpop.f32.mrb[176].mxu0  ;;  %v8147_v53 = vsub.f32 %v11073_v5, %v7787_v31  ;;  %v11078_v31 = vld [vmem:[#allocation32_spill] sm:$0xff] }
 0x2f2   :  { %11066 = vst [vmem:[#allocation7_spill] sm:$0xff] %v8119_v24  ;;  %11070 = vst [vmem:[#allocation33_spill] sm:$0xff] %v8134_v60  ;;  %5020 = vperm.xlu0 %6372, %v4840_v3   ;;  %3388 = vmatmul.mubr.f32.gmra.mrb[220].mxu0 %v2810_v0  ;;  %v8143_v19 = vpop.f32.mrb[177].mxu0  ;;  %v2812_v3 = vmul.f32 %v8106_v20, %v8106_v20  ;;  %v8165_v5 = vsub.f32 %v11078_v31, %v8029_v12  ;;  %v4842_v12 = vld [vmem:[%s10673_s3 + $0xc0] sm:$0xff] }
 0x2f3   :  { %11071 = vst [vmem:[#allocation152_spill] sm:$0xff] %v8140_v14  ;;  %3473 = vmatmul.mubr.f32.gmra.mrb[130].mxu1 %v2844_v61  ;;  %5949 = vmatprep.mubr.msk.f32.mxu0 %vm1051_vm0, %v2813_v7  ;;  %11072 = vst [vmem:[#allocation153_spill] sm:$0xff] %v8143_v19  ;;  %v8155_v0 = vpop.f32.mrb[178].mxu0  ;;  %v2815_v7 = vmul.f32 %v8119_v24, %v8119_v24  ;;  %v11076_v61 = vld [vmem:[#allocation9_spill] sm:$0xff]  ;;  %v11080_v24 = vld [vmem:[#allocation35_spill] sm:$0xff] }
 0x2f4   :  { %11074 = vst [vmem:[#allocation6_spill] sm:$0xff] %v8147_v53  ;;  %5966 = vmatprep.mubr.msk.f32.mxu1 %vm1051_vm0, %v2847_v44  ;;  %v8151_v13 = vpop.permute.xlu1 %2367  ;;  %11075 = vst [vmem:[#allocation154_spill] sm:$0xff] %v8155_v0  ;;  %v8161_v14 = vsub.f32 %v11076_v61, %v7803_v1  ;;  %v2846_v44 = vmul.f32 %v8122_v30, %v8122_v30  ;;  %v8171_v20 = vpop.f32.mrb[179].mxu0  ;;  %v2849_v0 = vmul.f32 %v8134_v60, %v8134_v60 }
 0x2f5   :  { %11079 = vst [vmem:[#allocation32_spill] sm:$0xff] %v8165_v5  ;;  %v8167_v34 = vpop.permute.xlu0 %2372  ;;  %5025 = vperm.xlu1 %6373, %v4841_v17   ;;  %v8177_v19 = vsub.f32 %v11080_v24, %v8044_v56  ;;  %v11082_v17 = vld [vmem:[#allocation8_spill] sm:$0xff]  ;;  %v2814_v24 = vmul.f32 %v8147_v53, %v8147_v53  ;;  %v11088_v53 = vld [vmem:[#allocation37_spill] sm:$0xff] }
 0x2f6   :  { %11077 = vst [vmem:[#allocation9_spill] sm:$0xff] %v8161_v14  ;;  %2572 = vperm.xlu0 %6372, %v2136_v27   ;;  %3393 = vmatmul.mubr.f32.gmra.mrb[222].mxu0 %v2812_v3  ;;  %v8185_v61 = vsub.f32 %v11082_v17, %v7803_v1  ;;  %v2817_v27 = vmul.f32 %v8161_v14, %v8161_v14  ;;  %v11084_v3 = vld [vmem:[#allocation11_spill] sm:$0xff] }
 0x2f7   :  { %11081 = vst [vmem:[#allocation35_spill] sm:$0xff] %v8177_v19  ;;  %3478 = vmatmul.mubr.f32.gmra.mrb[132].mxu1 %v2846_v44  ;;  %5950 = vmatprep.mubr.msk.f32.mxu0 %vm1051_vm0, %v2815_v7  ;;  %v8196_v7 = vsub.f32 %v11084_v3, %v7815_v18  ;;  %v11086_v44 = vld [vmem:[#allocation34_spill] sm:$0xff]  ;;  %v2851_v17 = vmul.f32 %v8177_v19, %v8177_v19  ;;  %v2138_v3 = vmul.f32 0.0051020407, %v7797_v35  ;;  %v2139_v19 = vmul.f32 0.0051020407, %v7789_v36 }
 0x2f8   :  { %11083 = vst [vmem:[#allocation8_spill] sm:$0xff] %v8185_v61  ;;  %5967 = vmatprep.mubr.msk.f32.mxu1 %vm1051_vm0, %v2849_v0  ;;  %v8188_v31 = vpop.permute.xlu1 %2377  ;;  %v8200_v60 = vsub.f32 %v11086_v44, %v8044_v56  ;;  %v2848_v0 = vmul.f32 %v8165_v5, %v8165_v5  ;;  %v8210_v14 = vsub.f32 %v11088_v53, %v8070_v22  ;;  %v4843_v56 = vld [vmem:[%s10673_s3 + $0xc8] sm:$0xff] }
 0x2f9   :  { %11085 = vst [vmem:[#allocation11_spill] sm:$0xff] %v8196_v7  ;;  %v8202_v1 = vpop.permute.xlu0 %2382  ;;  %2577 = vperm.xlu1 %6373, %v2137_v63   ;;  %v11090_v63 = vld [vmem:[#allocation10_spill] sm:$0xff]  ;;  %v2816_v35 = vmul.f32 %v8185_v61, %v8185_v61  ;;  %v11096_v61 = vld [vmem:[#allocation39_spill] sm:$0xff] }
 0x2fa   :  { %11087 = vst [vmem:[#allocation34_spill] sm:$0xff] %v8200_v60  ;;  %11089 = vst [vmem:[#allocation37_spill] sm:$0xff] %v8210_v14  ;;  %5030 = vperm.xlu0 %6372, %v4842_v12   ;;  %3398 = vmatmul.mubr.f32.gmra.mrb[224].mxu0 %v2814_v24  ;;  %v8219_v44 = vsub.f32 %v11090_v63, %v7815_v18  ;;  %v2819_v12 = vmul.f32 %v8196_v7, %v8196_v7  ;;  %v11092_v24 = vld [vmem:[#allocation13_spill] sm:$0xff] }
 0x2fb   :  { %3483 = vmatmul.mubr.f32.gmra.mrb[134].mxu1 %v2848_v0  ;;  %5951 = vmatprep.mubr.msk.f32.mxu0 %vm1051_vm0, %v2817_v27  ;;  %v8231_v0 = vsub.f32 %v11092_v24, %v7828_v40  ;;  %v11094_v27 = vld [vmem:[#allocation36_spill] sm:$0xff]  ;;  %v2850_v36 = vmul.f32 %v8200_v60, %v8200_v60  ;;  %v8245_v7 = vsub.f32 %v11096_v61, %v8085_v33 }
 0x2fc   :  { %11091 = vst [vmem:[#allocation10_spill] sm:$0xff] %v8219_v44  ;;  %5968 = vmatprep.mubr.msk.f32.mxu1 %vm1051_vm0, %v2851_v17  ;;  %v8223_v53 = vpop.permute.xlu1 %2387  ;;  %v8235_v18 = vsub.f32 %v11094_v27, %v8070_v22  ;;  %v2853_v17 = vmul.f32 %v8210_v14, %v8210_v14  ;;  %v4844_v22 = vld [vmem:[%s10673_s3 + $0xd0] sm:$0xff]  ;;  %v2818_v61 = vmul.f32 %v8219_v44, %v8219_v44  ;;  %v11104_v44 = vld [vmem:[#allocation41_spill] sm:$0xff] }
 0x2fd   :  { %11093 = vst [vmem:[#allocation13_spill] sm:$0xff] %v8231_v0  ;;  %v8237_v63 = vpop.permute.xlu0 %2392  ;;  %5035 = vperm.xlu1 %6373, %v4843_v56   ;;  %11097 = vst [vmem:[#allocation39_spill] sm:$0xff] %v8245_v7  ;;  %v11098_v56 = vld [vmem:[#allocation12_spill] sm:$0xff] }
 0x2fe   :  { %11095 = vst [vmem:[#allocation36_spill] sm:$0xff] %v8235_v18  ;;  %2582 = vperm.xlu0 %6372, %v2138_v3   ;;  %3403 = vmatmul.mubr.f32.gmra.mrb[226].mxu0 %v2816_v35  ;;  %v8253_v24 = vsub.f32 %v11098_v56, %v7828_v40  ;;  %v2821_v3 = vmul.f32 %v8231_v0, %v8231_v0  ;;  %v11100_v35 = vld [vmem:[#allocation15_spill] sm:$0xff] }
 0x2ff   :  { %3488 = vmatmul.mubr.f32.gmra.mrb[136].mxu1 %v2850_v36  ;;  %5952 = vmatprep.mubr.msk.f32.mxu0 %vm1051_vm0, %v2819_v12  ;;  %v8264_v12 = vsub.f32 %v11100_v35, %v7841_v54  ;;  %v11102_v36 = vld [vmem:[#allocation38_spill] sm:$0xff]  ;;  %v2855_v56 = vmul.f32 %v8245_v7, %v8245_v7  ;;  %v8278_v0 = vsub.f32 %v11104_v44, %v8109_v47  ;;  %v11110_v7 = vld [vmem:[#allocation40_spill] sm:$0xff] }
 0x300   :  { %11099 = vst [vmem:[#allocation12_spill] sm:$0xff] %v8253_v24  ;;  %5969 = vmatprep.mubr.msk.f32.mxu1 %vm1051_vm0, %v2853_v17  ;;  %v8256_v27 = vpop.permute.xlu1 %2397  ;;  %v8268_v14 = vsub.f32 %v11102_v36, %v8085_v33  ;;  %v2852_v17 = vmul.f32 %v8235_v18, %v8235_v18  ;;  %v4845_v33 = vld [vmem:[%s10673_s3 + $0xd8] sm:$0xff]  ;;  %v11106_v35 = vld [vmem:[#allocation14_spill] sm:$0xff]  ;;  %v8304_v18 = vsub.f32 %v11110_v7, %v8109_v47  ;;  %v4847_v47 = vld [vmem:[%s10673_s3 + $0xe8] sm:$0xff] }
 0x301   :  { %11101 = vst [vmem:[#allocation15_spill] sm:$0xff] %v8264_v12  ;;  %v8270_v40 = vpop.permute.xlu0 %2402  ;;  %2587 = vperm.xlu1 %6373, %v2139_v19   ;;  %11105 = vst [vmem:[#allocation41_spill] sm:$0xff] %v8278_v0  ;;  %v4846_v19 = vld [vmem:[%s10673_s3 + $0xe0] sm:$0xff]  ;;  %v8289_v36 = vsub.f32 %v11106_v35, %v7841_v54  ;;  %v2857_v35 = vmul.f32 %v8278_v0, %v8278_v0  ;;  %v4848_v7 = vld [vmem:[%s10673_s3 + $0xf0] sm:$0xff] }
 0x302   :  { %11103 = vst [vmem:[#allocation38_spill] sm:$0xff] %v8268_v14  ;;  %5040 = vperm.xlu0 %6372, %v4844_v22   ;;  %3408 = vmatmul.mubr.f32.gmra.mrb[228].mxu0 %v2818_v61  ;;  %v2820_v22 = vmul.f32 %v8253_v24, %v8253_v24  ;;  %v2823_v61 = vmul.f32 %v8264_v12, %v8264_v12  ;;  %11111 = vst [vmem:[#allocation40_spill] sm:$0xff] %v8304_v18  ;;  %v11112_v24 = vld [vmem:[#allocation43_spill] sm:$0xff]  ;;  %v11118_v0 = vld [vmem:[#allocation42_spill] sm:$0xff] }
 0x303   :  { %3493 = vmatmul.mubr.f32.gmra.mrb[138].mxu1 %v2852_v17  ;;  %5953 = vmatprep.mubr.msk.f32.mxu0 %vm1051_vm0, %v2821_v3  ;;  %11107 = vst [vmem:[#allocation14_spill] sm:$0xff] %v8289_v36  ;;  %v11108_v3 = vld [vmem:[#allocation17_spill] sm:$0xff]  ;;  %v8314_v12 = vsub.f32 %v11112_v24, %v8124_v55 }
 0x304   :  { %5970 = vmatprep.mubr.msk.f32.mxu1 %vm1051_vm0, %v2855_v56  ;;  %v8292_v44 = vpop.permute.xlu1 %2407  ;;  %v8300_v17 = vsub.f32 %v11108_v3, %v7853_v41  ;;  %v2854_v56 = vmul.f32 %v8268_v14, %v8268_v14  ;;  %v8340_v14 = vsub.f32 %v11118_v0, %v8124_v55  ;;  %v4849_v55 = vld [vmem:[%s10673_s3 + $0xf8] sm:$0xff]  ;;  %v4850_v0 = vld [vmem:[%s10673_s3 + $0x100] sm:$0xff] }
 0x305   :  { %v8306_v54 = vpop.permute.xlu0 %2412  ;;  %5045 = vperm.xlu1 %6373, %v4845_v33   ;;  %11113 = vst [vmem:[#allocation43_spill] sm:$0xff] %v8314_v12  ;;  %v11114_v33 = vld [vmem:[#allocation16_spill] sm:$0xff] }
 0x306   :  { %11109 = vst [vmem:[#allocation17_spill] sm:$0xff] %v8300_v17  ;;  %5050 = vperm.xlu0 %6372, %v4846_v19   ;;  %3413 = vmatmul.mubr.f32.gmra.mrb[230].mxu0 %v2820_v22  ;;  %v8325_v3 = vsub.f32 %v11114_v33, %v7853_v41  ;;  %v2822_v19 = vmul.f32 %v8289_v36, %v8289_v36  ;;  %11119 = vst [vmem:[#allocation42_spill] sm:$0xff] %v8340_v14  ;;  %v11120_v36 = vld [vmem:[#allocation45_spill] sm:$0xff] }
 0x307   :  { %3498 = vmatmul.mubr.f32.gmra.mrb[140].mxu1 %v2854_v56  ;;  %5954 = vmatprep.mubr.msk.f32.mxu0 %vm1051_vm0, %v2823_v61  ;;  %v2825_v22 = vmul.f32 %v8300_v17, %v8300_v17  ;;  %v11116_v61 = vld [vmem:[#allocation19_spill] sm:$0xff]  ;;  %v2859_v33 = vmul.f32 %v8314_v12, %v8314_v12  ;;  %v8350_v17 = vsub.f32 %v11120_v36, %v8151_v13  ;;  %v11126_v12 = vld [vmem:[#allocation44_spill] sm:$0xff] }
 0x308   :  { %11115 = vst [vmem:[#allocation16_spill] sm:$0xff] %v8325_v3  ;;  %5971 = vmatprep.mubr.msk.f32.mxu1 %vm1051_vm0, %v2857_v35  ;;  %v8328_v24 = vpop.permute.xlu1 %2417  ;;  %v8336_v56 = vsub.f32 %v11116_v61, %v7865_v6  ;;  %v2856_v35 = vmul.f32 %v8304_v18, %v8304_v18  ;;  %v8376_v18 = vsub.f32 %v11126_v12, %v8151_v13  ;;  %v4851_v13 = vld [vmem:[%s10673_s3 + $0x108] sm:$0xff]  ;;  %v4852_v12 = vld [vmem:[%s10673_s3 + $0x110] sm:$0xff] }
 0x309   :  { %v8342_v41 = vpop.permute.xlu0 %2422  ;;  %5055 = vperm.xlu1 %6373, %v4847_v47   ;;  %11121 = vst [vmem:[#allocation45_spill] sm:$0xff] %v8350_v17  ;;  %v11122_v47 = vld [vmem:[#allocation18_spill] sm:$0xff] }
 0x30a   :  { %11117 = vst [vmem:[#allocation19_spill] sm:$0xff] %v8336_v56  ;;  %5060 = vperm.xlu0 %6372, %v4848_v7   ;;  %3418 = vmatmul.mubr.f32.gmra.mrb[232].mxu0 %v2822_v19  ;;  %v8361_v61 = vsub.f32 %v11122_v47, %v7865_v6  ;;  %v2824_v7 = vmul.f32 %v8325_v3, %v8325_v3  ;;  %11127 = vst [vmem:[#allocation44_spill] sm:$0xff] %v8376_v18  ;;  %v11128_v3 = vld [vmem:[#allocation47_spill] sm:$0xff] }
 0x30b   :  { %3503 = vmatmul.mubr.f32.gmra.mrb[142].mxu1 %v2856_v35  ;;  %5955 = vmatprep.mubr.msk.f32.mxu0 %vm1051_vm0, %v2825_v22  ;;  %v2827_v19 = vmul.f32 %v8336_v56, %v8336_v56  ;;  %v11124_v22 = vld [vmem:[#allocation21_spill] sm:$0xff]  ;;  %v2861_v47 = vmul.f32 %v8350_v17, %v8350_v17  ;;  %v8386_v56 = vsub.f32 %v11128_v3, %v8167_v34  ;;  %v11134_v17 = vld [vmem:[#allocation46_spill] sm:$0xff] }
 0x30c   :  { %11123 = vst [vmem:[#allocation18_spill] sm:$0xff] %v8361_v61  ;;  %5972 = vmatprep.mubr.msk.f32.mxu1 %vm1051_vm0, %v2859_v33  ;;  %v8364_v36 = vpop.permute.xlu1 %2427  ;;  %v8372_v35 = vsub.f32 %v11124_v22, %v7878_v42  ;;  %v2858_v33 = vmul.f32 %v8340_v14, %v8340_v14  ;;  %v8412_v14 = vsub.f32 %v11134_v17, %v8167_v34  ;;  %v4853_v34 = vld [vmem:[%s10673_s3 + $0x118] sm:$0xff]  ;;  %v4854_v17 = vld [vmem:[%s10673_s3 + $0x120] sm:$0xff] }
 0x30d   :  { %v8378_v6 = vpop.permute.xlu0 %2432  ;;  %5065 = vperm.xlu1 %6373, %v4849_v55   ;;  %11129 = vst [vmem:[#allocation47_spill] sm:$0xff] %v8386_v56  ;;  %v11130_v55 = vld [vmem:[#allocation20_spill] sm:$0xff] }
 0x30e   :  { %11125 = vst [vmem:[#allocation21_spill] sm:$0xff] %v8372_v35  ;;  %5070 = vperm.xlu0 %6372, %v4850_v0   ;;  %3423 = vmatmul.mubr.f32.gmra.mrb[234].mxu0 %v2824_v7  ;;  %v8397_v22 = vsub.f32 %v11130_v55, %v7878_v42  ;;  %v2826_v0 = vmul.f32 %v8361_v61, %v8361_v61  ;;  %11135 = vst [vmem:[#allocation46_spill] sm:$0xff] %v8412_v14  ;;  %v11136_v61 = vld [vmem:[#allocation49_spill] sm:$0xff] }
 0x30f   :  { %3508 = vmatmul.mubr.f32.gmra.mrb[144].mxu1 %v2858_v33  ;;  %5956 = vmatprep.mubr.msk.f32.mxu0 %vm1051_vm0, %v2827_v19  ;;  %v2829_v7 = vmul.f32 %v8372_v35, %v8372_v35  ;;  %v11132_v19 = vld [vmem:[#allocation23_spill] sm:$0xff]  ;;  %v2863_v55 = vmul.f32 %v8386_v56, %v8386_v56  ;;  %v8422_v35 = vsub.f32 %v11136_v61, %v8188_v31  ;;  %v11142_v56 = vld [vmem:[#allocation48_spill] sm:$0xff] }
 0x310   :  { %11131 = vst [vmem:[#allocation20_spill] sm:$0xff] %v8397_v22  ;;  %5973 = vmatprep.mubr.msk.f32.mxu1 %vm1051_vm0, %v2861_v47  ;;  %v8400_v3 = vpop.permute.xlu1 %2437  ;;  %v8408_v33 = vsub.f32 %v11132_v19, %v7891_v37  ;;  %v2860_v47 = vmul.f32 %v8376_v18, %v8376_v18  ;;  %v8448_v18 = vsub.f32 %v11142_v56, %v8188_v31  ;;  %v4855_v31 = vld [vmem:[%s10673_s3 + $0x128] sm:$0xff]  ;;  %v4856_v56 = vld [vmem:[%s10673_s3 + $0x130] sm:$0xff] }
 0x311   :  { %v8414_v42 = vpop.permute.xlu0 %2442  ;;  %5075 = vperm.xlu1 %6373, %v4851_v13   ;;  %11137 = vst [vmem:[#allocation49_spill] sm:$0xff] %v8422_v35  ;;  %v11138_v13 = vld [vmem:[#allocation22_spill] sm:$0xff] }
 0x312   :  { %11133 = vst [vmem:[#allocation23_spill] sm:$0xff] %v8408_v33  ;;  %5080 = vperm.xlu0 %6372, %v4852_v12   ;;  %3428 = vmatmul.mubr.f32.gmra.mrb[236].mxu0 %v2826_v0  ;;  %v8433_v19 = vsub.f32 %v11138_v13, %v7891_v37  ;;  %v2828_v12 = vmul.f32 %v8397_v22, %v8397_v22  ;;  %11143 = vst [vmem:[#allocation48_spill] sm:$0xff] %v8448_v18  ;;  %v11144_v22 = vld [vmem:[#allocation51_spill] sm:$0xff] }
 0x313   :  { %3513 = vmatmul.mubr.f32.gmra.mrb[146].mxu1 %v2860_v47  ;;  %5957 = vmatprep.mubr.msk.f32.mxu0 %vm1051_vm0, %v2829_v7  ;;  %v2831_v0 = vmul.f32 %v8408_v33, %v8408_v33  ;;  %v11140_v7 = vld [vmem:[#allocation25_spill] sm:$0xff]  ;;  %v2865_v13 = vmul.f32 %v8422_v35, %v8422_v35  ;;  %v8458_v33 = vsub.f32 %v11144_v22, %v8202_v1  ;;  %v11150_v35 = vld [vmem:[#allocation50_spill] sm:$0xff] }
 0x314   :  { %11139 = vst [vmem:[#allocation22_spill] sm:$0xff] %v8433_v19  ;;  %5974 = vmatprep.mubr.msk.f32.mxu1 %vm1051_vm0, %v2863_v55  ;;  %v8436_v61 = vpop.permute.xlu1 %2447  ;;  %v8444_v47 = vsub.f32 %v11140_v7, %v7903_v29  ;;  %v2862_v55 = vmul.f32 %v8412_v14, %v8412_v14  ;;  %v8484_v14 = vsub.f32 %v11150_v35, %v8202_v1  ;;  %v4858_v1 = vld [vmem:[%s10673_s3 + $0x140] sm:$0xff] }
 0x315   :  { %v8450_v37 = vpop.permute.xlu0 %2452  ;;  %5085 = vperm.xlu1 %6373, %v4853_v34   ;;  %11145 = vst [vmem:[#allocation51_spill] sm:$0xff] %v8458_v33  ;;  %v11146_v34 = vld [vmem:[#allocation24_spill] sm:$0xff] }
 0x316   :  { %11141 = vst [vmem:[#allocation25_spill] sm:$0xff] %v8444_v47  ;;  %5090 = vperm.xlu0 %6372, %v4854_v17   ;;  %3433 = vmatmul.mubr.f32.gmra.mrb[238].mxu0 %v2828_v12  ;;  %v8469_v7 = vsub.f32 %v11146_v34, %v7903_v29  ;;  %v2830_v17 = vmul.f32 %v8433_v19, %v8433_v19  ;;  %11151 = vst [vmem:[#allocation50_spill] sm:$0xff] %v8484_v14  ;;  %v11152_v19 = vld [vmem:[#allocation53_spill] sm:$0xff] }
 0x317   :  { %3518 = vmatmul.mubr.f32.gmra.mrb[148].mxu1 %v2862_v55  ;;  %5958 = vmatprep.mubr.msk.f32.mxu0 %vm1051_vm0, %v2831_v0  ;;  %v2833_v12 = vmul.f32 %v8444_v47, %v8444_v47  ;;  %v11148_v0 = vld [vmem:[#allocation26_spill] sm:$0xff]  ;;  %v2867_v34 = vmul.f32 %v8458_v33, %v8458_v33  ;;  %v8494_v47 = vsub.f32 %v11152_v19, %v8223_v53 }
 0x318   :  { %11147 = vst [vmem:[#allocation24_spill] sm:$0xff] %v8469_v7  ;;  %5975 = vmatprep.mubr.msk.f32.mxu1 %vm1051_vm0, %v2865_v13  ;;  %v8472_v22 = vpop.permute.xlu1 %2457  ;;  %v8480_v55 = vsub.f32 %v11148_v0, %v7915_v59  ;;  %v2864_v13 = vmul.f32 %v8448_v18, %v8448_v18  ;;  %v4857_v59 = vld [vmem:[%s10673_s3 + $0x138] sm:$0xff]  ;;  %v2832_v19 = vmul.f32 %v8469_v7, %v8469_v7 }
 0x319   :  { %v8486_v29 = vpop.permute.xlu0 %4910  ;;  %5095 = vperm.xlu1 %6373, %v4855_v31   ;;  %11153 = vst [vmem:[#allocation53_spill] sm:$0xff] %v8494_v47 }
 0x31a   :  { %11149 = vst [vmem:[#allocation26_spill] sm:$0xff] %v8480_v55  ;;  %5100 = vperm.xlu0 %6372, %v4856_v56   ;;  %3438 = vmatmul.mubr.f32.gmra.mrb[240].mxu0 %v2830_v17  ;;  %v2835_v31 = vmul.f32 %v8480_v55, %v8480_v55  ;;  %v11154_v56 = vld [vmem:[#allocation52_spill] sm:$0xff] }
 0x31b   :  { %3523 = vmatmul.mubr.f32.gmra.mrb[150].mxu1 %v2864_v13  ;;  %5959 = vmatprep.mubr.msk.f32.mxu0 %vm1051_vm0, %v2833_v12  ;;  %v8512_v17 = vsub.f32 %v11154_v56, %v8223_v53  ;;  %v2866_v12 = vmul.f32 %v8484_v14, %v8484_v14  ;;  %v2869_v13 = vmul.f32 %v8494_v47, %v8494_v47  ;;  %v4859_v53 = vld [vmem:[%s10673_s3 + $0x148] sm:$0xff] }
 0x31c   :  { %5976 = vmatprep.mubr.msk.f32.mxu1 %vm1051_vm0, %v2867_v34  ;;  %v8504_v35 = vpop.permute.xlu1 %4915  ;;  %v11156_v34 = vld [vmem:[#allocation55_spill] sm:$0xff] }
 0x31d   :  { %11155 = vst [vmem:[#allocation52_spill] sm:$0xff] %v8512_v17  ;;  %v8514_v0 = vpop.permute.xlu0 %2462  ;;  %5105 = vperm.xlu1 %6373, %v4857_v59   ;;  %v8522_v33 = vsub.f32 %v11156_v34, %v8237_v63  ;;  %v4860_v59 = vld [vmem:[%s10673_s3 + $0x150] sm:$0xff]  ;;  %v2834_v34 = vmul.f32 %v7921_v43, %v7921_v43 }
 0x31e   :  { %5110 = vperm.xlu0 %6372, %v4858_v1   ;;  %3443 = vmatmul.mubr.f32.gmra.mrb[242].mxu0 %v2832_v19  ;;  %v11158_v1 = vld [vmem:[#allocation54_spill] sm:$0xff] }
 0x31f   :  { %11157 = vst [vmem:[#allocation55_spill] sm:$0xff] %v8522_v33  ;;  %3528 = vmatmul.mubr.f32.gmra.mrb[152].mxu1 %v2866_v12  ;;  %5960 = vmatprep.mubr.msk.f32.mxu0 %vm1051_vm0, %v2835_v31  ;;  %v8538_v19 = vsub.f32 %v11158_v1, %v8237_v63  ;;  %v2868_v31 = vmul.f32 %v8512_v17, %v8512_v17  ;;  %v4861_v63 = vld [vmem:[%s10673_s3 + $0x158] sm:$0xff] }
 0x320   :  { %5977 = vmatprep.mubr.msk.f32.mxu1 %vm1051_vm0, %v2869_v13  ;;  %v8532_v56 = vpop.permute.xlu1 %2467  ;;  %v2871_v12 = vmul.f32 %v8522_v33, %v8522_v33  ;;  %v11160_v13 = vld [vmem:[#allocation57_spill] sm:$0xff]  ;;  %v11162_v33 = vld [vmem:[#allocation56_spill] sm:$0xff] }
 0x321   :  { %11159 = vst [vmem:[#allocation54_spill] sm:$0xff] %v8538_v19  ;;  %v8540_v47 = vpop.permute.xlu0 %4920  ;;  %5115 = vperm.xlu1 %6373, %v4859_v53   ;;  %v8548_v55 = vsub.f32 %v11160_v13, %v8256_v27  ;;  %v4862_v53 = vld [vmem:[%s10673_s3 + $0x160] sm:$0xff]  ;;  %v8561_v17 = vsub.f32 %v11162_v33, %v8256_v27  ;;  %v4864_v27 = vld [vmem:[%s10673_s3 + $0x170] sm:$0xff] }
 0x322   :  { %5120 = vperm.xlu0 %6372, %v4860_v59   ;;  %3448 = vmatmul.mubr.f32.gmra.mrb[244].mxu0 %v2834_v34  ;;  %v2870_v59 = vmul.f32 %v8538_v19, %v8538_v19  ;;  %v11168_v19 = vld [vmem:[#allocation61_spill] sm:$0xff] }
 0x323   :  { %11161 = vst [vmem:[#allocation57_spill] sm:$0xff] %v8548_v55  ;;  %3533 = vmatmul.mubr.f32.gmra.mrb[154].mxu1 %v2868_v31  ;;  %11163 = vst [vmem:[#allocation56_spill] sm:$0xff] %v8561_v17  ;;  %v2873_v34 = vmul.f32 %v8548_v55, %v8548_v55  ;;  %v11164_v31 = vld [vmem:[#allocation59_spill] sm:$0xff]  ;;  %v8594_v7 = vsub.f32 %v11168_v19, %v8292_v44 }
 0x324   :  { %5978 = vmatprep.mubr.msk.f32.mxu1 %vm1051_vm0, %v2871_v12  ;;  %v8557_v1 = vpop.permute.xlu1 %4925  ;;  %v8571_v43 = vsub.f32 %v11164_v31, %v8270_v40  ;;  %v4863_v12 = vld [vmem:[%s10673_s3 + $0x168] sm:$0xff] }
 0x325   :  { %v8563_v13 = vpop.permute.xlu0 %2472  ;;  %5125 = vperm.xlu1 %6373, %v4861_v63   ;;  %v11166_v63 = vld [vmem:[#allocation58_spill] sm:$0xff]  ;;  %11169 = vst [vmem:[#allocation61_spill] sm:$0xff] %v8594_v7 }
 0x326   :  { %11165 = vst [vmem:[#allocation59_spill] sm:$0xff] %v8571_v43  ;;  %5130 = vperm.xlu0 %6372, %v4862_v53   ;;  %v8584_v55 = vsub.f32 %v11166_v63, %v8270_v40  ;;  %v2872_v53 = vmul.f32 %v8561_v17, %v8561_v17  ;;  %v4866_v40 = vld [vmem:[%s10673_s3 + $0x180] sm:$0xff]  ;;  %v11170_v63 = vld [vmem:[#allocation60_spill] sm:$0xff]  ;;  %v11172_v17 = vld [vmem:[#allocation63_spill] sm:$0xff] }
 0x327   :  { %3538 = vmatmul.mubr.f32.gmra.mrb[156].mxu1 %v2870_v59  ;;  %v2875_v59 = vmul.f32 %v8571_v43, %v8571_v43  ;;  %v8607_v43 = vsub.f32 %v11170_v63, %v8292_v44  ;;  %v8617_v14 = vsub.f32 %v11172_v17, %v8306_v54  ;;  %v4868_v44 = vld [vmem:[%s10673_s3 + $0x190] sm:$0xff]  ;;  %v11174_v63 = vld [vmem:[#allocation62_spill] sm:$0xff] }
 0x328   :  { %5979 = vmatprep.mubr.msk.f32.mxu1 %vm1051_vm0, %v2873_v34  ;;  %v8580_v33 = vpop.permute.xlu1 %2477  ;;  %11167 = vst [vmem:[#allocation58_spill] sm:$0xff] %v8584_v55  ;;  %v4865_v34 = vld [vmem:[%s10673_s3 + $0x178] sm:$0xff] }
 0x329   :  { %v8586_v31 = vpop.permute.xlu0 %4930  ;;  %5135 = vperm.xlu1 %6373, %v4863_v12   ;;  %11171 = vst [vmem:[#allocation60_spill] sm:$0xff] %v8607_v43  ;;  %11173 = vst [vmem:[#allocation63_spill] sm:$0xff] %v8617_v14 }
 0x32a   :  { %5140 = vperm.xlu0 %6372, %v4864_v27   ;;  %v2874_v27 = vmul.f32 %v8584_v55, %v8584_v55  ;;  %v11176_v55 = vld [vmem:[#allocation65_spill] sm:$0xff] }
 0x32b   :  { %3543 = vmatmul.mubr.f32.gmra.mrb[158].mxu1 %v2872_v53  ;;  %v2877_v53 = vmul.f32 %v8594_v7, %v8594_v7  ;;  %v8630_v7 = vsub.f32 %v11174_v63, %v8306_v54  ;;  %v8640_v18 = vsub.f32 %v11176_v55, %v8328_v24  ;;  %v4870_v54 = vld [vmem:[%s10673_s3 + $0x1a0] sm:$0xff]  ;;  %v11179_v63 = vld [vmem:[#allocation64_spill] sm:$0xff] }
 0x32c   :  { %5980 = vmatprep.mubr.msk.f32.mxu1 %vm1051_vm0, %v2875_v59  ;;  %v8603_v12 = vpop.permute.xlu1 %4935  ;;  %v4867_v59 = vld [vmem:[%s10673_s3 + $0x188] sm:$0xff] }
 0x32d   :  { %v8609_v19 = vpop.permute.xlu0 %2482  ;;  %5145 = vperm.xlu1 %6373, %v4865_v34   ;;  %11175 = vst [vmem:[#allocation62_spill] sm:$0xff] %v8630_v7  ;;  %11177 = vst [vmem:[#allocation65_spill] sm:$0xff] %v8640_v18 }
 0x32e   :  { %5150 = vperm.xlu0 %6372, %v4866_v40   ;;  %v2876_v40 = vmul.f32 %v8607_v43, %v8607_v43  ;;  %v11181_v43 = vld [vmem:[#allocation67_spill] sm:$0xff] }
 0x32f   :  { %3548 = vmatmul.mubr.f32.gmra.mrb[160].mxu1 %v2874_v27  ;;  %v2879_v27 = vmul.f32 %v8617_v14, %v8617_v14  ;;  %v8653_v14 = vsub.f32 %v11179_v63, %v8328_v24  ;;  %v8663_v60 = vsub.f32 %v11181_v43, %v8342_v41  ;;  %v4872_v24 = vld [vmem:[%s10673_s3 + $0x1b0] sm:$0xff]  ;;  %v11183_v63 = vld [vmem:[#allocation66_spill] sm:$0xff] }
 0x330   :  { %5981 = vmatprep.mubr.msk.f32.mxu1 %vm1051_vm0, %v2877_v53  ;;  %v8626_v34 = vpop.permute.xlu1 %2487  ;;  %v4869_v53 = vld [vmem:[%s10673_s3 + $0x198] sm:$0xff] }
 0x331   :  { %v8632_v17 = vpop.permute.xlu0 %4940  ;;  %5155 = vperm.xlu1 %6373, %v4867_v59   ;;  %11180 = vst [vmem:[#allocation64_spill] sm:$0xff] %v8653_v14  ;;  %11182 = vst [vmem:[#allocation67_spill] sm:$0xff] %v8663_v60 }
 0x332   :  { %5160 = vperm.xlu0 %6372, %v4868_v44   ;;  %v2878_v44 = vmul.f32 %v8630_v7, %v8630_v7  ;;  %v11186_v7 = vld [vmem:[#allocation69_spill] sm:$0xff] }
 0x333   :  { %3553 = vmatmul.mubr.f32.gmra.mrb[162].mxu1 %v2876_v40  ;;  %v2881_v40 = vmul.f32 %v8640_v18, %v8640_v18  ;;  %v8676_v18 = vsub.f32 %v11183_v63, %v8342_v41  ;;  %v8686_v5 = vsub.f32 %v11186_v7, %v8364_v36  ;;  %v4874_v41 = vld [vmem:[%s10673_s3 + $0x1c0] sm:$0xff]  ;;  %v11189_v63 = vld [vmem:[#allocation68_spill] sm:$0xff] }
 0x334   :  { %5982 = vmatprep.mubr.msk.f32.mxu1 %vm1051_vm0, %v2879_v27  ;;  %v8649_v59 = vpop.permute.xlu1 %4945  ;;  %v4871_v27 = vld [vmem:[%s10673_s3 + $0x1a8] sm:$0xff] }
 0x335   :  { %11178 = vst [vmem:[#allocation155_spill] sm:$0xff] %v8649_v59  ;;  %v8655_v55 = vpop.permute.xlu0 %2492  ;;  %5165 = vperm.xlu1 %6373, %v4869_v53   ;;  %11184 = vst [vmem:[#allocation66_spill] sm:$0xff] %v8676_v18 }
 0x336   :  { %5170 = vperm.xlu0 %6372, %v4870_v54   ;;  %v2880_v54 = vmul.f32 %v8653_v14, %v8653_v14  ;;  %11187 = vst [vmem:[#allocation69_spill] sm:$0xff] %v8686_v5  ;;  %v11191_v14 = vld [vmem:[#allocation71_spill] sm:$0xff] }
 0x337   :  { %3558 = vmatmul.mubr.f32.gmra.mrb[164].mxu1 %v2878_v44  ;;  %v2883_v44 = vmul.f32 %v8663_v60, %v8663_v60  ;;  %v8699_v60 = vsub.f32 %v11189_v63, %v8364_v36  ;;  %v8709_v30 = vsub.f32 %v11191_v14, %v8378_v6  ;;  %v4876_v36 = vld [vmem:[%s10673_s3 + $0x1d0] sm:$0xff]  ;;  %v11193_v63 = vld [vmem:[#allocation70_spill] sm:$0xff] }
 0x338   :  { %5983 = vmatprep.mubr.msk.f32.mxu1 %vm1051_vm0, %v2881_v40  ;;  %v8672_v53 = vpop.permute.xlu1 %2497  ;;  %v4873_v40 = vld [vmem:[%s10673_s3 + $0x1b8] sm:$0xff] }
 0x339   :  { %v8678_v43 = vpop.permute.xlu0 %4950  ;;  %5175 = vperm.xlu1 %6373, %v4871_v27   ;;  %11190 = vst [vmem:[#allocation68_spill] sm:$0xff] %v8699_v60  ;;  %11192 = vst [vmem:[#allocation71_spill] sm:$0xff] %v8709_v30 }
 0x33a   :  { %11185 = vst [vmem:[#allocation156_spill] sm:$0xff] %v8678_v43  ;;  %5180 = vperm.xlu0 %6372, %v4872_v24   ;;  %v2882_v24 = vmul.f32 %v8676_v18, %v8676_v18  ;;  %v11196_v18 = vld [vmem:[#allocation73_spill] sm:$0xff] }
 0x33b   :  { %3563 = vmatmul.mubr.f32.gmra.mrb[166].mxu1 %v2880_v54  ;;  %v2885_v54 = vmul.f32 %v8686_v5, %v8686_v5  ;;  %v8722_v5 = vsub.f32 %v11193_v63, %v8378_v6  ;;  %v4878_v6 = vld [vmem:[%s10673_s3 + $0x1e0] sm:$0xff]  ;;  %v11199_v63 = vld [vmem:[#allocation72_spill] sm:$0xff] }
 0x33c   :  { %5984 = vmatprep.mubr.msk.f32.mxu1 %vm1051_vm0, %v2883_v44  ;;  %v8695_v27 = vpop.permute.xlu1 %4955  ;;  %v4875_v44 = vld [vmem:[%s10673_s3 + $0x1c8] sm:$0xff] }
 0x33d   :  { %11188 = vst [vmem:[#allocation157_spill] sm:$0xff] %v8695_v27  ;;  %v8701_v7 = vpop.permute.xlu0 %2502  ;;  %5185 = vperm.xlu1 %6373, %v4873_v40   ;;  %11194 = vst [vmem:[#allocation70_spill] sm:$0xff] %v8722_v5  ;;  %v8732_v27 = vsub.f32 %v11196_v18, %v8400_v3 }
 0x33e   :  { %5190 = vperm.xlu0 %6372, %v4874_v41   ;;  %v2884_v41 = vmul.f32 %v8699_v60, %v8699_v60  ;;  %v11201_v60 = vld [vmem:[#allocation75_spill] sm:$0xff] }
 0x33f   :  { %3568 = vmatmul.mubr.f32.gmra.mrb[168].mxu1 %v2882_v24  ;;  %v2887_v24 = vmul.f32 %v8709_v30, %v8709_v30  ;;  %11197 = vst [vmem:[#allocation73_spill] sm:$0xff] %v8732_v27  ;;  %v8745_v30 = vsub.f32 %v11199_v63, %v8400_v3  ;;  %v4880_v3 = vld [vmem:[%s10673_s3 + $0x1f0] sm:$0xff]  ;;  %v11203_v63 = vld [vmem:[#allocation74_spill] sm:$0xff] }
 0x340   :  { %5985 = vmatprep.mubr.msk.f32.mxu1 %vm1051_vm0, %v2885_v54  ;;  %v8718_v40 = vpop.permute.xlu1 %2507  ;;  %v4877_v54 = vld [vmem:[%s10673_s3 + $0x1d8] sm:$0xff] }
 0x341   :  { %v8724_v14 = vpop.permute.xlu0 %4960  ;;  %5195 = vperm.xlu1 %6373, %v4875_v44   ;;  %11200 = vst [vmem:[#allocation72_spill] sm:$0xff] %v8745_v30 }
 0x342   :  { %11195 = vst [vmem:[#allocation158_spill] sm:$0xff] %v8724_v14  ;;  %5200 = vperm.xlu0 %6372, %v4876_v36   ;;  %v2886_v36 = vmul.f32 %v8722_v5, %v8722_v5  ;;  %v8755_v14 = vsub.f32 %v11201_v60, %v8414_v42  ;;  %v11206_v5 = vld [vmem:[#allocation77_spill] sm:$0xff] }
 0x343   :  { %3573 = vmatmul.mubr.f32.gmra.mrb[170].mxu1 %v2884_v41  ;;  %v2889_v41 = vmul.f32 %v8732_v27, %v8732_v27  ;;  %v8768_v27 = vsub.f32 %v11203_v63, %v8414_v42  ;;  %v4882_v42 = vld [vmem:[%s10673_s3 + $0x200] sm:$0xff]  ;;  %v11209_v63 = vld [vmem:[#allocation76_spill] sm:$0xff] }
 0x344   :  { %5986 = vmatprep.mubr.msk.f32.mxu1 %vm1051_vm0, %v2887_v24  ;;  %v8741_v44 = vpop.permute.xlu1 %4965  ;;  %11202 = vst [vmem:[#allocation75_spill] sm:$0xff] %v8755_v14  ;;  %v4879_v24 = vld [vmem:[%s10673_s3 + $0x1e8] sm:$0xff] }
 0x345   :  { %11198 = vst [vmem:[#allocation159_spill] sm:$0xff] %v8741_v44  ;;  %v8747_v18 = vpop.permute.xlu0 %2512  ;;  %5205 = vperm.xlu1 %6373, %v4877_v54   ;;  %11204 = vst [vmem:[#allocation74_spill] sm:$0xff] %v8768_v27  ;;  %v8778_v44 = vsub.f32 %v11206_v5, %v8436_v61 }
 0x346   :  { %5210 = vperm.xlu0 %6372, %v4878_v6   ;;  %v2888_v6 = vmul.f32 %v8745_v30, %v8745_v30  ;;  %v11211_v30 = vld [vmem:[#allocation79_spill] sm:$0xff] }
 0x347   :  { %3578 = vmatmul.mubr.f32.gmra.mrb[172].mxu1 %v2886_v36  ;;  %v2891_v36 = vmul.f32 %v8755_v14, %v8755_v14  ;;  %11207 = vst [vmem:[#allocation77_spill] sm:$0xff] %v8778_v44  ;;  %v8791_v14 = vsub.f32 %v11209_v63, %v8436_v61  ;;  %v4884_v61 = vld [vmem:[%s10673_s3 + $0x210] sm:$0xff]  ;;  %v11213_v63 = vld [vmem:[#allocation78_spill] sm:$0xff] }
 0x348   :  { %5987 = vmatprep.mubr.msk.f32.mxu1 %vm1051_vm0, %v2889_v41  ;;  %v8764_v54 = vpop.permute.xlu1 %2517  ;;  %v4881_v41 = vld [vmem:[%s10673_s3 + $0x1f8] sm:$0xff] }
 0x349   :  { %v8770_v60 = vpop.permute.xlu0 %4970  ;;  %5215 = vperm.xlu1 %6373, %v4879_v24   ;;  %11210 = vst [vmem:[#allocation76_spill] sm:$0xff] %v8791_v14 }
 0x34a   :  { %11205 = vst [vmem:[#allocation160_spill] sm:$0xff] %v8770_v60  ;;  %5220 = vperm.xlu0 %6372, %v4880_v3   ;;  %v2890_v3 = vmul.f32 %v8768_v27, %v8768_v27  ;;  %v8801_v60 = vsub.f32 %v11211_v30, %v8450_v37  ;;  %v11216_v27 = vld [vmem:[#allocation81_spill] sm:$0xff] }
 0x34b   :  { %3583 = vmatmul.mubr.f32.gmra.mrb[174].mxu1 %v2888_v6  ;;  %v2893_v6 = vmul.f32 %v8778_v44, %v8778_v44  ;;  %v8814_v44 = vsub.f32 %v11213_v63, %v8450_v37  ;;  %v4886_v37 = vld [vmem:[%s10673_s3 + $0x220] sm:$0xff]  ;;  %v11219_v63 = vld [vmem:[#allocation80_spill] sm:$0xff] }
 0x34c   :  { %5988 = vmatprep.mubr.msk.f32.mxu1 %vm1051_vm0, %v2891_v36  ;;  %v8787_v24 = vpop.permute.xlu1 %4975  ;;  %11212 = vst [vmem:[#allocation79_spill] sm:$0xff] %v8801_v60  ;;  %v4883_v36 = vld [vmem:[%s10673_s3 + $0x208] sm:$0xff] }
 0x34d   :  { %11208 = vst [vmem:[#allocation161_spill] sm:$0xff] %v8787_v24  ;;  %v8793_v5 = vpop.permute.xlu0 %2522  ;;  %5225 = vperm.xlu1 %6373, %v4881_v41   ;;  %11214 = vst [vmem:[#allocation78_spill] sm:$0xff] %v8814_v44  ;;  %v8824_v24 = vsub.f32 %v11216_v27, %v8472_v22 }
 0x34e   :  { %5230 = vperm.xlu0 %6372, %v4882_v42   ;;  %v2892_v42 = vmul.f32 %v8791_v14, %v8791_v14  ;;  %v11221_v14 = vld [vmem:[#allocation86_spill] sm:$0xff] }
 0x34f   :  { %3588 = vmatmul.mubr.f32.gmra.mrb[176].mxu1 %v2890_v3  ;;  %v2895_v3 = vmul.f32 %v8801_v60, %v8801_v60  ;;  %11217 = vst [vmem:[#allocation81_spill] sm:$0xff] %v8824_v24  ;;  %v8837_v60 = vsub.f32 %v11219_v63, %v8472_v22  ;;  %v4888_v22 = vld [vmem:[%s10673_s3 + $0x230] sm:$0xff]  ;;  %v11223_v63 = vld [vmem:[#allocation85_spill] sm:$0xff] }
 0x350   :  { %5989 = vmatprep.mubr.msk.f32.mxu1 %vm1051_vm0, %v2893_v6  ;;  %v8810_v41 = vpop.permute.xlu1 %2527  ;;  %v4885_v6 = vld [vmem:[%s10673_s3 + $0x218] sm:$0xff] }
 0x351   :  { %v8816_v30 = vpop.permute.xlu0 %4980  ;;  %5235 = vperm.xlu1 %6373, %v4883_v36   ;;  %11220 = vst [vmem:[#allocation80_spill] sm:$0xff] %v8837_v60 }
 0x352   :  { %11215 = vst [vmem:[#allocation162_spill] sm:$0xff] %v8816_v30  ;;  %5240 = vperm.xlu0 %6372, %v4884_v61   ;;  %v2894_v61 = vmul.f32 %v8814_v44, %v8814_v44  ;;  %v8847_v30 = vsub.f32 %v11221_v14, %v8514_v0  ;;  %v11226_v44 = vld [vmem:[#allocation90_spill] sm:$0xff] }
 0x353   :  { %3593 = vmatmul.mubr.f32.gmra.mrb[178].mxu1 %v2892_v42  ;;  %v2897_v42 = vmul.f32 %v8824_v24, %v8824_v24  ;;  %v8860_v24 = vsub.f32 %v11223_v63, %v8514_v0  ;;  %v4890_v0 = vld [vmem:[%s10673_s3 + $0x240] sm:$0xff]  ;;  %v11229_v63 = vld [vmem:[#allocation88_spill] sm:$0xff] }
 0x354   :  { %5990 = vmatprep.mubr.msk.f32.mxu1 %vm1051_vm0, %v2895_v3  ;;  %v8833_v36 = vpop.permute.xlu1 %4985  ;;  %11222 = vst [vmem:[#allocation86_spill] sm:$0xff] %v8847_v30  ;;  %v4887_v3 = vld [vmem:[%s10673_s3 + $0x228] sm:$0xff] }
 0x355   :  { %11218 = vst [vmem:[#allocation163_spill] sm:$0xff] %v8833_v36  ;;  %v8839_v27 = vpop.permute.xlu0 %2532  ;;  %5245 = vperm.xlu1 %6373, %v4885_v6   ;;  %11224 = vst [vmem:[#allocation85_spill] sm:$0xff] %v8860_v24  ;;  %v8870_v36 = vsub.f32 %v11226_v44, %v8532_v56 }
 0x356   :  { %5250 = vperm.xlu0 %6372, %v4886_v37   ;;  %v2896_v37 = vmul.f32 %v8837_v60, %v8837_v60  ;;  %v8893_v60 = vsub.f32 %v7569_v62, %v8563_v13 }
 0x357   :  { %3598 = vmatmul.mubr.f32.gmra.mrb[180].mxu1 %v2894_v61  ;;  %v2899_v61 = vmul.f32 %v8847_v30, %v8847_v30  ;;  %11227 = vst [vmem:[#allocation90_spill] sm:$0xff] %v8870_v36  ;;  %v8883_v30 = vsub.f32 %v11229_v63, %v8532_v56  ;;  %v4892_v56 = vld [vmem:[%s10673_s3 + $0x250] sm:$0xff] }
 0x358   :  { %5991 = vmatprep.mubr.msk.f32.mxu1 %vm1051_vm0, %v2897_v42  ;;  %v8856_v6 = vpop.permute.xlu1 %2537  ;;  %v4889_v42 = vld [vmem:[%s10673_s3 + $0x238] sm:$0xff]  ;;  %11231 = vst [vmem:[#allocation166_spill] sm:$0xff] %v8893_v60  ;;  %v11232_v63 = vld [vmem:[#allocation92_spill] sm:$0xff] }
 0x359   :  { %v8862_v14 = vpop.permute.xlu0 %4990  ;;  %5255 = vperm.xlu1 %6373, %v4887_v3   ;;  %11230 = vst [vmem:[#allocation88_spill] sm:$0xff] %v8883_v30 }
 0x35a   :  { %11225 = vst [vmem:[#allocation164_spill] sm:$0xff] %v8862_v14  ;;  %5260 = vperm.xlu0 %6372, %v4888_v22   ;;  %v2898_v22 = vmul.f32 %v8860_v24, %v8860_v24  ;;  %v11235_v24 = vld [vmem:[#allocation97_spill] sm:$0xff] }
 0x35b   :  { %3603 = vmatmul.mubr.f32.gmra.mrb[182].mxu1 %v2896_v37  ;;  %v2901_v37 = vmul.f32 %v8870_v36, %v8870_v36  ;;  %v8906_v36 = vsub.f32 %v11232_v63, %v8563_v13  ;;  %v4894_v13 = vld [vmem:[%s10673_s3 + $0x260] sm:$0xff]  ;;  %v11238_v63 = vld [vmem:[#allocation95_spill] sm:$0xff] }
 0x35c   :  { %5992 = vmatprep.mubr.msk.f32.mxu1 %vm1051_vm0, %v2899_v61  ;;  %v8879_v3 = vpop.permute.xlu1 %4995  ;;  %v4891_v61 = vld [vmem:[%s10673_s3 + $0x248] sm:$0xff] }
 0x35d   :  { %11228 = vst [vmem:[#allocation165_spill] sm:$0xff] %v8879_v3  ;;  %v8885_v44 = vpop.permute.xlu0 %2542  ;;  %5265 = vperm.xlu1 %6373, %v4889_v42   ;;  %11233 = vst [vmem:[#allocation92_spill] sm:$0xff] %v8906_v36  ;;  %v8916_v3 = vsub.f32 %v11235_v24, %v8580_v33 }
 0x35e   :  { %5270 = vperm.xlu0 %6372, %v4890_v0   ;;  %v2900_v0 = vmul.f32 %v8883_v30, %v8883_v30  ;;  %v11240_v30 = vld [vmem:[#allocation101_spill] sm:$0xff] }
 0x35f   :  { %3608 = vmatmul.mubr.f32.gmra.mrb[184].mxu1 %v2898_v22  ;;  %v2903_v22 = vmul.f32 %v8893_v60, %v8893_v60  ;;  %11236 = vst [vmem:[#allocation97_spill] sm:$0xff] %v8916_v3  ;;  %v8929_v60 = vsub.f32 %v11238_v63, %v8580_v33  ;;  %v4896_v33 = vld [vmem:[%s10673_s3 + $0x270] sm:$0xff]  ;;  %v11242_v63 = vld [vmem:[#allocation99_spill] sm:$0xff] }
 0x360   :  { %5993 = vmatprep.mubr.msk.f32.mxu1 %vm1051_vm0, %v2901_v37  ;;  %v8902_v42 = vpop.permute.xlu1 %2547  ;;  %v4893_v37 = vld [vmem:[%s10673_s3 + $0x258] sm:$0xff] }
 0x361   :  { %v8908_v62 = vpop.permute.xlu0 %5000  ;;  %5275 = vperm.xlu1 %6373, %v4891_v61   ;;  %11239 = vst [vmem:[#allocation95_spill] sm:$0xff] %v8929_v60 }
 0x362   :  { %11234 = vst [vmem:[#allocation167_spill] sm:$0xff] %v8908_v62  ;;  %5280 = vperm.xlu0 %6372, %v4892_v56   ;;  %v2902_v56 = vmul.f32 %v8906_v36, %v8906_v36  ;;  %v8939_v62 = vsub.f32 %v11240_v30, %v8609_v19  ;;  %v11245_v36 = vld [vmem:[#allocation105_spill] sm:$0xff] }
 0x363   :  { %3613 = vmatmul.mubr.f32.gmra.mrb[186].mxu1 %v2900_v0  ;;  %v2905_v0 = vmul.f32 %v8916_v3, %v8916_v3  ;;  %v8952_v3 = vsub.f32 %v11242_v63, %v8609_v19  ;;  %v4898_v19 = vld [vmem:[%s10673_s3 + $0x280] sm:$0xff]  ;;  %v11248_v63 = vld [vmem:[#allocation103_spill] sm:$0xff] }
 0x364   :  { %5994 = vmatprep.mubr.msk.f32.mxu1 %vm1051_vm0, %v2903_v22  ;;  %v8925_v61 = vpop.permute.xlu1 %5005  ;;  %11241 = vst [vmem:[#allocation101_spill] sm:$0xff] %v8939_v62  ;;  %v4895_v22 = vld [vmem:[%s10673_s3 + $0x268] sm:$0xff] }
 0x365   :  { %11237 = vst [vmem:[#allocation168_spill] sm:$0xff] %v8925_v61  ;;  %v8931_v24 = vpop.permute.xlu0 %2552  ;;  %5285 = vperm.xlu1 %6373, %v4893_v37   ;;  %11243 = vst [vmem:[#allocation99_spill] sm:$0xff] %v8952_v3  ;;  %v8962_v61 = vsub.f32 %v11245_v36, %v8626_v34 }
 0x366   :  { %5290 = vperm.xlu0 %6372, %v4894_v13   ;;  %v2904_v13 = vmul.f32 %v8929_v60, %v8929_v60  ;;  %v11250_v60 = vld [vmem:[#allocation109_spill] sm:$0xff] }
 0x367   :  { %3618 = vmatmul.mubr.f32.gmra.mrb[188].mxu1 %v2902_v56  ;;  %v2907_v56 = vmul.f32 %v8939_v62, %v8939_v62  ;;  %11246 = vst [vmem:[#allocation105_spill] sm:$0xff] %v8962_v61  ;;  %v8975_v62 = vsub.f32 %v11248_v63, %v8626_v34  ;;  %v4900_v34 = vld [vmem:[%s10673_s3 + $0x290] sm:$0xff]  ;;  %v11252_v63 = vld [vmem:[#allocation107_spill] sm:$0xff] }
 0x368   :  { %5995 = vmatprep.mubr.msk.f32.mxu1 %vm1051_vm0, %v2905_v0  ;;  %v8948_v37 = vpop.permute.xlu1 %2557  ;;  %v4897_v0 = vld [vmem:[%s10673_s3 + $0x278] sm:$0xff] }
 0x369   :  { %v8954_v30 = vpop.permute.xlu0 %5010  ;;  %5295 = vperm.xlu1 %6373, %v4895_v22   ;;  %11249 = vst [vmem:[#allocation103_spill] sm:$0xff] %v8975_v62 }
 0x36a   :  { %11244 = vst [vmem:[#allocation169_spill] sm:$0xff] %v8954_v30  ;;  %5300 = vperm.xlu0 %6372, %v4896_v33   ;;  %v2906_v33 = vmul.f32 %v8952_v3, %v8952_v3  ;;  %v8985_v30 = vsub.f32 %v11250_v60, %v8655_v55  ;;  %v11255_v3 = vld [vmem:[#allocation113_spill] sm:$0xff] }
 0x36b   :  { %3623 = vmatmul.mubr.f32.gmra.mrb[190].mxu1 %v2904_v13  ;;  %v2909_v13 = vmul.f32 %v8962_v61, %v8962_v61  ;;  %v8998_v61 = vsub.f32 %v11252_v63, %v8655_v55  ;;  %v4902_v55 = vld [vmem:[%s10673_s3 + $0x2a0] sm:$0xff]  ;;  %v11258_v63 = vld [vmem:[#allocation111_spill] sm:$0xff] }
 0x36c   :  { %5996 = vmatprep.mubr.msk.f32.mxu1 %vm1051_vm0, %v2907_v56  ;;  %v8971_v22 = vpop.permute.xlu1 %5015  ;;  %11251 = vst [vmem:[#allocation109_spill] sm:$0xff] %v8985_v30  ;;  %v4899_v56 = vld [vmem:[%s10673_s3 + $0x288] sm:$0xff] }
 0x36d   :  { %11247 = vst [vmem:[#allocation170_spill] sm:$0xff] %v8971_v22  ;;  %v8977_v36 = vpop.permute.xlu0 %2562  ;;  %5305 = vperm.xlu1 %6373, %v4897_v0   ;;  %11253 = vst [vmem:[#allocation107_spill] sm:$0xff] %v8998_v61  ;;  %v9008_v22 = vsub.f32 %v11255_v3, %v8672_v53 }
 0x36e   :  { %5310 = vperm.xlu0 %6372, %v4898_v19   ;;  %v2908_v19 = vmul.f32 %v8975_v62, %v8975_v62  ;;  %v2910_v62 = vmul.f32 %v8998_v61, %v8998_v61 }
 0x36f   :  { %3628 = vmatmul.mubr.f32.gmra.mrb[192].mxu1 %v2906_v33  ;;  %v2911_v33 = vmul.f32 %v8985_v30, %v8985_v30  ;;  %11256 = vst [vmem:[#allocation113_spill] sm:$0xff] %v9008_v22  ;;  %v9021_v30 = vsub.f32 %v11258_v63, %v8672_v53  ;;  %v4903_v53 = vld [vmem:[%s10673_s3 + $0x2a8] sm:$0xff] }
 0x370   :  { %5997 = vmatprep.mubr.msk.f32.mxu1 %vm1051_vm0, %v2909_v13  ;;  %v8994_v0 = vpop.permute.xlu1 %2567  ;;  %v4901_v13 = vld [vmem:[%s10673_s3 + $0x298] sm:$0xff] }
 0x371   :  { %v9000_v60 = vpop.permute.xlu0 %5020  ;;  %5315 = vperm.xlu1 %6373, %v4899_v56   ;;  %11259 = vst [vmem:[#allocation111_spill] sm:$0xff] %v9021_v30 }
 0x372   :  { %11254 = vst [vmem:[#allocation171_spill] sm:$0xff] %v9000_v60  ;;  %5320 = vperm.xlu0 %6372, %v4900_v34   ;;  %v11260_v60 = vld [vmem:[#allocation117_spill] sm:$0xff] }
 0x373   :  { %3633 = vmatmul.mubr.f32.gmra.mrb[194].mxu1 %v2908_v19  ;;  %v2913_v19 = vmul.f32 %v9008_v22, %v9008_v22  ;;  %v9031_v14 = vsub.f32 %v11260_v60, %v8701_v7  ;;  %v11262_v60 = vld [vmem:[#allocation115_spill] sm:$0xff] }
 0x374   :  { %5998 = vmatprep.mubr.msk.f32.mxu1 %vm1051_vm0, %v2911_v33  ;;  %v9017_v56 = vpop.permute.xlu1 %5025  ;;  %v9044_v61 = vsub.f32 %v11262_v60, %v8701_v7  ;;  %v4905_v7 = vld [vmem:[%s10673_s3 + $0x2b8] sm:$0xff] }
 0x375   :  { %11257 = vst [vmem:[#allocation172_spill] sm:$0xff] %v9017_v56  ;;  %v9023_v3 = vpop.permute.xlu0 %2572  ;;  %5325 = vperm.xlu1 %6373, %v4901_v13   ;;  %v3289_v34 = vpop.f32.mrb[180].mxu0  ;;  %11261 = vst [vmem:[#allocation117_spill] sm:$0xff] %v9031_v14  ;;  %v4904_v13 = vld [vmem:[%s10673_s3 + $0x2b0] sm:$0xff] }
 0x376   :  { %v3738_v33 = vmul.f32 0.0051020407, %v3289_v34  ;;  %5330 = vperm.xlu0 %6372, %v4902_v55   ;;  %v3291_v56 = vpop.f32.mrb[181].mxu0  ;;  %11263 = vst [vmem:[#allocation115_spill] sm:$0xff] %v9044_v61  ;;  %v2915_v34 = vmul.f32 %v9031_v14, %v9031_v14  ;;  %v11267_v14 = vld [vmem:[#allocation119_spill] sm:$0xff] }
 0x377   :  { %3638 = vmatmul.mubr.f32.gmra.mrb[196].mxu1 %v2910_v62  ;;  %v2912_v62 = vmul.f32 %v9021_v30, %v9021_v30  ;;  %v9064_v30 = vsub.f32 %v11267_v14, %v8718_v40 }
 0x378   :  { %v3918_v63 = vadd.f32 1e-05, %v3738_v33  ;;  %5999 = vmatprep.mubr.msk.f32.mxu1 %vm1051_vm0, %v2913_v19  ;;  %v9040_v22 = vpop.permute.xlu1 %2577  ;;  %v11264_v33 = vld [vmem:[#allocation121_spill] sm:$0xff] }
 0x379   :  { %v9046_v55 = vpop.permute.xlu0 %5030  ;;  %5335 = vperm.xlu1 %6373, %v4903_v53   ;;  %v3294_v56 = vpop.f32.mrb[182].mxu0  ;;  %v9054_v43 = vsub.f32 %v11264_v33, %v8718_v40  ;;  %11268 = vst [vmem:[#allocation119_spill] sm:$0xff] %v9064_v30 }
 0x37a   :  { %6487 = vrsqrt.f32 %v3918_v63  ;;  %v3739_v19 = vmul.f32 0.0051020407, %v3294_v56  ;;  %5340 = vperm.xlu0 %6372, %v4904_v13   ;;  %v3296_v59 = vpop.f32.mrb[183].mxu0  ;;  %v11269_v56 = vld [vmem:[#allocation125_spill] sm:$0xff] }
 0x37b   :  { %11265 = vst [vmem:[#allocation121_spill] sm:$0xff] %v9054_v43  ;;  %3643 = vmatmul.mubr.f32.gmra.mrb[198].mxu1 %v2912_v62  ;;  %v2914_v59 = vmul.f32 %v9044_v61, %v9044_v61  ;;  %v2917_v13 = vmul.f32 %v9054_v43, %v9054_v43  ;;  %v9074_v62 = vsub.f32 %v11269_v56, %v8747_v18 }
 0x37c   :  { %v3919_v53 = vadd.f32 1e-05, %v3739_v19  ;;  %6000 = vmatprep.mubr.msk.f32.mxu1 %vm1051_vm0, %v2915_v34  ;;  %v9060_v60 = vpop.permute.xlu1 %5035  ;;  %v2916_v56 = vmul.f32 %v9064_v30, %v9064_v30 }
 0x37d   :  { %11266 = vst [vmem:[#allocation173_spill] sm:$0xff] %v9060_v60  ;;  %5345 = vperm.xlu1 %6373, %v4905_v7   ;;  %v9066_v33 = vpop.permute.xlu0 %2582  ;;  %v3299_v63 = vpop.f32.mrb[184].mxu0  ;;  %11270 = vst [vmem:[#allocation125_spill] sm:$0xff] %v9074_v62  ;;  %v11271_v7 = vld [vmem:[#allocation123_spill] sm:$0xff] }
 0x37e   :  { %6489 = vrsqrt.f32 %v3919_v53  ;;  %v3740_v34 = vmul.f32 0.0051020407, %v3299_v63  ;;  %v3301_v19 = vpop.f32.mrb[185].mxu0  ;;  %v9081_v60 = vsub.f32 %v11271_v7, %v8747_v18  ;;  %v2919_v53 = vmul.f32 %v9074_v62, %v9074_v62  ;;  %v3828_v18 = vld [vmem:[%s10674_s2] sm:$0xff] }
 0x37f   :  { %3648 = vmatmul.mubr.f32.gmra.mrb[200].mxu1 %v2914_v59  ;;  %v9091_v63 = vsub.f32 %v7817_v57, %v8764_v54  ;;  %v9101_v62 = vsub.f32 %v7807_v52, %v8764_v54  ;;  %v3829_v52 = vld [vmem:[%s10674_s2 + $0x8] sm:$0xff] }
 0x380   :  { %v3920_v40 = vadd.f32 1e-05, %v3740_v34  ;;  %6001 = vmatprep.mubr.msk.f32.mxu1 %vm1051_vm0, %v2917_v13  ;;  %v9077_v14 = vpop.permute.xlu1 %2587  ;;  %11272 = vst [vmem:[#allocation123_spill] sm:$0xff] %v9081_v60 }
 0x381   :  { %v9083_v61 = vpop.permute.xlu0 %5040  ;;  %v3304_v43 = vpop.f32.mrb[186].mxu0  ;;  %11273 = vst [vmem:[#allocation174_spill] sm:$0xff] %v9091_v63  ;;  %11274 = vst [vmem:[#allocation175_spill] sm:$0xff] %v9101_v62 }
 0x382   :  { %6491 = vrsqrt.f32 %v3920_v40  ;;  %v3741_v59 = vmul.f32 0.0051020407, %v3304_v43  ;;  %v3306_v13 = vpop.f32.mrb[187].mxu0  ;;  %v2918_v43 = vmul.f32 %v9081_v60, %v9081_v60 }
 0x383   :  { %3653 = vmatmul.mubr.f32.gmra.mrb[202].mxu1 %v2916_v56  ;;  %v2921_v56 = vmul.f32 %v9091_v63, %v9091_v63 }
 0x384   :  { %v6488_v34 = vpop.eup %6487  ;;  %v3921_v19 = vadd.f32 1e-05, %v3741_v59  ;;  %6002 = vmatprep.mubr.msk.f32.mxu1 %vm1051_vm0, %v2919_v53  ;;  %v9097_v7 = vpop.permute.xlu1 %5045  ;;  %v9111_v59 = vsub.f32 %v7843_v39, %v8793_v5 }
 0x385   :  { %v9103_v57 = vpop.permute.xlu0 %5050  ;;  %v3309_v40 = vpop.f32.mrb[188].mxu0  ;;  %v4098_v13 = vmul.f32 %v6488_v34, %v3828_v18  ;;  %v9121_v34 = vsub.f32 %v7832_v25, %v8793_v5  ;;  %v3830_v25 = vld [vmem:[%s10674_s2 + $0x10] sm:$0xff] }
 0x386   :  { %11275 = vst [vmem:[#allocation176_spill] sm:$0xff] %v9103_v57  ;;  %11276 = vst [vmem:[#allocation177_spill] sm:$0xff] %v9111_v59  ;;  %6493 = vrsqrt.f32 %v3921_v19  ;;  %v3742_v53 = vmul.f32 0.0051020407, %v3309_v40  ;;  %v3311_v30 = vpop.f32.mrb[189].mxu0 }
 0x387   :  { %3658 = vmatmul.mubr.f32.gmra.mrb[204].mxu1 %v2918_v43  ;;  %4190 = vperm.xlu0 %6372, %v4098_v13   ;;  %11277 = vst [vmem:[#allocation178_spill] sm:$0xff] %v9121_v34  ;;  %v2920_v30 = vmul.f32 %v9101_v62, %v9101_v62  ;;  %v2923_v43 = vmul.f32 %v9111_v59, %v9111_v59  ;;  %v3847_v62 = vld [vmem:[%s10674_s2 + $0x98] sm:$0xff] }
 0x388   :  { %v6490_v54 = vpop.eup %6489  ;;  %v3922_v57 = vadd.f32 1e-05, %v3742_v53  ;;  %6003 = vmatprep.mubr.msk.f32.mxu1 %vm1051_vm0, %v2921_v56  ;;  %v9117_v18 = vpop.permute.xlu1 %5055  ;;  %v9131_v13 = vsub.f32 %v7867_v26, %v8810_v41 }
 0x389   :  { %v9123_v39 = vpop.permute.xlu0 %5060  ;;  %v3314_v19 = vpop.f32.mrb[190].mxu0  ;;  %v4099_v40 = vmul.f32 %v6490_v54, %v3829_v52  ;;  %v9141_v54 = vsub.f32 %v7857_v45, %v8810_v41  ;;  %v3831_v45 = vld [vmem:[%s10674_s2 + $0x18] sm:$0xff] }
 0x38a   :  { %11278 = vst [vmem:[#allocation179_spill] sm:$0xff] %v9131_v13  ;;  %6495 = vrsqrt.f32 %v3922_v57  ;;  %v3743_v56 = vmul.f32 0.0051020407, %v3314_v19  ;;  %v3316_v53 = vpop.f32.mrb[191].mxu0  ;;  %v2922_v19 = vmul.f32 %v9121_v34, %v9121_v34 }
 0x38b   :  { %3663 = vmatmul.mubr.f32.gmra.mrb[206].mxu1 %v2920_v30  ;;  %4195 = vperm.xlu1 %6373, %v4099_v40   ;;  %11279 = vst [vmem:[#allocation180_spill] sm:$0xff] %v9141_v54  ;;  %v2925_v30 = vmul.f32 %v9131_v13, %v9131_v13  ;;  %v9151_v40 = vsub.f32 %v7893_v28, %v8839_v27 }
 0x38c   :  { %v6492_v5 = vpop.eup %6491  ;;  %v3923_v63 = vadd.f32 1e-05, %v3743_v56  ;;  %6004 = vmatprep.mubr.msk.f32.mxu1 %vm1051_vm0, %v2923_v43  ;;  %v9137_v52 = vpop.permute.xlu1 %5065 }
 0x38d   :  { %v9143_v26 = vpop.permute.xlu0 %5070  ;;  %v3319_v57 = vpop.f32.mrb[192].mxu0  ;;  %v4100_v53 = vmul.f32 %v6492_v5, %v3830_v25  ;;  %11280 = vst [vmem:[#allocation181_spill] sm:$0xff] %v9151_v40  ;;  %v9161_v5 = vsub.f32 %v7882_v15, %v8839_v27  ;;  %v3832_v15 = vld [vmem:[%s10674_s2 + $0x20] sm:$0xff] }
 0x38e   :  { %6497 = vrsqrt.f32 %v3923_v63  ;;  %v3744_v43 = vmul.f32 0.0051020407, %v3319_v57  ;;  %v3321_v56 = vpop.f32.mrb[193].mxu0  ;;  %v2924_v57 = vmul.f32 %v9141_v54, %v9141_v54 }
 0x38f   :  { %3668 = vmatmul.mubr.f32.gmra.mrb[208].mxu1 %v2922_v19  ;;  %4200 = vperm.xlu0 %6372, %v4100_v53   ;;  %11281 = vst [vmem:[#allocation182_spill] sm:$0xff] %v9161_v5  ;;  %v2927_v19 = vmul.f32 %v9151_v40, %v9151_v40  ;;  %v9171_v53 = vsub.f32 %v7917_v21, %v8856_v6 }
 0x390   :  { %v6494_v41 = vpop.eup %6493  ;;  %v3924_v59 = vadd.f32 1e-05, %v3744_v43  ;;  %6005 = vmatprep.mubr.msk.f32.mxu1 %vm1051_vm0, %v2925_v30  ;;  %v9157_v25 = vpop.permute.xlu1 %5075 }
 0x391   :  { %v9163_v28 = vpop.permute.xlu0 %5080  ;;  %v3324_v63 = vpop.f32.mrb[194].mxu0  ;;  %v4101_v56 = vmul.f32 %v6494_v41, %v3831_v45  ;;  %11282 = vst [vmem:[#allocation183_spill] sm:$0xff] %v9171_v53  ;;  %v9181_v41 = vsub.f32 %v7907_v8, %v8856_v6  ;;  %v3833_v8 = vld [vmem:[%s10674_s2 + $0x28] sm:$0xff] }
 0x392   :  { %6499 = vrsqrt.f32 %v3924_v59  ;;  %v3745_v30 = vmul.f32 0.0051020407, %v3324_v63  ;;  %v3326_v43 = vpop.f32.mrb[195].mxu0  ;;  %v2926_v63 = vmul.f32 %v9161_v5, %v9161_v5 }
 0x393   :  { %3673 = vmatmul.mubr.f32.gmra.mrb[210].mxu1 %v2924_v57  ;;  %4205 = vperm.xlu1 %6373, %v4101_v56   ;;  %11283 = vst [vmem:[#allocation184_spill] sm:$0xff] %v9181_v41  ;;  %v2929_v57 = vmul.f32 %v9171_v53, %v9171_v53  ;;  %v9191_v56 = vsub.f32 %v7952_v58, %v8885_v44 }
 0x394   :  { %v6496_v27 = vpop.eup %6495  ;;  %v3925_v13 = vadd.f32 1e-05, %v3745_v30  ;;  %6006 = vmatprep.mubr.msk.f32.mxu1 %vm1051_vm0, %v2927_v19  ;;  %v9177_v45 = vpop.permute.xlu1 %5085 }
 0x395   :  { %v9183_v21 = vpop.permute.xlu0 %5090  ;;  %v3329_v59 = vpop.f32.mrb[196].mxu0  ;;  %v4102_v43 = vmul.f32 %v6496_v27, %v3832_v15  ;;  %11284 = vst [vmem:[#allocation185_spill] sm:$0xff] %v9191_v56  ;;  %v9201_v27 = vsub.f32 %v7935_v16, %v8885_v44  ;;  %v3834_v16 = vld [vmem:[%s10674_s2 + $0x30] sm:$0xff] }
 0x396   :  { %6501 = vrsqrt.f32 %v3925_v13  ;;  %v3746_v19 = vmul.f32 0.0051020407, %v3329_v59  ;;  %v3331_v30 = vpop.f32.mrb[197].mxu0  ;;  %v2928_v59 = vmul.f32 %v9181_v41, %v9181_v41 }
 0x397   :  { %3678 = vmatmul.mubr.f32.gmra.mrb[212].mxu1 %v2926_v63  ;;  %4210 = vperm.xlu0 %6372, %v4102_v43   ;;  %11285 = vst [vmem:[#allocation186_spill] sm:$0xff] %v9201_v27  ;;  %v2931_v63 = vmul.f32 %v9191_v56, %v9191_v56  ;;  %v9211_v43 = vsub.f32 %v7982_v46, %v8902_v42 }
 0x398   :  { %v6498_v6 = vpop.eup %6497  ;;  %v3926_v40 = vadd.f32 1e-05, %v3746_v19  ;;  %6007 = vmatprep.mubr.msk.f32.mxu1 %vm1051_vm0, %v2929_v57  ;;  %v9197_v15 = vpop.permute.xlu1 %5095 }
 0x399   :  { %v9203_v58 = vpop.permute.xlu0 %5100  ;;  %v3334_v13 = vpop.f32.mrb[198].mxu0  ;;  %v4103_v30 = vmul.f32 %v6498_v6, %v3833_v8  ;;  %11286 = vst [vmem:[#allocation187_spill] sm:$0xff] %v9211_v43  ;;  %v9221_v6 = vsub.f32 %v7970_v48, %v8902_v42  ;;  %v3835_v48 = vld [vmem:[%s10674_s2 + $0x38] sm:$0xff] }
 0x39a   :  { %6503 = vrsqrt.f32 %v3926_v40  ;;  %v3747_v57 = vmul.f32 0.0051020407, %v3334_v13  ;;  %v3336_v19 = vpop.f32.mrb[199].mxu0  ;;  %v2930_v13 = vmul.f32 %v9201_v27, %v9201_v27 }
 0x39b   :  { %3683 = vmatmul.mubr.f32.gmra.mrb[214].mxu1 %v2928_v59  ;;  %4215 = vperm.xlu1 %6373, %v4103_v30   ;;  %11287 = vst [vmem:[#allocation188_spill] sm:$0xff] %v9221_v6  ;;  %v2933_v59 = vmul.f32 %v9211_v43, %v9211_v43  ;;  %v9231_v30 = vsub.f32 %v8018_v38, %v8931_v24 }
 0x39c   :  { %v6500_v44 = vpop.eup %6499  ;;  %v3927_v53 = vadd.f32 1e-05, %v3747_v57  ;;  %6008 = vmatprep.mubr.msk.f32.mxu1 %vm1051_vm0, %v2931_v63  ;;  %v9217_v8 = vpop.permute.xlu1 %5105 }
 0x39d   :  { %v9223_v46 = vpop.permute.xlu0 %5110  ;;  %v3339_v40 = vpop.f32.mrb[200].mxu0  ;;  %v4104_v19 = vmul.f32 %v6500_v44, %v3834_v16  ;;  %11288 = vst [vmem:[#allocation189_spill] sm:$0xff] %v9231_v30  ;;  %v9241_v44 = vsub.f32 %v8000_v2, %v8931_v24  ;;  %v3836_v2 = vld [vmem:[%s10674_s2 + $0x40] sm:$0xff] }
 0x39e   :  { %6505 = vrsqrt.f32 %v3927_v53  ;;  %v3748_v63 = vmul.f32 0.0051020407, %v3339_v40  ;;  %v3341_v57 = vpop.f32.mrb[201].mxu0  ;;  %v2932_v40 = vmul.f32 %v9221_v6, %v9221_v6 }
 0x39f   :  { %3688 = vmatmul.mubr.f32.gmra.mrb[216].mxu1 %v2930_v13  ;;  %4220 = vperm.xlu0 %6372, %v4104_v19   ;;  %11289 = vst [vmem:[#allocation190_spill] sm:$0xff] %v9241_v44  ;;  %v2935_v13 = vmul.f32 %v9231_v30, %v9231_v30  ;;  %v9251_v19 = vsub.f32 %v8048_v23, %v8948_v37 }
 0x3a0   :  { %v6502_v42 = vpop.eup %6501  ;;  %v3928_v56 = vadd.f32 1e-05, %v3748_v63  ;;  %6009 = vmatprep.mubr.msk.f32.mxu1 %vm1051_vm0, %v2933_v59  ;;  %v9237_v16 = vpop.permute.xlu1 %5115 }
 0x3a1   :  { %v9243_v38 = vpop.permute.xlu0 %5120  ;;  %v3344_v53 = vpop.f32.mrb[202].mxu0  ;;  %v4105_v57 = vmul.f32 %v6502_v42, %v3835_v48  ;;  %11290 = vst [vmem:[#allocation191_spill] sm:$0xff] %v9251_v19  ;;  %v9261_v42 = vsub.f32 %v8033_v11, %v8948_v37  ;;  %v3837_v11 = vld [vmem:[%s10674_s2 + $0x48] sm:$0xff] }
 0x3a2   :  { %6507 = vrsqrt.f32 %v3928_v56  ;;  %v3749_v59 = vmul.f32 0.0051020407, %v3344_v53  ;;  %v3346_v63 = vpop.f32.mrb[203].mxu0  ;;  %v2934_v53 = vmul.f32 %v9241_v44, %v9241_v44 }
 0x3a3   :  { %3693 = vmatmul.mubr.f32.gmra.mrb[218].mxu1 %v2932_v40  ;;  %4225 = vperm.xlu1 %6373, %v4105_v57   ;;  %11291 = vst [vmem:[#allocation192_spill] sm:$0xff] %v9261_v42  ;;  %v2937_v40 = vmul.f32 %v9251_v19, %v9251_v19  ;;  %v9271_v57 = vsub.f32 %v8062_v32, %v8977_v36 }
 0x3a4   :  { %v6504_v24 = vpop.eup %6503  ;;  %v3929_v43 = vadd.f32 1e-05, %v3749_v59  ;;  %6010 = vmatprep.mubr.msk.f32.mxu1 %vm1051_vm0, %v2935_v13  ;;  %v9257_v48 = vpop.permute.xlu1 %5125 }
 0x3a5   :  { %v9263_v23 = vpop.permute.xlu0 %5130  ;;  %v3349_v56 = vpop.f32.mrb[204].mxu0  ;;  %v4106_v63 = vmul.f32 %v6504_v24, %v3836_v2  ;;  %11292 = vst [vmem:[#allocation193_spill] sm:$0xff] %v9271_v57  ;;  %v9281_v24 = vsub.f32 %v8059_v9, %v8977_v36  ;;  %v3838_v9 = vld [vmem:[%s10674_s2 + $0x50] sm:$0xff] }
 0x3a6   :  { %6509 = vrsqrt.f32 %v3929_v43  ;;  %v3750_v13 = vmul.f32 0.0051020407, %v3349_v56  ;;  %v3351_v59 = vpop.f32.mrb[205].mxu0  ;;  %v2936_v56 = vmul.f32 %v9261_v42, %v9261_v42 }
 0x3a7   :  { %3698 = vmatmul.mubr.f32.gmra.mrb[220].mxu1 %v2934_v53  ;;  %4230 = vperm.xlu0 %6372, %v4106_v63   ;;  %11293 = vst [vmem:[#allocation194_spill] sm:$0xff] %v9281_v24  ;;  %v2939_v53 = vmul.f32 %v9271_v57, %v9271_v57  ;;  %v9291_v63 = vsub.f32 %v8089_v50, %v8994_v0 }
 0x3a8   :  { %v6506_v37 = vpop.eup %6505  ;;  %v3930_v30 = vadd.f32 1e-05, %v3750_v13  ;;  %6011 = vmatprep.mubr.msk.f32.mxu1 %vm1051_vm0, %v2937_v40  ;;  %v9277_v2 = vpop.permute.xlu1 %5135 }
 0x3a9   :  { %v9283_v32 = vpop.permute.xlu0 %5140  ;;  %v3354_v43 = vpop.f32.mrb[206].mxu0  ;;  %v4107_v59 = vmul.f32 %v6506_v37, %v3837_v11  ;;  %11294 = vst [vmem:[#allocation195_spill] sm:$0xff] %v9291_v63  ;;  %v9301_v37 = vsub.f32 %v8074_v10, %v8994_v0  ;;  %v3839_v10 = vld [vmem:[%s10674_s2 + $0x58] sm:$0xff] }
 0x3aa   :  { %6511 = vrsqrt.f32 %v3930_v30  ;;  %v3751_v40 = vmul.f32 0.0051020407, %v3354_v43  ;;  %v3356_v13 = vpop.f32.mrb[207].mxu0  ;;  %v2938_v43 = vmul.f32 %v9281_v24, %v9281_v24 }
 0x3ab   :  { %3703 = vmatmul.mubr.f32.gmra.mrb[222].mxu1 %v2936_v56  ;;  %4235 = vperm.xlu1 %6373, %v4107_v59   ;;  %11295 = vst [vmem:[#allocation196_spill] sm:$0xff] %v9301_v37  ;;  %v2941_v56 = vmul.f32 %v9291_v63, %v9291_v63  ;;  %v9311_v59 = vsub.f32 %v8102_v49, %v9023_v3 }
 0x3ac   :  { %v6508_v36 = vpop.eup %6507  ;;  %v3931_v19 = vadd.f32 1e-05, %v3751_v40  ;;  %6012 = vmatprep.mubr.msk.f32.mxu1 %vm1051_vm0, %v2939_v53  ;;  %v9297_v11 = vpop.permute.xlu1 %5145 }
 0x3ad   :  { %v9303_v50 = vpop.permute.xlu0 %5150  ;;  %v3359_v30 = vpop.f32.mrb[208].mxu0  ;;  %v4108_v13 = vmul.f32 %v6508_v36, %v3838_v9  ;;  %11296 = vst [vmem:[#allocation197_spill] sm:$0xff] %v9311_v59  ;;  %v9321_v36 = vsub.f32 %v8096_v51, %v9023_v3  ;;  %v3840_v51 = vld [vmem:[%s10674_s2 + $0x60] sm:$0xff] }
 0x3ae   :  { %6513 = vrsqrt.f32 %v3931_v19  ;;  %v3752_v53 = vmul.f32 0.0051020407, %v3359_v30  ;;  %v3361_v40 = vpop.f32.mrb[209].mxu0  ;;  %v2940_v30 = vmul.f32 %v9301_v37, %v9301_v37 }
 0x3af   :  { %3708 = vmatmul.mubr.f32.gmra.mrb[224].mxu1 %v2938_v43  ;;  %4240 = vperm.xlu0 %6372, %v4108_v13   ;;  %11297 = vst [vmem:[#allocation198_spill] sm:$0xff] %v9321_v36  ;;  %v2943_v43 = vmul.f32 %v9311_v59, %v9311_v59  ;;  %v9331_v13 = vsub.f32 %v8128_v4, %v9040_v22 }
 0x3b0   :  { %v6510_v0 = vpop.eup %6509  ;;  %v3932_v57 = vadd.f32 1e-05, %v3752_v53  ;;  %6013 = vmatprep.mubr.msk.f32.mxu1 %vm1051_vm0, %v2941_v56  ;;  %v9317_v9 = vpop.permute.xlu1 %5155 }
 0x3b1   :  { %v9323_v49 = vpop.permute.xlu0 %5160  ;;  %v3364_v19 = vpop.f32.mrb[210].mxu0  ;;  %v4109_v40 = vmul.f32 %v6510_v0, %v3839_v10  ;;  %11298 = vst [vmem:[#allocation199_spill] sm:$0xff] %v9331_v13  ;;  %v11299_v0 = vld [vmem:[#allocation151_spill] sm:$0xff] }
 0x3b2   :  { %6515 = vrsqrt.f32 %v3932_v57  ;;  %v3753_v56 = vmul.f32 0.0051020407, %v3364_v19  ;;  %v3366_v53 = vpop.f32.mrb[211].mxu0  ;;  %v9341_v59 = vsub.f32 %v11299_v0, %v9040_v22  ;;  %v2942_v19 = vmul.f32 %v9321_v36, %v9321_v36  ;;  %v3841_v22 = vld [vmem:[%s10674_s2 + $0x68] sm:$0xff] }
 0x3b3   :  { %3713 = vmatmul.mubr.f32.gmra.mrb[226].mxu1 %v2940_v30  ;;  %4245 = vperm.xlu1 %6373, %v4109_v40   ;;  %v2945_v30 = vmul.f32 %v9331_v13, %v9331_v13  ;;  %v11301_v40 = vld [vmem:[#allocation153_spill] sm:$0xff] }
 0x3b4   :  { %v6512_v3 = vpop.eup %6511  ;;  %v3933_v63 = vadd.f32 1e-05, %v3753_v56  ;;  %6014 = vmatprep.mubr.msk.f32.mxu1 %vm1051_vm0, %v2943_v43  ;;  %v9337_v10 = vpop.permute.xlu1 %5165  ;;  %11300 = vst [vmem:[#allocation151_spill] sm:$0xff] %v9341_v59  ;;  %v9351_v56 = vsub.f32 %v11301_v40, %v9066_v33  ;;  %v11303_v40 = vld [vmem:[#allocation152_spill] sm:$0xff] }
 0x3b5   :  { %v9343_v4 = vpop.permute.xlu0 %5170  ;;  %v3369_v57 = vpop.f32.mrb[212].mxu0  ;;  %v4110_v53 = vmul.f32 %v6512_v3, %v3840_v51 }
 0x3b6   :  { %11302 = vst [vmem:[#allocation153_spill] sm:$0xff] %v9351_v56  ;;  %6517 = vrsqrt.f32 %v3933_v63  ;;  %v3754_v43 = vmul.f32 0.0051020407, %v3369_v57  ;;  %v3454_v37 = vpop.f32.mrb[122].mxu1  ;;  %v3371_v24 = vpop.f32.mrb[213].mxu0  ;;  %v9361_v63 = vsub.f32 %v11303_v40, %v9066_v33 }
 0x3b7   :  { %v3771_v0 = vmul.f32 0.0051020407, %v3454_v37  ;;  %v3456_v42 = vpop.f32.mrb[123].mxu1  ;;  %3718 = vmatmul.mubr.f32.gmra.mrb[228].mxu1 %v2942_v19  ;;  %4250 = vperm.xlu0 %6372, %v4110_v53   ;;  %v2944_v37 = vmul.f32 %v9341_v59, %v9341_v59  ;;  %v2947_v19 = vmul.f32 %v9351_v56, %v9351_v56  ;;  %v9371_v53 = vsub.f32 %v8171_v20, %v9077_v14  ;;  %v11306_v20 = vld [vmem:[#allocation154_spill] sm:$0xff] }
 0x3b8   :  { %v6514_v51 = vpop.eup %6513  ;;  %v3934_v3 = vadd.f32 1e-05, %v3754_v43  ;;  %6015 = vmatprep.mubr.msk.f32.mxu1 %vm1051_vm0, %v2945_v30  ;;  %v9357_v13 = vpop.permute.xlu1 %5175  ;;  %11304 = vst [vmem:[#allocation152_spill] sm:$0xff] %v9361_v63 }
 0x3b9   :  { %v3951_v57 = vadd.f32 1e-05, %v3771_v0  ;;  %v9363_v24 = vpop.permute.xlu0 %5180  ;;  %v3374_v36 = vpop.f32.mrb[214].mxu0  ;;  %v4111_v42 = vmul.f32 %v6514_v51, %v3841_v22  ;;  %11305 = vst [vmem:[#allocation200_spill] sm:$0xff] %v9371_v53  ;;  %v3842_v0 = vld [vmem:[%s10674_s2 + $0x70] sm:$0xff] }
 0x3ba   :  { %6519 = vrsqrt.f32 %v3934_v3  ;;  %v3755_v30 = vmul.f32 0.0051020407, %v3374_v36  ;;  %v3459_v43 = vpop.f32.mrb[124].mxu1  ;;  %v3376_v33 = vpop.f32.mrb[215].mxu0  ;;  %v9381_v36 = vsub.f32 %v11306_v20, %v9077_v14  ;;  %v3843_v14 = vld [vmem:[%s10674_s2 + $0x78] sm:$0xff] }
 0x3bb   :  { %6521 = vrsqrt.f32 %v3951_v57  ;;  %v3772_v40 = vmul.f32 0.0051020407, %v3459_v43  ;;  %v3461_v44 = vpop.f32.mrb[125].mxu1  ;;  %3723 = vmatmul.mubr.f32.gmra.mrb[230].mxu1 %v2944_v37  ;;  %4255 = vperm.xlu1 %6373, %v4111_v42   ;;  %v2946_v57 = vmul.f32 %v9361_v63, %v9361_v63  ;;  %v2949_v37 = vmul.f32 %v9371_v53, %v9371_v53 }
 0x3bc   :  { %v6516_v22 = vpop.eup %6515  ;;  %v3935_v51 = vadd.f32 1e-05, %v3755_v30  ;;  %6016 = vmatprep.mubr.msk.f32.mxu1 %vm1051_vm0, %v2947_v19  ;;  %v9377_v56 = vpop.permute.xlu1 %5185  ;;  %11307 = vst [vmem:[#allocation154_spill] sm:$0xff] %v9381_v36 }
 0x3bd   :  { %v3952_v3 = vadd.f32 1e-05, %v3772_v40  ;;  %v9383_v33 = vpop.permute.xlu0 %5190  ;;  %v3379_v59 = vpop.f32.mrb[216].mxu0  ;;  %v4112_v44 = vmul.f32 %v6516_v22, %v3842_v0 }
 0x3be   :  { %6523 = vrsqrt.f32 %v3935_v51  ;;  %v3756_v42 = vmul.f32 0.0051020407, %v3379_v59  ;;  %v3464_v19 = vpop.f32.mrb[126].mxu1  ;;  %v3381_v30 = vpop.f32.mrb[217].mxu0 }
 0x3bf   :  { %6525 = vrsqrt.f32 %v3952_v3  ;;  %v3773_v43 = vmul.f32 0.0051020407, %v3464_v19  ;;  %v3466_v40 = vpop.f32.mrb[127].mxu1  ;;  %3728 = vmatmul.mubr.f32.gmra.mrb[232].mxu1 %v2946_v57  ;;  %4260 = vperm.xlu0 %6372, %v4112_v44   ;;  %v2948_v30 = vmul.f32 %v9381_v36, %v9381_v36  ;;  %v3844_v57 = vld [vmem:[%s10674_s2 + $0x80] sm:$0xff] }
 0x3c0   :  { %v6518_v20 = vpop.eup %6517  ;;  %v3936_v6 = vadd.f32 1e-05, %v3756_v42  ;;  %6017 = vmatprep.mubr.msk.f32.mxu1 %vm1051_vm0, %v2949_v37  ;;  %v9393_v0 = vpop.permute.xlu1 %5195  ;;  %v3861_v42 = vld [vmem:[%s10674_s2 + $0x108] sm:$0xff] }
 0x3c1   :  { %v3953_v22 = vadd.f32 1e-05, %v3773_v43  ;;  %v9395_v51 = vpop.permute.xlu0 %5200  ;;  %v3384_v59 = vpop.f32.mrb[218].mxu0  ;;  %v4113_v53 = vmul.f32 %v6518_v20, %v3843_v14 }
 0x3c2   :  { %6527 = vrsqrt.f32 %v3936_v6  ;;  %v3757_v3 = vmul.f32 0.0051020407, %v3384_v59  ;;  %v3469_v19 = vpop.f32.mrb[128].mxu1  ;;  %v3386_v40 = vpop.f32.mrb[219].mxu0 }
 0x3c3   :  { %6529 = vrsqrt.f32 %v3953_v22  ;;  %v3774_v44 = vmul.f32 0.0051020407, %v3469_v19  ;;  %v3471_v37 = vpop.f32.mrb[129].mxu1  ;;  %3733 = vmatmul.mubr.f32.gmra.mrb[234].mxu1 %v2948_v30  ;;  %4265 = vperm.xlu1 %6373, %v4113_v53   ;;  %v3845_v53 = vld [vmem:[%s10674_s2 + $0x88] sm:$0xff] }
 0x3c4   :  { %v6520_v43 = vpop.eup %6519  ;;  %v3937_v36 = vadd.f32 1e-05, %v3757_v3  ;;  %v9405_v14 = vpop.permute.xlu1 %5205 }
 0x3c5   :  { %v6522_v6 = vpop.eup %6521  ;;  %v3954_v20 = vadd.f32 1e-05, %v3774_v44  ;;  %v9407_v59 = vpop.permute.xlu0 %5210  ;;  %v4114_v63 = vmul.f32 %v6520_v43, %v3844_v57  ;;  %v3862_v44 = vld [vmem:[%s10674_s2 + $0x110] sm:$0xff] }
 0x3c6   :  { %v3389_v40 = vpop.f32.mrb[220].mxu0  ;;  %6531 = vrsqrt.f32 %v3937_v36  ;;  %v3474_v19 = vpop.f32.mrb[130].mxu1  ;;  %v4131_v30 = vmul.f32 %v6522_v6, %v3861_v42 }
 0x3c7   :  { %v3758_v22 = vmul.f32 0.0051020407, %v3389_v40  ;;  %v3391_v37 = vpop.f32.mrb[221].mxu0  ;;  %6533 = vrsqrt.f32 %v3954_v20  ;;  %v3775_v27 = vmul.f32 0.0051020407, %v3474_v19  ;;  %v3476_v3 = vpop.f32.mrb[131].mxu1  ;;  %4270 = vperm.xlu0 %6372, %v4114_v63  }
 0x3c8   :  { %v6524_v41 = vpop.eup %6523  ;;  %4355 = vperm.xlu1 %6373, %v4131_v30   ;;  %v9415_v36 = vpop.permute.xlu1 %5215  ;;  %v3846_v3 = vld [vmem:[%s10674_s2 + $0x90] sm:$0xff] }
 0x3c9   :  { %v3938_v5 = vadd.f32 1e-05, %v3758_v22  ;;  %v6526_v57 = vpop.eup %6525  ;;  %v3955_v43 = vadd.f32 1e-05, %v3775_v27  ;;  %v9417_v42 = vpop.permute.xlu0 %5220  ;;  %v4115_v40 = vmul.f32 %v6524_v41, %v3845_v53  ;;  %v3863_v27 = vld [vmem:[%s10674_s2 + $0x118] sm:$0xff] }
 0x3ca   :  { %v3394_v6 = vpop.f32.mrb[222].mxu0  ;;  %v3479_v19 = vpop.f32.mrb[132].mxu1  ;;  %v4132_v63 = vmul.f32 %v6526_v57, %v3862_v44 }
 0x3cb   :  { %6535 = vrsqrt.f32 %v3938_v5  ;;  %v3759_v20 = vmul.f32 0.0051020407, %v3394_v6  ;;  %v3396_v37 = vpop.f32.mrb[223].mxu0  ;;  %v3776_v22 = vmul.f32 0.0051020407, %v3479_v19  ;;  %v3481_v30 = vpop.f32.mrb[133].mxu1 }
 0x3cc   :  { %6537 = vrsqrt.f32 %v3955_v43  ;;  %v6528_v54 = vpop.eup %6527  ;;  %4360 = vperm.xlu0 %6372, %v4132_v63   ;;  %4275 = vperm.xlu1 %6373, %v4115_v40   ;;  %v9425_v5 = vpop.permute.xlu1 %5225  ;;  %v3864_v63 = vld [vmem:[%s10674_s2 + $0x120] sm:$0xff] }
 0x3cd   :  { %v3939_v34 = vadd.f32 1e-05, %v3759_v20  ;;  %v6530_v41 = vpop.eup %6529  ;;  %v3956_v53 = vadd.f32 1e-05, %v3776_v22  ;;  %v9427_v44 = vpop.permute.xlu0 %5230  ;;  %v4116_v6 = vmul.f32 %v6528_v54, %v3846_v3 }
 0x3ce   :  { %11308 = vst [vmem:[#allocation201_spill] sm:$0xff] %v9427_v44  ;;  %v3399_v57 = vpop.f32.mrb[224].mxu0  ;;  %v3484_v19 = vpop.f32.mrb[134].mxu1  ;;  %v4133_v30 = vmul.f32 %v6530_v41, %v3863_v27  ;;  %v3848_v44 = vld [vmem:[%s10674_s2 + $0xa0] sm:$0xff] }
 0x3cf   :  { %6539 = vrsqrt.f32 %v3939_v34  ;;  %v3760_v43 = vmul.f32 0.0051020407, %v3399_v57  ;;  %v3401_v37 = vpop.f32.mrb[225].mxu0  ;;  %v3777_v20 = vmul.f32 0.0051020407, %v3484_v19  ;;  %v3486_v40 = vpop.f32.mrb[135].mxu1 }
 0x3d0   :  { %6541 = vrsqrt.f32 %v3956_v53  ;;  %v6532_v22 = vpop.eup %6531  ;;  %4365 = vperm.xlu1 %6373, %v4133_v30   ;;  %4280 = vperm.xlu0 %6372, %v4116_v6   ;;  %v9435_v34 = vpop.permute.xlu1 %5235  ;;  %v3865_v30 = vld [vmem:[%s10674_s2 + $0x128] sm:$0xff] }
 0x3d1   :  { %v3940_v60 = vadd.f32 1e-05, %v3760_v43  ;;  %11309 = vst [vmem:[#allocation202_spill] sm:$0xff] %v9435_v34  ;;  %v6534_v54 = vpop.eup %6533  ;;  %v3957_v3 = vadd.f32 1e-05, %v3777_v20  ;;  %v9437_v27 = vpop.permute.xlu0 %5240  ;;  %v4117_v57 = vmul.f32 %v6532_v22, %v3847_v62  ;;  %v3849_v34 = vld [vmem:[%s10674_s2 + $0xa8] sm:$0xff] }
 0x3d2   :  { %11310 = vst [vmem:[#allocation203_spill] sm:$0xff] %v9437_v27  ;;  %v3404_v41 = vpop.f32.mrb[226].mxu0  ;;  %v3489_v19 = vpop.f32.mrb[136].mxu1  ;;  %v4134_v40 = vmul.f32 %v6534_v54, %v3864_v63 }
 0x3d3   :  { %6543 = vrsqrt.f32 %v3940_v60  ;;  %v3761_v53 = vmul.f32 0.0051020407, %v3404_v41  ;;  %v3406_v37 = vpop.f32.mrb[227].mxu0  ;;  %v3778_v43 = vmul.f32 0.0051020407, %v3489_v19  ;;  %v3491_v6 = vpop.f32.mrb[137].mxu1 }
 0x3d4   :  { %6545 = vrsqrt.f32 %v3957_v3  ;;  %4370 = vperm.xlu0 %6372, %v4134_v40   ;;  %4285 = vperm.xlu1 %6373, %v4117_v57   ;;  %v9445_v60 = vpop.permute.xlu1 %5245  ;;  %v3866_v40 = vld [vmem:[%s10674_s2 + $0x130] sm:$0xff] }
 0x3d5   :  { %v6536_v20 = vpop.eup %6535  ;;  %v3941_v27 = vadd.f32 1e-05, %v3761_v53  ;;  %11311 = vst [vmem:[#allocation204_spill] sm:$0xff] %v9445_v60  ;;  %v3958_v22 = vadd.f32 1e-05, %v3778_v43  ;;  %v9447_v63 = vpop.permute.xlu0 %5250  ;;  %v3850_v60 = vld [vmem:[%s10674_s2 + $0xb0] sm:$0xff] }
 0x3d6   :  { %v6538_v62 = vpop.eup %6537  ;;  %11312 = vst [vmem:[#allocation205_spill] sm:$0xff] %v9447_v63  ;;  %v3409_v54 = vpop.f32.mrb[228].mxu0  ;;  %v4118_v41 = vmul.f32 %v6536_v20, %v3848_v44 }
 0x3d7   :  { %6547 = vrsqrt.f32 %v3941_v27  ;;  %v3762_v3 = vmul.f32 0.0051020407, %v3409_v54  ;;  %v3494_v19 = vpop.f32.mrb[138].mxu1  ;;  %v3411_v37 = vpop.f32.mrb[229].mxu0  ;;  %v4135_v6 = vmul.f32 %v6538_v62, %v3865_v30 }
 0x3d8   :  { %6549 = vrsqrt.f32 %v3958_v22  ;;  %v3779_v53 = vmul.f32 0.0051020407, %v3494_v19  ;;  %v3496_v57 = vpop.f32.mrb[139].mxu1  ;;  %4290 = vperm.xlu0 %6372, %v4118_v41   ;;  %v9455_v44 = vpop.permute.xlu1 %5255 }
 0x3d9   :  { %v6540_v43 = vpop.eup %6539  ;;  %v3942_v63 = vadd.f32 1e-05, %v3762_v3  ;;  %4375 = vperm.xlu1 %6373, %v4135_v6   ;;  %11313 = vst [vmem:[#allocation206_spill] sm:$0xff] %v9455_v44  ;;  %v9457_v30 = vpop.permute.xlu0 %5260  ;;  %v3867_v6 = vld [vmem:[%s10674_s2 + $0x138] sm:$0xff] }
 0x3da   :  { %v6542_v27 = vpop.eup %6541  ;;  %v3959_v20 = vadd.f32 1e-05, %v3779_v53  ;;  %11314 = vst [vmem:[#allocation207_spill] sm:$0xff] %v9457_v30  ;;  %v3414_v62 = vpop.f32.mrb[230].mxu0  ;;  %v4119_v54 = vmul.f32 %v6540_v43, %v3849_v34  ;;  %v3851_v44 = vld [vmem:[%s10674_s2 + $0xb8] sm:$0xff] }
 0x3db   :  { %6551 = vrsqrt.f32 %v3942_v63  ;;  %v3763_v22 = vmul.f32 0.0051020407, %v3414_v62  ;;  %v3499_v19 = vpop.f32.mrb[140].mxu1  ;;  %v3416_v37 = vpop.f32.mrb[231].mxu0  ;;  %v4136_v57 = vmul.f32 %v6542_v27, %v3866_v40 }
 0x3dc   :  { %6553 = vrsqrt.f32 %v3959_v20  ;;  %v3780_v3 = vmul.f32 0.0051020407, %v3499_v19  ;;  %v3501_v41 = vpop.f32.mrb[141].mxu1  ;;  %v9465_v34 = vpop.permute.xlu1 %5265 }
 0x3dd   :  { %v6544_v53 = vpop.eup %6543  ;;  %v3943_v30 = vadd.f32 1e-05, %v3763_v22  ;;  %4380 = vperm.xlu0 %6372, %v4136_v57   ;;  %4295 = vperm.xlu1 %6373, %v4119_v54   ;;  %11315 = vst [vmem:[#allocation208_spill] sm:$0xff] %v9465_v34  ;;  %v9467_v40 = vpop.permute.xlu0 %5270  ;;  %v3868_v57 = vld [vmem:[%s10674_s2 + $0x140] sm:$0xff] }
 0x3de   :  { %v6546_v63 = vpop.eup %6545  ;;  %v3960_v43 = vadd.f32 1e-05, %v3780_v3  ;;  %11316 = vst [vmem:[#allocation209_spill] sm:$0xff] %v9467_v40  ;;  %v3419_v27 = vpop.f32.mrb[232].mxu0  ;;  %v4120_v62 = vmul.f32 %v6544_v53, %v3850_v60  ;;  %v3852_v34 = vld [vmem:[%s10674_s2 + $0xc0] sm:$0xff] }
 0x3df   :  { %6555 = vrsqrt.f32 %v3943_v30  ;;  %v3764_v20 = vmul.f32 0.0051020407, %v3419_v27  ;;  %v3504_v19 = vpop.f32.mrb[142].mxu1  ;;  %v3421_v37 = vpop.f32.mrb[233].mxu0  ;;  %v4137_v41 = vmul.f32 %v6546_v63, %v3867_v6 }
 0x3e0   :  { %6557 = vrsqrt.f32 %v3960_v43  ;;  %v3781_v22 = vmul.f32 0.0051020407, %v3504_v19  ;;  %v3506_v54 = vpop.f32.mrb[143].mxu1  ;;  %v9475_v60 = vpop.permute.xlu1 %5275 }
 0x3e1   :  { %v6548_v3 = vpop.eup %6547  ;;  %v3944_v40 = vadd.f32 1e-05, %v3764_v20  ;;  %4385 = vperm.xlu1 %6373, %v4137_v41   ;;  %4300 = vperm.xlu0 %6372, %v4120_v62   ;;  %11317 = vst [vmem:[#allocation210_spill] sm:$0xff] %v9475_v60  ;;  %v9477_v6 = vpop.permute.xlu0 %5280  ;;  %v3869_v41 = vld [vmem:[%s10674_s2 + $0x148] sm:$0xff] }
 0x3e2   :  { %v6550_v30 = vpop.eup %6549  ;;  %v3961_v53 = vadd.f32 1e-05, %v3781_v22  ;;  %11318 = vst [vmem:[#allocation211_spill] sm:$0xff] %v9477_v6  ;;  %v3424_v63 = vpop.f32.mrb[234].mxu0  ;;  %v4121_v27 = vmul.f32 %v6548_v3, %v3851_v44  ;;  %v3853_v60 = vld [vmem:[%s10674_s2 + $0xc8] sm:$0xff] }
 0x3e3   :  { %6559 = vrsqrt.f32 %v3944_v40  ;;  %v3765_v43 = vmul.f32 0.0051020407, %v3424_v63  ;;  %v3509_v19 = vpop.f32.mrb[144].mxu1  ;;  %v3426_v37 = vpop.f32.mrb[235].mxu0  ;;  %v4138_v54 = vmul.f32 %v6550_v30, %v3868_v57 }
 0x3e4   :  { %6561 = vrsqrt.f32 %v3961_v53  ;;  %v3782_v20 = vmul.f32 0.0051020407, %v3509_v19  ;;  %v3511_v62 = vpop.f32.mrb[145].mxu1  ;;  %v9485_v44 = vpop.permute.xlu1 %5285 }
 0x3e5   :  { %v6552_v22 = vpop.eup %6551  ;;  %v3945_v6 = vadd.f32 1e-05, %v3765_v43  ;;  %4390 = vperm.xlu0 %6372, %v4138_v54   ;;  %4305 = vperm.xlu1 %6373, %v4121_v27   ;;  %11319 = vst [vmem:[#allocation212_spill] sm:$0xff] %v9485_v44  ;;  %v9487_v57 = vpop.permute.xlu0 %5290  ;;  %v3870_v54 = vld [vmem:[%s10674_s2 + $0x150] sm:$0xff] }
 0x3e6   :  { %v6554_v40 = vpop.eup %6553  ;;  %v3962_v3 = vadd.f32 1e-05, %v3782_v20  ;;  %11320 = vst [vmem:[#allocation213_spill] sm:$0xff] %v9487_v57  ;;  %v3429_v30 = vpop.f32.mrb[236].mxu0  ;;  %v4122_v63 = vmul.f32 %v6552_v22, %v3852_v34  ;;  %v3854_v44 = vld [vmem:[%s10674_s2 + $0xd0] sm:$0xff] }
 0x3e7   :  { %6563 = vrsqrt.f32 %v3945_v6  ;;  %v3766_v53 = vmul.f32 0.0051020407, %v3429_v30  ;;  %v3514_v19 = vpop.f32.mrb[146].mxu1  ;;  %v3431_v37 = vpop.f32.mrb[237].mxu0  ;;  %v4139_v62 = vmul.f32 %v6554_v40, %v3869_v41 }
 0x3e8   :  { %6565 = vrsqrt.f32 %v3962_v3  ;;  %v3783_v43 = vmul.f32 0.0051020407, %v3514_v19  ;;  %v3516_v27 = vpop.f32.mrb[147].mxu1  ;;  %v9495_v34 = vpop.permute.xlu1 %5295 }
 0x3e9   :  { %v6556_v20 = vpop.eup %6555  ;;  %v3946_v57 = vadd.f32 1e-05, %v3766_v53  ;;  %4395 = vperm.xlu1 %6373, %v4139_v62   ;;  %4310 = vperm.xlu0 %6372, %v4122_v63   ;;  %11321 = vst [vmem:[#allocation214_spill] sm:$0xff] %v9495_v34  ;;  %v9497_v41 = vpop.permute.xlu0 %5300  ;;  %v3871_v62 = vld [vmem:[%s10674_s2 + $0x158] sm:$0xff] }
 0x3ea   :  { %v6558_v6 = vpop.eup %6557  ;;  %v3963_v22 = vadd.f32 1e-05, %v3783_v43  ;;  %11322 = vst [vmem:[#allocation215_spill] sm:$0xff] %v9497_v41  ;;  %v3434_v40 = vpop.f32.mrb[238].mxu0  ;;  %v4123_v30 = vmul.f32 %v6556_v20, %v3853_v60 }
 0x3eb   :  { %6567 = vrsqrt.f32 %v3946_v57  ;;  %v3767_v3 = vmul.f32 0.0051020407, %v3434_v40  ;;  %v3519_v19 = vpop.f32.mrb[148].mxu1  ;;  %v3436_v37 = vpop.f32.mrb[239].mxu0  ;;  %v4140_v27 = vmul.f32 %v6558_v6, %v3870_v54 }
 0x3ec   :  { %6569 = vrsqrt.f32 %v3963_v22  ;;  %v3784_v53 = vmul.f32 0.0051020407, %v3519_v19  ;;  %v3521_v63 = vpop.f32.mrb[149].mxu1  ;;  %v9505_v20 = vpop.permute.xlu1 %5305 }
 0x3ed   :  { %v6560_v43 = vpop.eup %6559  ;;  %v3947_v41 = vadd.f32 1e-05, %v3767_v3  ;;  %4400 = vperm.xlu0 %6372, %v4140_v27   ;;  %4315 = vperm.xlu1 %6373, %v4123_v30   ;;  %11323 = vst [vmem:[#allocation216_spill] sm:$0xff] %v9505_v20  ;;  %v3439_v54 = vpop.f32.mrb[240].mxu0  ;;  %v3855_v63 = vld [vmem:[%s10674_s2 + $0xd8] sm:$0xff]  ;;  %v3872_v27 = vld [vmem:[%s10674_s2 + $0x160] sm:$0xff] }
 0x3ee   :  { %v6562_v60 = vpop.eup %6561  ;;  %v3964_v57 = vadd.f32 1e-05, %v3784_v53  ;;  %v4124_v6 = vmul.f32 %v6560_v43, %v3854_v44  ;;  %v3768_v40 = vmul.f32 0.0051020407, %v3439_v54  ;;  %v3524_v37 = vpop.f32.mrb[150].mxu1 }
 0x3ef   :  { %6571 = vrsqrt.f32 %v3947_v41  ;;  %v3441_v22 = vpop.f32.mrb[241].mxu0  ;;  %v4141_v19 = vmul.f32 %v6562_v60, %v3871_v62  ;;  %v9510_v34 = vpop.permute.xlu0 %5310  ;;  %v3785_v3 = vmul.f32 0.0051020407, %v3524_v37  ;;  %v3856_v37 = vld [vmem:[%s10674_s2 + $0xe0] sm:$0xff] }
 0x3f0   :  { %6573 = vrsqrt.f32 %v3964_v57  ;;  %11324 = vst [vmem:[#allocation217_spill] sm:$0xff] %v9510_v34  ;;  %v3526_v30 = vpop.f32.mrb[151].mxu1  ;;  %v3948_v44 = vadd.f32 1e-05, %v3768_v40 }
 0x3f1   :  { %v6564_v53 = vpop.eup %6563  ;;  %4405 = vperm.xlu1 %6373, %v4141_v19   ;;  %4320 = vperm.xlu0 %6372, %v4124_v6   ;;  %v3965_v43 = vadd.f32 1e-05, %v3785_v3  ;;  %v3444_v62 = vpop.f32.mrb[242].mxu0  ;;  %v3873_v6 = vld [vmem:[%s10674_s2 + $0x168] sm:$0xff] }
 0x3f2   :  { %v6566_v41 = vpop.eup %6565  ;;  %v4125_v60 = vmul.f32 %v6564_v53, %v3855_v63  ;;  %6575 = vrsqrt.f32 %v3948_v44  ;;  %v3769_v54 = vmul.f32 0.0051020407, %v3444_v62  ;;  %v3529_v22 = vpop.f32.mrb[152].mxu1 }
 0x3f3   :  { %v3446_v57 = vpop.f32.mrb[243].mxu0  ;;  %v4142_v20 = vmul.f32 %v6566_v41, %v3872_v27  ;;  %6577 = vrsqrt.f32 %v3965_v43  ;;  %v9518_v30 = vpop.permute.xlu1 %5315  ;;  %v3786_v34 = vmul.f32 0.0051020407, %v3529_v22 }
 0x3f4   :  { %11325 = vst [vmem:[#allocation218_spill] sm:$0xff] %v9518_v30  ;;  %v3531_v40 = vpop.f32.mrb[153].mxu1  ;;  %v3949_v63 = vadd.f32 1e-05, %v3769_v54  ;;  %v9523_v53 = vpop.permute.xlu0 %5320 }
 0x3f5   :  { %v6568_v19 = vpop.eup %6567  ;;  %4410 = vperm.xlu0 %6372, %v4142_v20   ;;  %4325 = vperm.xlu1 %6373, %v4125_v60   ;;  %11326 = vst [vmem:[#allocation219_spill] sm:$0xff] %v9523_v53  ;;  %v3966_v27 = vadd.f32 1e-05, %v3786_v34  ;;  %v3449_v44 = vpop.f32.mrb[244].mxu0  ;;  %v3857_v40 = vld [vmem:[%s10674_s2 + $0xe8] sm:$0xff]  ;;  %v3874_v20 = vld [vmem:[%s10674_s2 + $0x170] sm:$0xff] }
 0x3f6   :  { %v6570_v3 = vpop.eup %6569  ;;  %v4126_v41 = vmul.f32 %v6568_v19, %v3856_v37  ;;  %6579 = vrsqrt.f32 %v3949_v63  ;;  %v3770_v43 = vmul.f32 0.0051020407, %v3449_v44  ;;  %v3534_v62 = vpop.f32.mrb[154].mxu1 }
 0x3f7   :  { %v3451_v57 = vpop.f32.mrb[245].mxu0  ;;  %v4143_v22 = vmul.f32 %v6570_v3, %v3873_v6  ;;  %6581 = vrsqrt.f32 %v3966_v27  ;;  %v3787_v30 = vmul.f32 0.0051020407, %v3534_v62  ;;  %v3536_v54 = vpop.f32.mrb[155].mxu1  ;;  %v3858_v27 = vld [vmem:[%s10674_s2 + $0xf0] sm:$0xff] }
 0x3f8   :  { %v3950_v34 = vadd.f32 1e-05, %v3770_v43  ;;  %v9531_v19 = vpop.permute.xlu1 %5325  ;;  %v3875_v43 = vld [vmem:[%s10674_s2 + $0x178] sm:$0xff] }
 0x3f9   :  { %v6572_v60 = vpop.eup %6571  ;;  %4415 = vperm.xlu1 %6373, %v4143_v22   ;;  %4330 = vperm.xlu0 %6372, %v4126_v41   ;;  %11327 = vst [vmem:[#allocation220_spill] sm:$0xff] %v9531_v19  ;;  %v3967_v63 = vadd.f32 1e-05, %v3787_v30  ;;  %v9539_v22 = vpop.permute.xlu0 %5330  ;;  %v11333_v19 = vld [vmem:[#allocation84_spill] sm:$0xff] }
 0x3fa   :  { %v6574_v37 = vpop.eup %6573  ;;  %v4127_v6 = vmul.f32 %v6572_v60, %v3857_v40  ;;  %6583 = vrsqrt.f32 %v3950_v34  ;;  %v3539_v3 = vpop.f32.mrb[156].mxu1  ;;  %11328 = vst [vmem:[#allocation221_spill] sm:$0xff] %v9539_v22  ;;  %v3859_v34 = vld [vmem:[%s10674_s2 + $0xf8] sm:$0xff] }
 0x3fb   :  { %v4144_v44 = vmul.f32 %v6574_v37, %v3874_v20  ;;  %6585 = vrsqrt.f32 %v3967_v63  ;;  %v3788_v62 = vmul.f32 0.0051020407, %v3539_v3  ;;  %v3541_v57 = vpop.f32.mrb[157].mxu1 }
 0x3fc   :  { %v6576_v41 = vpop.eup %6575  ;;  %v9544_v37 = vpop.permute.xlu1 %5335  ;;  %v3876_v57 = vld [vmem:[%s10674_s2 + $0x180] sm:$0xff] }
 0x3fd   :  { %4420 = vperm.xlu0 %6372, %v4144_v44   ;;  %4335 = vperm.xlu1 %6373, %v4127_v6   ;;  %v6578_v30 = vpop.eup %6577  ;;  %v3968_v40 = vadd.f32 1e-05, %v3788_v62  ;;  %v4128_v54 = vmul.f32 %v6576_v41, %v3858_v27  ;;  %11329 = vst [vmem:[#allocation222_spill] sm:$0xff] %v9544_v37  ;;  %v3877_v37 = vld [vmem:[%s10674_s2 + $0x188] sm:$0xff] }
 0x3fe   :  { %v3544_v20 = vpop.f32.mrb[158].mxu1  ;;  %v4145_v60 = vmul.f32 %v6578_v30, %v3875_v43  ;;  %v9549_v43 = vpop.permute.xlu0 %5340 }
 0x3ff   :  { %6587 = vrsqrt.f32 %v3968_v40  ;;  %v3789_v63 = vmul.f32 0.0051020407, %v3544_v20  ;;  %v3546_v3 = vpop.f32.mrb[159].mxu1  ;;  %11330 = vst [vmem:[#allocation223_spill] sm:$0xff] %v9549_v43  ;;  %v3860_v40 = vld [vmem:[%s10674_s2 + $0x100] sm:$0xff] }
 0x400   :  { %v6580_v44 = vpop.eup %6579 }
 0x401   :  { %4425 = vperm.xlu1 %6373, %v4145_v60   ;;  %4340 = vperm.xlu0 %6372, %v4128_v54   ;;  %v6582_v6 = vpop.eup %6581  ;;  %v3969_v27 = vadd.f32 1e-05, %v3789_v63  ;;  %v4129_v62 = vmul.f32 %v6580_v44, %v3859_v34  ;;  %v9557_v34 = vpop.permute.xlu1 %5345 }
 0x402   :  { %v3549_v41 = vpop.f32.mrb[160].mxu1  ;;  %v4146_v30 = vmul.f32 %v6582_v6, %v3876_v57  ;;  %11331 = vst [vmem:[#allocation224_spill] sm:$0xff] %v9557_v34 }
 0x403   :  { %6589 = vrsqrt.f32 %v3969_v27  ;;  %v3790_v20 = vmul.f32 0.0051020407, %v3549_v41  ;;  %v3551_v3 = vpop.f32.mrb[161].mxu1  ;;  %v11332_v41 = vld [vmem:[#allocation83_spill] sm:$0xff] }
 0x404   :  { %v6584_v60 = vpop.eup %6583 }
 0x405   :  { %4430 = vperm.xlu0 %6372, %v4146_v30   ;;  %4345 = vperm.xlu1 %6373, %v4129_v62   ;;  %v6586_v54 = vpop.eup %6585  ;;  %v3970_v63 = vadd.f32 1e-05, %v3790_v20  ;;  %v4130_v44 = vmul.f32 %v6584_v60, %v3860_v40  ;;  %v3878_v30 = vld [vmem:[%s10674_s2 + $0x190] sm:$0xff] }
 0x406   :  { %v3554_v57 = vpop.f32.mrb[162].mxu1  ;;  %v4191_v6 = vpop.permute.xlu0 %4190  ;;  %v4147_v43 = vmul.f32 %v6586_v54, %v3877_v37 }
 0x407   :  { %6591 = vrsqrt.f32 %v3970_v63  ;;  %v3791_v22 = vmul.f32 0.0051020407, %v3554_v57  ;;  %v3556_v27 = vpop.f32.mrb[163].mxu1  ;;  %v4638_v3 = vmul.f32 %v4191_v6, %v11332_v41  ;;  %v4639_v53 = vmul.f32 %v4191_v6, %v11333_v19 }
 0x409   :  { %4435 = vperm.xlu1 %6373, %v4147_v43   ;;  %4350 = vperm.xlu0 %6372, %v4130_v44   ;;  %v6588_v62 = vpop.eup %6587  ;;  %v3971_v34 = vadd.f32 1e-05, %v3791_v22  ;;  %v5358_v40 = vadd.f32 %v8486_v29, %v4638_v3  ;;  %v5359_v20 = vadd.f32 %v8486_v29, %v4639_v53  ;;  %v11334_v22 = vld [vmem:[#allocation87_spill] sm:$0xff]  ;;  %v11335_v44 = vld [vmem:[#allocation82_spill] sm:$0xff]  ;;  %v3879_v29 = vld [vmem:[%s10674_s2 + $0x198] sm:$0xff] }
 0x40a   :  { %v3559_v37 = vpop.f32.mrb[164].mxu1  ;;  %v4196_v60 = vpop.permute.xlu1 %4195  ;;  %v4148_v54 = vmul.f32 %v6588_v62, %v3878_v30 }
 0x40b   :  { %6593 = vrsqrt.f32 %v3971_v34  ;;  %5538 = vst [vmem:[%s10675_s4] sm:$0xff] %v5358_v40  ;;  %5539 = vst.msk [vmem:[%s10675_s4 + $0x8] sm:$0xff] %vm1051_vm0, %v5359_v20  ;;  %v3792_v19 = vmul.f32 0.0051020407, %v3559_v37  ;;  %v3561_v43 = vpop.f32.mrb[165].mxu1  ;;  %v4640_v63 = vmul.f32 %v4196_v60, %v11334_v22  ;;  %v4641_v57 = vmul.f32 %v4196_v60, %v11335_v44  ;;  %v11336_v20 = vld [vmem:[#allocation91_spill] sm:$0xff]  ;;  %v11337_v60 = vld [vmem:[#allocation89_spill] sm:$0xff] }
 0x40d   :  { %4440 = vperm.xlu0 %6372, %v4148_v54   ;;  %v6590_v53 = vpop.eup %6589  ;;  %v3972_v34 = vadd.f32 1e-05, %v3792_v19  ;;  %v5360_v6 = vadd.f32 %v8504_v35, %v4640_v63  ;;  %v5361_v27 = vadd.f32 %v8504_v35, %v4641_v57  ;;  %v3880_v35 = vld [vmem:[%s10674_s2 + $0x1a0] sm:$0xff] }
 0x40e   :  { %v3564_v41 = vpop.f32.mrb[166].mxu1  ;;  %v4201_v3 = vpop.permute.xlu0 %4200  ;;  %v4149_v30 = vmul.f32 %v6590_v53, %v3879_v29 }
 0x40f   :  { %6595 = vrsqrt.f32 %v3972_v34  ;;  %5540 = vst [vmem:[%s10675_s4 + $0x10] sm:$0xff] %v5360_v6  ;;  %5541 = vst.msk [vmem:[%s10675_s4 + $0x18] sm:$0xff] %vm1051_vm0, %v5361_v27  ;;  %v3793_v62 = vmul.f32 0.0051020407, %v3564_v41  ;;  %v3566_v40 = vpop.f32.mrb[167].mxu1  ;;  %v4642_v37 = vmul.f32 %v4201_v3, %v11336_v20  ;;  %v4643_v54 = vmul.f32 %v4201_v3, %v11337_v60  ;;  %v11338_v6 = vld [vmem:[#allocation94_spill] sm:$0xff] }
 0x410   :  { %4445 = vperm.xlu1 %6373, %v4149_v30   ;;  %v11339_v41 = vld [vmem:[#allocation93_spill] sm:$0xff] }
 0x411   :  { %v6592_v19 = vpop.eup %6591  ;;  %v3973_v43 = vadd.f32 1e-05, %v3793_v62  ;;  %v5362_v22 = vadd.f32 %v8540_v47, %v4642_v37  ;;  %v5363_v63 = vadd.f32 %v8540_v47, %v4643_v54  ;;  %v3881_v47 = vld [vmem:[%s10674_s2 + $0x1a8] sm:$0xff] }
 0x412   :  { %v3569_v44 = vpop.f32.mrb[168].mxu1  ;;  %v4206_v57 = vpop.permute.xlu1 %4205  ;;  %v4150_v29 = vmul.f32 %v6592_v19, %v3880_v35 }
 0x413   :  { %6597 = vrsqrt.f32 %v3973_v43  ;;  %5542 = vst [vmem:[%s10675_s4 + $0x20] sm:$0xff] %v5362_v22  ;;  %5543 = vst.msk [vmem:[%s10675_s4 + $0x28] sm:$0xff] %vm1051_vm0, %v5363_v63  ;;  %v3794_v53 = vmul.f32 0.0051020407, %v3569_v44  ;;  %v3571_v34 = vpop.f32.mrb[169].mxu1  ;;  %v4644_v27 = vmul.f32 %v4206_v57, %v11338_v6  ;;  %v4645_v3 = vmul.f32 %v4206_v57, %v11339_v41  ;;  %v11340_v43 = vld [vmem:[#allocation98_spill] sm:$0xff] }
 0x414   :  { %4450 = vperm.xlu0 %6372, %v4150_v29   ;;  %v11341_v63 = vld [vmem:[#allocation96_spill] sm:$0xff] }
 0x415   :  { %v6594_v30 = vpop.eup %6593  ;;  %v3974_v62 = vadd.f32 1e-05, %v3794_v53  ;;  %v5364_v40 = vadd.f32 %v8557_v1, %v4644_v27  ;;  %v5365_v20 = vadd.f32 %v8557_v1, %v4645_v3  ;;  %v3882_v1 = vld [vmem:[%s10674_s2 + $0x1b0] sm:$0xff] }
 0x416   :  { %v3574_v37 = vpop.f32.mrb[170].mxu1  ;;  %v4211_v60 = vpop.permute.xlu0 %4210  ;;  %v4151_v54 = vmul.f32 %v6594_v30, %v3881_v47  ;;  %v11342_v30 = vld [vmem:[#allocation102_spill] sm:$0xff] }
 0x417   :  { %6599 = vrsqrt.f32 %v3974_v62  ;;  %5544 = vst [vmem:[%s10675_s4 + $0x30] sm:$0xff] %v5364_v40  ;;  %5545 = vst.msk [vmem:[%s10675_s4 + $0x38] sm:$0xff] %vm1051_vm0, %v5365_v20  ;;  %v3795_v35 = vmul.f32 0.0051020407, %v3574_v37  ;;  %v3576_v19 = vpop.f32.mrb[171].mxu1  ;;  %v4646_v22 = vmul.f32 %v4211_v60, %v11340_v43  ;;  %v4647_v44 = vmul.f32 %v4211_v60, %v11341_v63  ;;  %v11343_v40 = vld [vmem:[#allocation100_spill] sm:$0xff] }
 0x418   :  { %4455 = vperm.xlu1 %6373, %v4151_v54  }
 0x419   :  { %v6596_v57 = vpop.eup %6595  ;;  %v3975_v29 = vadd.f32 1e-05, %v3795_v35  ;;  %v5366_v53 = vadd.f32 %v8586_v31, %v4646_v22  ;;  %v5367_v34 = vadd.f32 %v8586_v31, %v4647_v44  ;;  %v3883_v31 = vld [vmem:[%s10674_s2 + $0x1b8] sm:$0xff] }
 0x41a   :  { %v3579_v6 = vpop.f32.mrb[172].mxu1  ;;  %v4216_v27 = vpop.permute.xlu1 %4215  ;;  %v4152_v41 = vmul.f32 %v6596_v57, %v3882_v1  ;;  %v11344_v1 = vld [vmem:[#allocation106_spill] sm:$0xff] }
 0x41b   :  { %6601 = vrsqrt.f32 %v3975_v29  ;;  %5546 = vst [vmem:[%s10675_s4 + $0x40] sm:$0xff] %v5366_v53  ;;  %5547 = vst.msk [vmem:[%s10675_s4 + $0x48] sm:$0xff] %vm1051_vm0, %v5367_v34  ;;  %v3796_v3 = vmul.f32 0.0051020407, %v3579_v6  ;;  %v3581_v47 = vpop.f32.mrb[173].mxu1  ;;  %v4648_v62 = vmul.f32 %v4216_v27, %v11342_v30  ;;  %v4649_v20 = vmul.f32 %v4216_v27, %v11343_v40  ;;  %v11345_v29 = vld [vmem:[#allocation104_spill] sm:$0xff] }
 0x41c   :  { %4460 = vperm.xlu0 %6372, %v4152_v41  }
 0x41d   :  { %v6598_v37 = vpop.eup %6597  ;;  %v3976_v60 = vadd.f32 1e-05, %v3796_v3  ;;  %v5368_v54 = vadd.f32 %v8603_v12, %v4648_v62  ;;  %v5369_v35 = vadd.f32 %v8603_v12, %v4649_v20  ;;  %v3884_v12 = vld [vmem:[%s10674_s2 + $0x1c0] sm:$0xff] }
 0x41e   :  { %v3584_v19 = vpop.f32.mrb[174].mxu1  ;;  %v4221_v43 = vpop.permute.xlu0 %4220  ;;  %v4153_v22 = vmul.f32 %v6598_v37, %v3883_v31  ;;  %v11346_v20 = vld [vmem:[#allocation110_spill] sm:$0xff]  ;;  %v11347_v37 = vld [vmem:[#allocation108_spill] sm:$0xff] }
 0x41f   :  { %6603 = vrsqrt.f32 %v3976_v60  ;;  %5548 = vst [vmem:[%s10675_s4 + $0x50] sm:$0xff] %v5368_v54  ;;  %5549 = vst.msk [vmem:[%s10675_s4 + $0x58] sm:$0xff] %vm1051_vm0, %v5369_v35  ;;  %v3797_v63 = vmul.f32 0.0051020407, %v3584_v19  ;;  %v3586_v44 = vpop.f32.mrb[175].mxu1  ;;  %v4650_v57 = vmul.f32 %v4221_v43, %v11344_v1  ;;  %v4651_v53 = vmul.f32 %v4221_v43, %v11345_v29  ;;  %v11348_v19 = vld [vmem:[#allocation155_spill] sm:$0xff] }
 0x420   :  { %4465 = vperm.xlu1 %6373, %v4153_v22  }
 0x421   :  { %v6600_v34 = vpop.eup %6599  ;;  %v3977_v6 = vadd.f32 1e-05, %v3797_v63  ;;  %v5370_v27 = vadd.f32 %v8632_v17, %v4650_v57  ;;  %v5371_v41 = vadd.f32 %v8632_v17, %v4651_v53  ;;  %v3885_v17 = vld [vmem:[%s10674_s2 + $0x1c8] sm:$0xff]  ;;  %v11349_v53 = vld [vmem:[#allocation114_spill] sm:$0xff] }
 0x422   :  { %v3589_v3 = vpop.f32.mrb[176].mxu1  ;;  %v4226_v47 = vpop.permute.xlu1 %4225  ;;  %v4154_v30 = vmul.f32 %v6600_v34, %v3884_v12  ;;  %v11350_v34 = vld [vmem:[#allocation112_spill] sm:$0xff] }
 0x423   :  { %6605 = vrsqrt.f32 %v3977_v6  ;;  %5550 = vst [vmem:[%s10675_s4 + $0x60] sm:$0xff] %v5370_v27  ;;  %5551 = vst.msk [vmem:[%s10675_s4 + $0x68] sm:$0xff] %vm1051_vm0, %v5371_v41  ;;  %v3798_v62 = vmul.f32 0.0051020407, %v3589_v3  ;;  %v3591_v40 = vpop.f32.mrb[177].mxu1  ;;  %v4652_v31 = vmul.f32 %v4226_v47, %v11346_v20  ;;  %v4653_v60 = vmul.f32 %v4226_v47, %v11347_v37  ;;  %v3886_v27 = vld [vmem:[%s10674_s2 + $0x1d0] sm:$0xff] }
 0x424   :  { %4470 = vperm.xlu0 %6372, %v4154_v30   ;;  %v11351_v47 = vld [vmem:[#allocation156_spill] sm:$0xff] }
 0x425   :  { %v6602_v54 = vpop.eup %6601  ;;  %v3978_v35 = vadd.f32 1e-05, %v3798_v62  ;;  %v5372_v43 = vadd.f32 %v11348_v19, %v4652_v31  ;;  %v5373_v22 = vadd.f32 %v11348_v19, %v4653_v60 }
 0x426   :  { %v3594_v63 = vpop.f32.mrb[178].mxu1  ;;  %v4231_v44 = vpop.permute.xlu0 %4230  ;;  %v4155_v1 = vmul.f32 %v6602_v54, %v3885_v17  ;;  %v11352_v17 = vld [vmem:[#allocation118_spill] sm:$0xff] }
 0x427   :  { %6607 = vrsqrt.f32 %v3978_v35  ;;  %5552 = vst [vmem:[%s10675_s4 + $0x70] sm:$0xff] %v5372_v43  ;;  %5553 = vst.msk [vmem:[%s10675_s4 + $0x78] sm:$0xff] %vm1051_vm0, %v5373_v22  ;;  %v3799_v57 = vmul.f32 0.0051020407, %v3594_v63  ;;  %v3596_v29 = vpop.f32.mrb[179].mxu1  ;;  %v4654_v12 = vmul.f32 %v4231_v44, %v11349_v53  ;;  %v4655_v6 = vmul.f32 %v4231_v44, %v11350_v34  ;;  %v11353_v35 = vld [vmem:[#allocation116_spill] sm:$0xff] }
 0x428   :  { %4475 = vperm.xlu1 %6373, %v4155_v1   ;;  %v3887_v43 = vld [vmem:[%s10674_s2 + $0x1d8] sm:$0xff] }
 0x429   :  { %v6604_v41 = vpop.eup %6603  ;;  %v3979_v3 = vadd.f32 1e-05, %v3799_v57  ;;  %v5374_v30 = vadd.f32 %v11351_v47, %v4654_v12  ;;  %v5375_v62 = vadd.f32 %v11351_v47, %v4655_v6  ;;  %v11354_v44 = vld [vmem:[#allocation157_spill] sm:$0xff] }
 0x42a   :  { %v3599_v40 = vpop.f32.mrb[180].mxu1  ;;  %v4236_v20 = vpop.permute.xlu1 %4235  ;;  %v4156_v31 = vmul.f32 %v6604_v41, %v3886_v27  ;;  %v11355_v27 = vld [vmem:[#allocation122_spill] sm:$0xff] }
 0x42b   :  { %6609 = vrsqrt.f32 %v3979_v3  ;;  %5554 = vst [vmem:[%s10675_s4 + $0x80] sm:$0xff] %v5374_v30  ;;  %5555 = vst.msk [vmem:[%s10675_s4 + $0x88] sm:$0xff] %vm1051_vm0, %v5375_v62  ;;  %v3800_v37 = vmul.f32 0.0051020407, %v3599_v40  ;;  %v3601_v60 = vpop.f32.mrb[181].mxu1  ;;  %v4656_v54 = vmul.f32 %v4236_v20, %v11352_v17  ;;  %v4657_v19 = vmul.f32 %v4236_v20, %v11353_v35  ;;  %v11356_v3 = vld [vmem:[#allocation120_spill] sm:$0xff] }
 0x42c   :  { %4480 = vperm.xlu0 %6372, %v4156_v31   ;;  %v3888_v30 = vld [vmem:[%s10674_s2 + $0x1e0] sm:$0xff] }
 0x42d   :  { %v6606_v22 = vpop.eup %6605  ;;  %v3980_v63 = vadd.f32 1e-05, %v3800_v37  ;;  %v5376_v1 = vadd.f32 %v11354_v44, %v4656_v54  ;;  %v5377_v57 = vadd.f32 %v11354_v44, %v4657_v19  ;;  %v11357_v20 = vld [vmem:[#allocation158_spill] sm:$0xff] }
 0x42e   :  { %v3604_v29 = vpop.f32.mrb[182].mxu1  ;;  %v4241_v53 = vpop.permute.xlu0 %4240  ;;  %v4157_v12 = vmul.f32 %v6606_v22, %v3887_v43  ;;  %v11358_v43 = vld [vmem:[#allocation126_spill] sm:$0xff] }
 0x42f   :  { %6611 = vrsqrt.f32 %v3980_v63  ;;  %5556 = vst [vmem:[%s10675_s4 + $0x90] sm:$0xff] %v5376_v1  ;;  %5557 = vst.msk [vmem:[%s10675_s4 + $0x98] sm:$0xff] %vm1051_vm0, %v5377_v57  ;;  %v3801_v34 = vmul.f32 0.0051020407, %v3604_v29  ;;  %v3606_v6 = vpop.f32.mrb[183].mxu1  ;;  %v4658_v41 = vmul.f32 %v4241_v53, %v11355_v27  ;;  %v4659_v47 = vmul.f32 %v4241_v53, %v11356_v3  ;;  %v11359_v63 = vld [vmem:[#allocation124_spill] sm:$0xff] }
 0x430   :  { %4485 = vperm.xlu1 %6373, %v4157_v12   ;;  %v3889_v1 = vld [vmem:[%s10674_s2 + $0x1e8] sm:$0xff] }
 0x431   :  { %v6608_v62 = vpop.eup %6607  ;;  %v3981_v40 = vadd.f32 1e-05, %v3801_v34  ;;  %v5378_v31 = vadd.f32 %v11357_v20, %v4658_v41  ;;  %v5379_v37 = vadd.f32 %v11357_v20, %v4659_v47  ;;  %v11360_v53 = vld [vmem:[#allocation159_spill] sm:$0xff] }
 0x432   :  { %v3609_v60 = vpop.f32.mrb[184].mxu1  ;;  %v4246_v17 = vpop.permute.xlu1 %4245  ;;  %v4158_v54 = vmul.f32 %v6608_v62, %v3888_v30  ;;  %v11361_v30 = vld [vmem:[#allocation128_spill] sm:$0xff] }
 0x433   :  { %6613 = vrsqrt.f32 %v3981_v40  ;;  %5558 = vst [vmem:[%s10675_s4 + $0xa0] sm:$0xff] %v5378_v31  ;;  %5559 = vst.msk [vmem:[%s10675_s4 + $0xa8] sm:$0xff] %vm1051_vm0, %v5379_v37  ;;  %v3802_v35 = vmul.f32 0.0051020407, %v3609_v60  ;;  %v3611_v19 = vpop.f32.mrb[185].mxu1  ;;  %v4660_v22 = vmul.f32 %v4246_v17, %v11358_v43  ;;  %v4661_v44 = vmul.f32 %v4246_v17, %v11359_v63  ;;  %v11362_v40 = vld [vmem:[#allocation127_spill] sm:$0xff] }
 0x434   :  { %4490 = vperm.xlu0 %6372, %v4158_v54   ;;  %v3890_v31 = vld [vmem:[%s10674_s2 + $0x1f0] sm:$0xff] }
 0x435   :  { %v6610_v57 = vpop.eup %6609  ;;  %v3982_v29 = vadd.f32 1e-05, %v3802_v35  ;;  %v5380_v12 = vadd.f32 %v11360_v53, %v4660_v22  ;;  %v5381_v34 = vadd.f32 %v11360_v53, %v4661_v44  ;;  %v11363_v17 = vld [vmem:[#allocation160_spill] sm:$0xff] }
 0x436   :  { %v3614_v6 = vpop.f32.mrb[186].mxu1  ;;  %v4251_v27 = vpop.permute.xlu0 %4250  ;;  %v4159_v41 = vmul.f32 %v6610_v57, %v3889_v1  ;;  %v11364_v1 = vld [vmem:[#allocation130_spill] sm:$0xff] }
 0x437   :  { %6615 = vrsqrt.f32 %v3982_v29  ;;  %5560 = vst [vmem:[%s10675_s4 + $0xb0] sm:$0xff] %v5380_v12  ;;  %5561 = vst.msk [vmem:[%s10675_s4 + $0xb8] sm:$0xff] %vm1051_vm0, %v5381_v34  ;;  %v3803_v3 = vmul.f32 0.0051020407, %v3614_v6  ;;  %v3616_v47 = vpop.f32.mrb[187].mxu1  ;;  %v4662_v62 = vmul.f32 %v4251_v27, %v11361_v30  ;;  %v4663_v20 = vmul.f32 %v4251_v27, %v11362_v40  ;;  %v11365_v29 = vld [vmem:[#allocation129_spill] sm:$0xff] }
 0x438   :  { %4495 = vperm.xlu1 %6373, %v4159_v41   ;;  %v3891_v12 = vld [vmem:[%s10674_s2 + $0x1f8] sm:$0xff] }
 0x439   :  { %v6612_v37 = vpop.eup %6611  ;;  %v3983_v60 = vadd.f32 1e-05, %v3803_v3  ;;  %v5382_v54 = vadd.f32 %v11363_v17, %v4662_v62  ;;  %v5383_v35 = vadd.f32 %v11363_v17, %v4663_v20  ;;  %v11366_v27 = vld [vmem:[#allocation161_spill] sm:$0xff] }
 0x43a   :  { %v3619_v19 = vpop.f32.mrb[188].mxu1  ;;  %v4256_v43 = vpop.permute.xlu1 %4255  ;;  %v4160_v22 = vmul.f32 %v6612_v37, %v3890_v31  ;;  %v11367_v31 = vld [vmem:[#allocation132_spill] sm:$0xff] }
 0x43b   :  { %6617 = vrsqrt.f32 %v3983_v60  ;;  %5562 = vst [vmem:[%s10675_s4 + $0xc0] sm:$0xff] %v5382_v54  ;;  %5563 = vst.msk [vmem:[%s10675_s4 + $0xc8] sm:$0xff] %vm1051_vm0, %v5383_v35  ;;  %v3804_v63 = vmul.f32 0.0051020407, %v3619_v19  ;;  %v3621_v44 = vpop.f32.mrb[189].mxu1  ;;  %v4664_v57 = vmul.f32 %v4256_v43, %v11364_v1  ;;  %v4665_v53 = vmul.f32 %v4256_v43, %v11365_v29  ;;  %v11368_v60 = vld [vmem:[#allocation131_spill] sm:$0xff] }
 0x43c   :  { %4500 = vperm.xlu0 %6372, %v4160_v22   ;;  %v3892_v54 = vld [vmem:[%s10674_s2 + $0x200] sm:$0xff] }
 0x43d   :  { %v6614_v34 = vpop.eup %6613  ;;  %v3984_v6 = vadd.f32 1e-05, %v3804_v63  ;;  %v5384_v41 = vadd.f32 %v11366_v27, %v4664_v57  ;;  %v5385_v3 = vadd.f32 %v11366_v27, %v4665_v53  ;;  %v11369_v43 = vld [vmem:[#allocation162_spill] sm:$0xff] }
 0x43e   :  { %v3624_v47 = vpop.f32.mrb[190].mxu1  ;;  %v4261_v30 = vpop.permute.xlu0 %4260  ;;  %v4161_v62 = vmul.f32 %v6614_v34, %v3891_v12  ;;  %v11370_v12 = vld [vmem:[#allocation134_spill] sm:$0xff] }
 0x43f   :  { %6619 = vrsqrt.f32 %v3984_v6  ;;  %5564 = vst [vmem:[%s10675_s4 + $0xd0] sm:$0xff] %v5384_v41  ;;  %5565 = vst.msk [vmem:[%s10675_s4 + $0xd8] sm:$0xff] %vm1051_vm0, %v5385_v3  ;;  %v3805_v40 = vmul.f32 0.0051020407, %v3624_v47  ;;  %v3626_v20 = vpop.f32.mrb[191].mxu1  ;;  %v4666_v37 = vmul.f32 %v4261_v30, %v11367_v31  ;;  %v4667_v17 = vmul.f32 %v4261_v30, %v11368_v60  ;;  %v11371_v6 = vld [vmem:[#allocation133_spill] sm:$0xff] }
 0x440   :  { %4505 = vperm.xlu1 %6373, %v4161_v62   ;;  %v3893_v41 = vld [vmem:[%s10674_s2 + $0x208] sm:$0xff] }
 0x441   :  { %v6616_v35 = vpop.eup %6615  ;;  %v3985_v19 = vadd.f32 1e-05, %v3805_v40  ;;  %v5386_v22 = vadd.f32 %v11369_v43, %v4666_v37  ;;  %v5387_v63 = vadd.f32 %v11369_v43, %v4667_v17  ;;  %v11372_v30 = vld [vmem:[#allocation163_spill] sm:$0xff] }
 0x442   :  { %v3629_v44 = vpop.f32.mrb[192].mxu1  ;;  %v4266_v1 = vpop.permute.xlu1 %4265  ;;  %v4162_v57 = vmul.f32 %v6616_v35, %v3892_v54  ;;  %v11373_v35 = vld [vmem:[#allocation137_spill] sm:$0xff]  ;;  %v11374_v43 = vld [vmem:[#allocation135_spill] sm:$0xff] }
 0x443   :  { %6621 = vrsqrt.f32 %v3985_v19  ;;  %5566 = vst [vmem:[%s10675_s4 + $0xe0] sm:$0xff] %v5386_v22  ;;  %5567 = vst.msk [vmem:[%s10675_s4 + $0xe8] sm:$0xff] %vm1051_vm0, %v5387_v63  ;;  %v3806_v29 = vmul.f32 0.0051020407, %v3629_v44  ;;  %v3631_v53 = vpop.f32.mrb[193].mxu1  ;;  %v4668_v34 = vmul.f32 %v4266_v1, %v11370_v12  ;;  %v4669_v27 = vmul.f32 %v4266_v1, %v11371_v6  ;;  %v3894_v63 = vld [vmem:[%s10674_s2 + $0x210] sm:$0xff] }
 0x444   :  { %4510 = vperm.xlu0 %6372, %v4162_v57   ;;  %v11375_v44 = vld [vmem:[#allocation139_spill] sm:$0xff]  ;;  %v11376_v57 = vld [vmem:[#allocation140_spill] sm:$0xff] }
 0x445   :  { %v6618_v3 = vpop.eup %6617  ;;  %v3986_v47 = vadd.f32 1e-05, %v3806_v29  ;;  %v5388_v62 = vadd.f32 %v11372_v30, %v4668_v34  ;;  %v5389_v40 = vadd.f32 %v11372_v30, %v4669_v27  ;;  %v11377_v34 = vld [vmem:[#allocation164_spill] sm:$0xff] }
 0x446   :  { %v3634_v20 = vpop.f32.mrb[194].mxu1  ;;  %v4271_v31 = vpop.permute.xlu0 %4270  ;;  %v4163_v37 = vmul.f32 %v6618_v3, %v3893_v41 }
 0x447   :  { %6623 = vrsqrt.f32 %v3986_v47  ;;  %5568 = vst [vmem:[%s10675_s4 + $0xf0] sm:$0xff] %v5388_v62  ;;  %5569 = vst.msk [vmem:[%s10675_s4 + $0xf8] sm:$0xff] %vm1051_vm0, %v5389_v40  ;;  %v3807_v60 = vmul.f32 0.0051020407, %v3634_v20  ;;  %v3636_v17 = vpop.f32.mrb[195].mxu1  ;;  %v4356_v54 = vpop.permute.xlu1 %4355  ;;  %v4670_v19 = vmul.f32 %v4271_v31, %v11373_v35  ;;  %v4671_v22 = vmul.f32 %v4271_v31, %v11374_v43  ;;  %v3895_v31 = vld [vmem:[%s10674_s2 + $0x218] sm:$0xff] }
 0x448   :  { %v4704_v1 = vmul.f32 %v4356_v54, %v11375_v44  ;;  %v4705_v29 = vmul.f32 %v4356_v54, %v11376_v57  ;;  %4515 = vperm.xlu1 %6373, %v4163_v37   ;;  %v11380_v43 = vld [vmem:[#allocation142_spill] sm:$0xff] }
 0x449   :  { %v6620_v53 = vpop.eup %6619  ;;  %v3987_v12 = vadd.f32 1e-05, %v3807_v60  ;;  %v5390_v6 = vadd.f32 %v11377_v34, %v4670_v19  ;;  %v5391_v27 = vadd.f32 %v11377_v34, %v4671_v22  ;;  %v11379_v60 = vld [vmem:[#allocation141_spill] sm:$0xff] }
 0x44a   :  { %v5424_v41 = vadd.f32 %v9157_v25, %v4704_v1  ;;  %v5425_v3 = vadd.f32 %v9157_v25, %v4705_v29  ;;  %v3639_v47 = vpop.f32.mrb[196].mxu1  ;;  %v4164_v30 = vmul.f32 %v6620_v53, %v3894_v63  ;;  %v11378_v25 = vld [vmem:[#allocation144_spill] sm:$0xff]  ;;  %v11381_v63 = vld [vmem:[#allocation138_spill] sm:$0xff] }
 0x44b   :  { %6625 = vrsqrt.f32 %v3987_v12  ;;  %5570 = vst [vmem:[%s10675_s4 + $0x100] sm:$0xff] %v5390_v6  ;;  %5571 = vst.msk [vmem:[%s10675_s4 + $0x108] sm:$0xff] %vm1051_vm0, %v5391_v27  ;;  %v3808_v62 = vmul.f32 0.0051020407, %v3639_v47  ;;  %v3641_v40 = vpop.f32.mrb[197].mxu1  ;;  %v4361_v20 = vpop.permute.xlu0 %4360  ;;  %v11382_v12 = vld [vmem:[#allocation165_spill] sm:$0xff] }
 0x44c   :  { %5604 = vst [vmem:[%s10675_s4 + $0x210] sm:$0xff] %v5424_v41  ;;  %5605 = vst.msk [vmem:[%s10675_s4 + $0x218] sm:$0xff] %vm1051_vm0, %v5425_v3  ;;  %v4706_v37 = vmul.f32 %v4361_v20, %v11378_v25  ;;  %v4707_v17 = vmul.f32 %v4361_v20, %v11379_v60  ;;  %v4276_v54 = vpop.permute.xlu1 %4275  ;;  %4520 = vperm.xlu0 %6372, %v4164_v30   ;;  %v3896_v47 = vld [vmem:[%s10674_s2 + $0x220] sm:$0xff]  ;;  %v11384_v40 = vld [vmem:[#allocation143_spill] sm:$0xff] }
 0x44d   :  { %v6622_v35 = vpop.eup %6621  ;;  %v3988_v19 = vadd.f32 1e-05, %v3808_v62  ;;  %v4672_v22 = vmul.f32 %v4276_v54, %v11380_v43  ;;  %v4673_v44 = vmul.f32 %v4276_v54, %v11381_v63  ;;  %v11383_v30 = vld [vmem:[#allocation146_spill] sm:$0xff] }
 0x44e   :  { %v5426_v1 = vadd.f32 %v9163_v28, %v4706_v37  ;;  %v5427_v57 = vadd.f32 %v9163_v28, %v4707_v17  ;;  %v3644_v29 = vpop.f32.mrb[198].mxu1  ;;  %v4165_v53 = vmul.f32 %v6622_v35, %v3895_v31  ;;  %v11385_v37 = vld [vmem:[#allocation148_spill] sm:$0xff]  ;;  %v11386_v17 = vld [vmem:[#allocation145_spill] sm:$0xff]  ;;  %v11387_v35 = vld [vmem:[#allocation167_spill] sm:$0xff] }
 0x44f   :  { %6627 = vrsqrt.f32 %v3988_v19  ;;  %v5392_v34 = vadd.f32 %v11382_v12, %v4672_v22  ;;  %v5393_v6 = vadd.f32 %v11382_v12, %v4673_v44  ;;  %v3809_v27 = vmul.f32 0.0051020407, %v3644_v29  ;;  %v3646_v41 = vpop.f32.mrb[199].mxu1  ;;  %v4281_v3 = vpop.permute.xlu0 %4280  ;;  %v3897_v12 = vld [vmem:[%s10674_s2 + $0x228] sm:$0xff] }
 0x450   :  { %5606 = vst [vmem:[%s10675_s4 + $0x220] sm:$0xff] %v5426_v1  ;;  %5607 = vst.msk [vmem:[%s10675_s4 + $0x228] sm:$0xff] %vm1051_vm0, %v5427_v57  ;;  %v4366_v28 = vpop.permute.xlu1 %4365  ;;  %v4674_v62 = vmul.f32 %v4281_v3, %v11383_v30  ;;  %v4675_v20 = vmul.f32 %v4281_v3, %v11384_v40  ;;  %4525 = vperm.xlu1 %6373, %v4165_v53  }
 0x451   :  { %v6624_v31 = vpop.eup %6623  ;;  %5572 = vst [vmem:[%s10675_s4 + $0x110] sm:$0xff] %v5392_v34  ;;  %5573 = vst.msk [vmem:[%s10675_s4 + $0x118] sm:$0xff] %vm1051_vm0, %v5393_v6  ;;  %v3989_v25 = vadd.f32 1e-05, %v3809_v27  ;;  %v4708_v60 = vmul.f32 %v4366_v28, %v11385_v37  ;;  %v4709_v54 = vmul.f32 %v4366_v28, %v11386_v17  ;;  %v11388_v34 = vld [vmem:[#allocation27_spill] sm:$0xff]  ;;  %v11389_v27 = vld [vmem:[#allocation149_spill] sm:$0xff] }
 0x452   :  { %v5394_v19 = vadd.f32 %v11387_v35, %v4674_v62  ;;  %v5395_v43 = vadd.f32 %v11387_v35, %v4675_v20  ;;  %v3649_v22 = vpop.f32.mrb[200].mxu1  ;;  %v4166_v63 = vmul.f32 %v6624_v31, %v3896_v47  ;;  %v11390_v28 = vld [vmem:[#allocation150_spill] sm:$0xff]  ;;  %v11391_v62 = vld [vmem:[#allocation147_spill] sm:$0xff] }
 0x453   :  { %6629 = vrsqrt.f32 %v3989_v25  ;;  %v5428_v44 = vadd.f32 %v9177_v45, %v4708_v60  ;;  %v5429_v1 = vadd.f32 %v9177_v45, %v4709_v54  ;;  %v3810_v57 = vmul.f32 0.0051020407, %v3649_v22  ;;  %v3651_v29 = vpop.f32.mrb[201].mxu1  ;;  %v4371_v53 = vpop.permute.xlu0 %4370  ;;  %v11392_v60 = vld [vmem:[#allocation168_spill] sm:$0xff] }
 0x454   :  { %5574 = vst [vmem:[%s10675_s4 + $0x120] sm:$0xff] %v5394_v19  ;;  %5575 = vst.msk [vmem:[%s10675_s4 + $0x128] sm:$0xff] %vm1051_vm0, %v5395_v43  ;;  %v4710_v6 = vmul.f32 %v4371_v53, %v11388_v34  ;;  %v4711_v45 = vmul.f32 %v4371_v53, %v11389_v27  ;;  %v4286_v41 = vpop.permute.xlu1 %4285  ;;  %4530 = vperm.xlu0 %6372, %v4166_v63   ;;  %v3898_v22 = vld [vmem:[%s10674_s2 + $0x230] sm:$0xff]  ;;  %v11393_v63 = vld [vmem:[#allocation2_spill] sm:$0xff] }
 0x455   :  { %v6626_v3 = vpop.eup %6625  ;;  %5608 = vst [vmem:[%s10675_s4 + $0x230] sm:$0xff] %v5428_v44  ;;  %5609 = vst.msk [vmem:[%s10675_s4 + $0x238] sm:$0xff] %vm1051_vm0, %v5429_v1  ;;  %v3990_v47 = vadd.f32 1e-05, %v3810_v57  ;;  %v4676_v30 = vmul.f32 %v4286_v41, %v11390_v28  ;;  %v4677_v40 = vmul.f32 %v4286_v41, %v11391_v62  ;;  %v11394_v1 = vld [vmem:[#allocation3_spill] sm:$0xff] }
 0x456   :  { %v5430_v20 = vadd.f32 %v9183_v21, %v4710_v6  ;;  %v5431_v31 = vadd.f32 %v9183_v21, %v4711_v45  ;;  %v3654_v25 = vpop.f32.mrb[202].mxu1  ;;  %v4167_v37 = vmul.f32 %v6626_v3, %v3897_v12  ;;  %v11395_v12 = vld [vmem:[#allocation28_spill] sm:$0xff]  ;;  %v11396_v6 = vld [vmem:[#allocation29_spill] sm:$0xff] }
 0x457   :  { %6631 = vrsqrt.f32 %v3990_v47  ;;  %v5396_v17 = vadd.f32 %v11392_v60, %v4676_v30  ;;  %v5397_v54 = vadd.f32 %v11392_v60, %v4677_v40  ;;  %v3811_v35 = vmul.f32 0.0051020407, %v3654_v25  ;;  %v3656_v19 = vpop.f32.mrb[203].mxu1  ;;  %v4291_v43 = vpop.permute.xlu0 %4290  ;;  %v11397_v45 = vld [vmem:[#allocation169_spill] sm:$0xff] }
 0x458   :  { %5610 = vst [vmem:[%s10675_s4 + $0x240] sm:$0xff] %v5430_v20  ;;  %5611 = vst.msk [vmem:[%s10675_s4 + $0x248] sm:$0xff] %vm1051_vm0, %v5431_v31  ;;  %v4376_v21 = vpop.permute.xlu1 %4375  ;;  %v4678_v44 = vmul.f32 %v4291_v43, %v11393_v63  ;;  %v4679_v57 = vmul.f32 %v4291_v43, %v11394_v1  ;;  %4535 = vperm.xlu1 %6373, %v4167_v37   ;;  %v3899_v25 = vld [vmem:[%s10674_s2 + $0x238] sm:$0xff]  ;;  %v11398_v37 = vld [vmem:[#allocation30_spill] sm:$0xff] }
 0x459   :  { %v6628_v29 = vpop.eup %6627  ;;  %5576 = vst [vmem:[%s10675_s4 + $0x130] sm:$0xff] %v5396_v17  ;;  %5577 = vst.msk [vmem:[%s10675_s4 + $0x138] sm:$0xff] %vm1051_vm0, %v5397_v54  ;;  %v3991_v53 = vadd.f32 1e-05, %v3811_v35  ;;  %v4712_v34 = vmul.f32 %v4376_v21, %v11395_v12  ;;  %v4713_v27 = vmul.f32 %v4376_v21, %v11396_v6  ;;  %v11399_v17 = vld [vmem:[#allocation31_spill] sm:$0xff]  ;;  %v11400_v43 = vld [vmem:[#allocation4_spill] sm:$0xff] }
 0x45a   :  { %v5398_v41 = vadd.f32 %v11397_v45, %v4678_v44  ;;  %v5399_v3 = vadd.f32 %v11397_v45, %v4679_v57  ;;  %v3659_v47 = vpop.f32.mrb[204].mxu1  ;;  %v4168_v28 = vmul.f32 %v6628_v29, %v3898_v22  ;;  %v11401_v21 = vld [vmem:[#allocation5_spill] sm:$0xff] }
 0x45b   :  { %6633 = vrsqrt.f32 %v3991_v53  ;;  %v5432_v30 = vadd.f32 %v9197_v15, %v4712_v34  ;;  %v5433_v62 = vadd.f32 %v9197_v15, %v4713_v27  ;;  %v3812_v40 = vmul.f32 0.0051020407, %v3659_v47  ;;  %v3661_v20 = vpop.f32.mrb[205].mxu1  ;;  %v11402_v53 = vld [vmem:[#allocation170_spill] sm:$0xff] }
 0x45c   :  { %v4381_v31 = vpop.permute.xlu0 %4380  ;;  %5578 = vst [vmem:[%s10675_s4 + $0x140] sm:$0xff] %v5398_v41  ;;  %5579 = vst.msk [vmem:[%s10675_s4 + $0x148] sm:$0xff] %vm1051_vm0, %v5399_v3  ;;  %v4296_v54 = vpop.permute.xlu1 %4295  ;;  %4540 = vperm.xlu0 %6372, %v4168_v28   ;;  %v3900_v41 = vld [vmem:[%s10674_s2 + $0x240] sm:$0xff]  ;;  %v11404_v28 = vld [vmem:[#allocation7_spill] sm:$0xff] }
 0x45d   :  { %v4714_v60 = vmul.f32 %v4381_v31, %v11398_v37  ;;  %v4715_v15 = vmul.f32 %v4381_v31, %v11399_v17  ;;  %v6630_v35 = vpop.eup %6629  ;;  %5612 = vst [vmem:[%s10675_s4 + $0x250] sm:$0xff] %v5432_v30  ;;  %5613 = vst.msk [vmem:[%s10675_s4 + $0x258] sm:$0xff] %vm1051_vm0, %v5433_v62  ;;  %v3992_v19 = vadd.f32 1e-05, %v3812_v40  ;;  %v4680_v22 = vmul.f32 %v4296_v54, %v11400_v43  ;;  %v11403_v3 = vld [vmem:[#allocation6_spill] sm:$0xff]  ;;  %v11405_v20 = vld [vmem:[#allocation32_spill] sm:$0xff] }
 0x45e   :  { %v4681_v63 = vmul.f32 %v4296_v54, %v11401_v21  ;;  %v3664_v57 = vpop.f32.mrb[206].mxu1  ;;  %v4169_v29 = vmul.f32 %v6630_v35, %v3899_v25  ;;  %v11406_v25 = vld [vmem:[#allocation33_spill] sm:$0xff] }
 0x45f   :  { %v5434_v44 = vadd.f32 %v9203_v58, %v4714_v60  ;;  %v5435_v1 = vadd.f32 %v9203_v58, %v4715_v15  ;;  %6635 = vrsqrt.f32 %v3992_v19  ;;  %v5400_v12 = vadd.f32 %v11402_v53, %v4680_v22  ;;  %v3666_v27 = vpop.f32.mrb[207].mxu1  ;;  %v11407_v60 = vld [vmem:[#allocation171_spill] sm:$0xff] }
 0x460   :  { %v5401_v34 = vadd.f32 %v11402_v53, %v4681_v63  ;;  %v3813_v6 = vmul.f32 0.0051020407, %v3664_v57  ;;  %v4301_v45 = vpop.permute.xlu0 %4300  ;;  %v4386_v58 = vpop.permute.xlu1 %4385  ;;  %4545 = vperm.xlu1 %6373, %v4169_v29   ;;  %v11409_v29 = vld [vmem:[#allocation35_spill] sm:$0xff] }
 0x461   :  { %5614 = vst [vmem:[%s10675_s4 + $0x260] sm:$0xff] %v5434_v44  ;;  %5615 = vst.msk [vmem:[%s10675_s4 + $0x268] sm:$0xff] %vm1051_vm0, %v5435_v1  ;;  %v4682_v47 = vmul.f32 %v4301_v45, %v11403_v3  ;;  %v4683_v30 = vmul.f32 %v4301_v45, %v11404_v28  ;;  %v6632_v62 = vpop.eup %6631  ;;  %v4716_v31 = vmul.f32 %v4386_v58, %v11405_v20  ;;  %v3901_v44 = vld [vmem:[%s10674_s2 + $0x248] sm:$0xff]  ;;  %v11408_v1 = vld [vmem:[#allocation34_spill] sm:$0xff] }
 0x462   :  { %5580 = vst [vmem:[%s10675_s4 + $0x150] sm:$0xff] %v5400_v12  ;;  %5581 = vst.msk [vmem:[%s10675_s4 + $0x158] sm:$0xff] %vm1051_vm0, %v5401_v34  ;;  %v3993_v40 = vadd.f32 1e-05, %v3813_v6  ;;  %v4717_v37 = vmul.f32 %v4386_v58, %v11406_v25  ;;  %v3669_v54 = vpop.f32.mrb[208].mxu1  ;;  %v4170_v35 = vmul.f32 %v6632_v62, %v3900_v41  ;;  %v11410_v6 = vld [vmem:[#allocation8_spill] sm:$0xff] }
 0x463   :  { %v5402_v17 = vadd.f32 %v11407_v60, %v4682_v47  ;;  %v5403_v15 = vadd.f32 %v11407_v60, %v4683_v30  ;;  %v5436_v19 = vadd.f32 %v9217_v8, %v4716_v31  ;;  %v3814_v22 = vmul.f32 0.0051020407, %v3669_v54  ;;  %v3671_v21 = vpop.f32.mrb[209].mxu1  ;;  %v11411_v45 = vld [vmem:[#allocation9_spill] sm:$0xff]  ;;  %v11412_v30 = vld [vmem:[#allocation172_spill] sm:$0xff]  ;;  %v11413_v60 = vld [vmem:[#allocation10_spill] sm:$0xff] }
 0x464   :  { %6637 = vrsqrt.f32 %v3993_v40  ;;  %v5437_v43 = vadd.f32 %v9217_v8, %v4717_v37  ;;  %v4391_v63 = vpop.permute.xlu0 %4390  ;;  %v4306_v53 = vpop.permute.xlu1 %4305  ;;  %4550 = vperm.xlu0 %6372, %v4170_v35   ;;  %v3902_v37 = vld [vmem:[%s10674_s2 + $0x250] sm:$0xff]  ;;  %v11416_v21 = vld [vmem:[#allocation37_spill] sm:$0xff] }
 0x465   :  { %5582 = vst [vmem:[%s10675_s4 + $0x160] sm:$0xff] %v5402_v17  ;;  %5583 = vst.msk [vmem:[%s10675_s4 + $0x168] sm:$0xff] %vm1051_vm0, %v5403_v15  ;;  %v4718_v57 = vmul.f32 %v4391_v63, %v11408_v1  ;;  %v4719_v8 = vmul.f32 %v4391_v63, %v11409_v29  ;;  %v6634_v12 = vpop.eup %6633  ;;  %v3994_v34 = vadd.f32 1e-05, %v3814_v22  ;;  %v4684_v27 = vmul.f32 %v4306_v53, %v11410_v6  ;;  %v11414_v15 = vld [vmem:[#allocation11_spill] sm:$0xff] }
 0x466   :  { %5616 = vst [vmem:[%s10675_s4 + $0x270] sm:$0xff] %v5436_v19  ;;  %5617 = vst.msk [vmem:[%s10675_s4 + $0x278] sm:$0xff] %vm1051_vm0, %v5437_v43  ;;  %v4685_v41 = vmul.f32 %v4306_v53, %v11411_v45  ;;  %v3674_v47 = vpop.f32.mrb[210].mxu1  ;;  %v4171_v28 = vmul.f32 %v6634_v12, %v3901_v44  ;;  %v11415_v43 = vld [vmem:[#allocation36_spill] sm:$0xff] }
 0x467   :  { %v5438_v58 = vadd.f32 %v9223_v46, %v4718_v57  ;;  %v5439_v3 = vadd.f32 %v9223_v46, %v4719_v8  ;;  %6639 = vrsqrt.f32 %v3994_v34  ;;  %v5404_v62 = vadd.f32 %v11412_v30, %v4684_v27  ;;  %v3676_v31 = vpop.f32.mrb[211].mxu1  ;;  %v3903_v27 = vld [vmem:[%s10674_s2 + $0x258] sm:$0xff] }
 0x468   :  { %v5405_v40 = vadd.f32 %v11412_v30, %v4685_v41  ;;  %v3815_v20 = vmul.f32 0.0051020407, %v3674_v47  ;;  %v4311_v25 = vpop.permute.xlu0 %4310  ;;  %v4396_v46 = vpop.permute.xlu1 %4395  ;;  %4555 = vperm.xlu1 %6373, %v4171_v28   ;;  %v11418_v41 = vld [vmem:[#allocation39_spill] sm:$0xff]  ;;  %v11419_v28 = vld [vmem:[#allocation12_spill] sm:$0xff] }
 0x469   :  { %5618 = vst [vmem:[%s10675_s4 + $0x280] sm:$0xff] %v5438_v58  ;;  %5619 = vst.msk [vmem:[%s10675_s4 + $0x288] sm:$0xff] %vm1051_vm0, %v5439_v3  ;;  %v4686_v17 = vmul.f32 %v4311_v25, %v11413_v60  ;;  %v4687_v54 = vmul.f32 %v4311_v25, %v11414_v15  ;;  %v6636_v35 = vpop.eup %6635  ;;  %v4720_v22 = vmul.f32 %v4396_v46, %v11415_v43  ;;  %v11422_v43 = vld [vmem:[#allocation14_spill] sm:$0xff] }
 0x46a   :  { %5584 = vst [vmem:[%s10675_s4 + $0x170] sm:$0xff] %v5404_v62  ;;  %5585 = vst.msk [vmem:[%s10675_s4 + $0x178] sm:$0xff] %vm1051_vm0, %v5405_v40  ;;  %v3995_v19 = vadd.f32 1e-05, %v3815_v20  ;;  %v4721_v63 = vmul.f32 %v4396_v46, %v11416_v21  ;;  %v3679_v57 = vpop.f32.mrb[212].mxu1  ;;  %v4172_v29 = vmul.f32 %v6636_v35, %v3902_v37  ;;  %v11420_v62 = vld [vmem:[#allocation13_spill] sm:$0xff] }
 0x46b   :  { %v5406_v44 = vadd.f32 %v9046_v55, %v4686_v17  ;;  %v5407_v1 = vadd.f32 %v9046_v55, %v4687_v54  ;;  %v5440_v8 = vadd.f32 %v9237_v16, %v4720_v22  ;;  %v3816_v12 = vmul.f32 0.0051020407, %v3679_v57  ;;  %v3681_v34 = vpop.f32.mrb[213].mxu1  ;;  %v11417_v55 = vld [vmem:[#allocation38_spill] sm:$0xff]  ;;  %v11421_v46 = vld [vmem:[#allocation173_spill] sm:$0xff]  ;;  %v11423_v21 = vld [vmem:[#allocation15_spill] sm:$0xff] }
 0x46c   :  { %6641 = vrsqrt.f32 %v3995_v19  ;;  %v5441_v53 = vadd.f32 %v9237_v16, %v4721_v63  ;;  %v4401_v6 = vpop.permute.xlu0 %4400  ;;  %v4316_v58 = vpop.permute.xlu1 %4315  ;;  %4560 = vperm.xlu0 %6372, %v4172_v29   ;;  %v3904_v19 = vld [vmem:[%s10674_s2 + $0x260] sm:$0xff]  ;;  %v11424_v57 = vld [vmem:[#allocation40_spill] sm:$0xff] }
 0x46d   :  { %5586 = vst [vmem:[%s10675_s4 + $0x180] sm:$0xff] %v5406_v44  ;;  %5587 = vst.msk [vmem:[%s10675_s4 + $0x188] sm:$0xff] %vm1051_vm0, %v5407_v1  ;;  %v4722_v45 = vmul.f32 %v4401_v6, %v11417_v55  ;;  %v4723_v16 = vmul.f32 %v4401_v6, %v11418_v41  ;;  %v3996_v47 = vadd.f32 1e-05, %v3816_v12  ;;  %v4688_v30 = vmul.f32 %v4316_v58, %v11419_v28  ;;  %v11427_v28 = vld [vmem:[#allocation43_spill] sm:$0xff] }
 0x46e   :  { %v6638_v3 = vpop.eup %6637  ;;  %5620 = vst [vmem:[%s10675_s4 + $0x290] sm:$0xff] %v5440_v8  ;;  %5621 = vst.msk [vmem:[%s10675_s4 + $0x298] sm:$0xff] %vm1051_vm0, %v5441_v53  ;;  %v4689_v40 = vmul.f32 %v4316_v58, %v11420_v62  ;;  %v3684_v25 = vpop.f32.mrb[214].mxu1  ;;  %v11425_v8 = vld [vmem:[#allocation41_spill] sm:$0xff] }
 0x46f   :  { %v5442_v20 = vadd.f32 %v9243_v38, %v4722_v45  ;;  %v5443_v31 = vadd.f32 %v9243_v38, %v4723_v16  ;;  %v4173_v37 = vmul.f32 %v6638_v3, %v3903_v27  ;;  %6643 = vrsqrt.f32 %v3996_v47  ;;  %v3686_v54 = vpop.f32.mrb[215].mxu1  ;;  %v3905_v3 = vld [vmem:[%s10674_s2 + $0x268] sm:$0xff] }
 0x470   :  { %v5408_v60 = vadd.f32 %v11421_v46, %v4688_v30  ;;  %v5409_v17 = vadd.f32 %v11421_v46, %v4689_v40  ;;  %v3817_v15 = vmul.f32 0.0051020407, %v3684_v25  ;;  %v4321_v35 = vpop.permute.xlu0 %4320  ;;  %v4406_v38 = vpop.permute.xlu1 %4405  ;;  %v11429_v25 = vld [vmem:[#allocation17_spill] sm:$0xff] }
 0x471   :  { %5622 = vst [vmem:[%s10675_s4 + $0x2a0] sm:$0xff] %v5442_v20  ;;  %5623 = vst.msk [vmem:[%s10675_s4 + $0x2a8] sm:$0xff] %vm1051_vm0, %v5443_v31  ;;  %v4690_v22 = vmul.f32 %v4321_v35, %v11422_v43  ;;  %v4691_v63 = vmul.f32 %v4321_v35, %v11423_v21  ;;  %4565 = vperm.xlu1 %6373, %v4173_v37   ;;  %v6640_v44 = vpop.eup %6639  ;;  %v4724_v29 = vmul.f32 %v4406_v38, %v11424_v57  ;;  %v11428_v20 = vld [vmem:[#allocation16_spill] sm:$0xff]  ;;  %v11430_v21 = vld [vmem:[#allocation18_spill] sm:$0xff] }
 0x472   :  { %5588 = vst [vmem:[%s10675_s4 + $0x190] sm:$0xff] %v5408_v60  ;;  %5589 = vst.msk [vmem:[%s10675_s4 + $0x198] sm:$0xff] %vm1051_vm0, %v5409_v17  ;;  %v3997_v1 = vadd.f32 1e-05, %v3817_v15  ;;  %v4725_v53 = vmul.f32 %v4406_v38, %v11425_v8  ;;  %v3689_v6 = vpop.f32.mrb[216].mxu1  ;;  %v4174_v27 = vmul.f32 %v6640_v44, %v3904_v19 }
 0x473   :  { %v5410_v12 = vadd.f32 %v9083_v61, %v4690_v22  ;;  %v5411_v34 = vadd.f32 %v9083_v61, %v4691_v63  ;;  %v5444_v55 = vadd.f32 %v9257_v48, %v4724_v29  ;;  %v3818_v41 = vmul.f32 0.0051020407, %v3689_v6  ;;  %v3691_v16 = vpop.f32.mrb[217].mxu1  ;;  %v11426_v61 = vld [vmem:[#allocation42_spill] sm:$0xff]  ;;  %v3906_v22 = vld [vmem:[%s10674_s2 + $0x270] sm:$0xff] }
 0x474   :  { %6645 = vrsqrt.f32 %v3997_v1  ;;  %v5445_v45 = vadd.f32 %v9257_v48, %v4725_v53  ;;  %v4411_v58 = vpop.permute.xlu0 %4410  ;;  %v4326_v30 = vpop.permute.xlu1 %4325  ;;  %4570 = vperm.xlu0 %6372, %v4174_v27   ;;  %v11432_v29 = vld [vmem:[#allocation44_spill] sm:$0xff]  ;;  %v11433_v53 = vld [vmem:[#allocation45_spill] sm:$0xff] }
 0x475   :  { %5590 = vst [vmem:[%s10675_s4 + $0x1a0] sm:$0xff] %v5410_v12  ;;  %5591 = vst.msk [vmem:[%s10675_s4 + $0x1a8] sm:$0xff] %vm1051_vm0, %v5411_v34  ;;  %v4726_v47 = vmul.f32 %v4411_v58, %v11426_v61  ;;  %v4727_v48 = vmul.f32 %v4411_v58, %v11427_v28  ;;  %v3998_v40 = vadd.f32 1e-05, %v3818_v41  ;;  %v4692_v31 = vmul.f32 %v4326_v30, %v11428_v20  ;;  %v11434_v34 = vld [vmem:[#allocation176_spill] sm:$0xff]  ;;  %v11435_v28 = vld [vmem:[#allocation46_spill] sm:$0xff] }
 0x476   :  { %v6642_v62 = vpop.eup %6641  ;;  %5624 = vst [vmem:[%s10675_s4 + $0x2b0] sm:$0xff] %v5444_v55  ;;  %5625 = vst.msk [vmem:[%s10675_s4 + $0x2b8] sm:$0xff] %vm1051_vm0, %v5445_v45  ;;  %v4693_v37 = vmul.f32 %v4326_v30, %v11429_v25  ;;  %v3694_v17 = vpop.f32.mrb[218].mxu1  ;;  %v11436_v30 = vld [vmem:[#allocation47_spill] sm:$0xff] }
 0x477   :  { %v5446_v46 = vadd.f32 %v9263_v23, %v4726_v47  ;;  %v5447_v60 = vadd.f32 %v9263_v23, %v4727_v48  ;;  %v4175_v15 = vmul.f32 %v6642_v62, %v3905_v3  ;;  %6647 = vrsqrt.f32 %v3998_v40  ;;  %v3696_v38 = vpop.f32.mrb[219].mxu1  ;;  %v3907_v47 = vld [vmem:[%s10674_s2 + $0x278] sm:$0xff] }
 0x478   :  { %v5412_v54 = vadd.f32 %v9097_v7, %v4692_v31  ;;  %v5413_v35 = vadd.f32 %v9097_v7, %v4693_v37  ;;  %v3819_v19 = vmul.f32 0.0051020407, %v3694_v17  ;;  %v4331_v43 = vpop.permute.xlu0 %4330  ;;  %v4416_v23 = vpop.permute.xlu1 %4415  ;;  %v11431_v7 = vld [vmem:[#allocation19_spill] sm:$0xff]  ;;  %v11437_v31 = vld [vmem:[#allocation20_spill] sm:$0xff]  ;;  %v11438_v37 = vld [vmem:[#allocation21_spill] sm:$0xff] }
 0x479   :  { %5626 = vst [vmem:[%s10675_s4 + $0x2c0] sm:$0xff] %v5446_v46  ;;  %5627 = vst.msk [vmem:[%s10675_s4 + $0x2c8] sm:$0xff] %vm1051_vm0, %v5447_v60  ;;  %v4694_v63 = vmul.f32 %v4331_v43, %v11430_v21  ;;  %v4695_v44 = vmul.f32 %v4331_v43, %v11431_v7  ;;  %4575 = vperm.xlu1 %6373, %v4175_v15   ;;  %v6644_v1 = vpop.eup %6643  ;;  %v4728_v8 = vmul.f32 %v4416_v23, %v11432_v29  ;;  %v11439_v21 = vld [vmem:[#allocation22_spill] sm:$0xff] }
 0x47a   :  { %5592 = vst [vmem:[%s10675_s4 + $0x1b0] sm:$0xff] %v5412_v54  ;;  %5593 = vst.msk [vmem:[%s10675_s4 + $0x1b8] sm:$0xff] %vm1051_vm0, %v5413_v35  ;;  %v3999_v57 = vadd.f32 1e-05, %v3819_v19  ;;  %v4729_v12 = vmul.f32 %v4416_v23, %v11433_v53  ;;  %v3699_v55 = vpop.f32.mrb[220].mxu1  ;;  %v4176_v45 = vmul.f32 %v6644_v1, %v3906_v22  ;;  %v3908_v23 = vld [vmem:[%s10674_s2 + $0x280] sm:$0xff] }
 0x47b   :  { %v5414_v6 = vadd.f32 %v11434_v34, %v4694_v63  ;;  %v5415_v27 = vadd.f32 %v11434_v34, %v4695_v44  ;;  %v5448_v41 = vadd.f32 %v9277_v2, %v4728_v8  ;;  %v3820_v58 = vmul.f32 0.0051020407, %v3699_v55  ;;  %v3701_v3 = vpop.f32.mrb[221].mxu1  ;;  %v11442_v8 = vld [vmem:[#allocation49_spill] sm:$0xff] }
 0x47c   :  { %6649 = vrsqrt.f32 %v3999_v57  ;;  %v5449_v16 = vadd.f32 %v9277_v2, %v4729_v12  ;;  %v4421_v61 = vpop.permute.xlu0 %4420  ;;  %v4336_v62 = vpop.permute.xlu1 %4335  ;;  %4580 = vperm.xlu0 %6372, %v4176_v45   ;;  %v11441_v57 = vld [vmem:[#allocation48_spill] sm:$0xff]  ;;  %v3909_v3 = vld [vmem:[%s10674_s2 + $0x288] sm:$0xff] }
 0x47d   :  { %5594 = vst [vmem:[%s10675_s4 + $0x1c0] sm:$0xff] %v5414_v6  ;;  %5595 = vst.msk [vmem:[%s10675_s4 + $0x1c8] sm:$0xff] %vm1051_vm0, %v5415_v27  ;;  %v4730_v48 = vmul.f32 %v4421_v61, %v11435_v28  ;;  %v4731_v2 = vmul.f32 %v4421_v61, %v11436_v30  ;;  %v4000_v20 = vadd.f32 1e-05, %v3820_v58  ;;  %v4696_v25 = vmul.f32 %v4336_v62, %v11437_v31 }
 0x47e   :  { %v6646_v40 = vpop.eup %6645  ;;  %5628 = vst [vmem:[%s10675_s4 + $0x2d0] sm:$0xff] %v5448_v41  ;;  %5629 = vst.msk [vmem:[%s10675_s4 + $0x2d8] sm:$0xff] %vm1051_vm0, %v5449_v16  ;;  %v4697_v46 = vmul.f32 %v4336_v62, %v11438_v37  ;;  %v3704_v15 = vpop.f32.mrb[222].mxu1 }
 0x47f   :  { %v5450_v60 = vadd.f32 %v9283_v32, %v4730_v48  ;;  %v5451_v17 = vadd.f32 %v9283_v32, %v4731_v2  ;;  %v4177_v54 = vmul.f32 %v6646_v40, %v3907_v47  ;;  %6651 = vrsqrt.f32 %v4000_v20  ;;  %v3706_v43 = vpop.f32.mrb[223].mxu1  ;;  %v11444_v47 = vld [vmem:[#allocation51_spill] sm:$0xff]  ;;  %v11445_v2 = vld [vmem:[#allocation24_spill] sm:$0xff]  ;;  %v11446_v40 = vld [vmem:[#allocation25_spill] sm:$0xff] }
 0x480   :  { %v5416_v35 = vadd.f32 %v9117_v18, %v4696_v25  ;;  %v5417_v19 = vadd.f32 %v9117_v18, %v4697_v46  ;;  %v3821_v38 = vmul.f32 0.0051020407, %v3704_v15  ;;  %v4341_v22 = vpop.permute.xlu0 %4340  ;;  %v4426_v32 = vpop.permute.xlu1 %4425  ;;  %v11440_v18 = vld [vmem:[#allocation23_spill] sm:$0xff] }
 0x481   :  { %5630 = vst [vmem:[%s10675_s4 + $0x2e0] sm:$0xff] %v5450_v60  ;;  %5631 = vst.msk [vmem:[%s10675_s4 + $0x2e8] sm:$0xff] %vm1051_vm0, %v5451_v17  ;;  %v4698_v63 = vmul.f32 %v4341_v22, %v11439_v21  ;;  %v4699_v7 = vmul.f32 %v4341_v22, %v11440_v18  ;;  %4585 = vperm.xlu1 %6373, %v4177_v54   ;;  %v6648_v44 = vpop.eup %6647  ;;  %v4732_v29 = vmul.f32 %v4426_v32, %v11441_v57  ;;  %v11449_v21 = vld [vmem:[#allocation52_spill] sm:$0xff]  ;;  %v11450_v18 = vld [vmem:[#allocation53_spill] sm:$0xff] }
 0x482   :  { %5596 = vst [vmem:[%s10675_s4 + $0x1d0] sm:$0xff] %v5416_v35  ;;  %5597 = vst.msk [vmem:[%s10675_s4 + $0x1d8] sm:$0xff] %vm1051_vm0, %v5417_v19  ;;  %v4001_v1 = vadd.f32 1e-05, %v3821_v38  ;;  %v4733_v53 = vmul.f32 %v4426_v32, %v11442_v8  ;;  %v3709_v6 = vpop.f32.mrb[224].mxu1  ;;  %v4178_v27 = vmul.f32 %v6648_v44, %v3908_v23  ;;  %v3910_v19 = vld [vmem:[%s10674_s2 + $0x290] sm:$0xff] }
 0x483   :  { %v5418_v12 = vadd.f32 %v9123_v39, %v4698_v63  ;;  %v5419_v34 = vadd.f32 %v9123_v39, %v4699_v7  ;;  %v5452_v55 = vadd.f32 %v9297_v11, %v4732_v29  ;;  %v3822_v41 = vmul.f32 0.0051020407, %v3709_v6  ;;  %v3711_v16 = vpop.f32.mrb[225].mxu1  ;;  %v11443_v39 = vld [vmem:[#allocation50_spill] sm:$0xff]  ;;  %v11447_v38 = vld [vmem:[#allocation136_spill] sm:$0xff] }
 0x484   :  { %6653 = vrsqrt.f32 %v4001_v1  ;;  %v5453_v45 = vadd.f32 %v9297_v11, %v4733_v53  ;;  %v4431_v58 = vpop.permute.xlu0 %4430  ;;  %v4346_v28 = vpop.permute.xlu1 %4345  ;;  %4590 = vperm.xlu0 %6372, %v4178_v27   ;;  %v3911_v27 = vld [vmem:[%s10674_s2 + $0x298] sm:$0xff] }
 0x485   :  { %5598 = vst [vmem:[%s10675_s4 + $0x1e0] sm:$0xff] %v5418_v12  ;;  %5599 = vst.msk [vmem:[%s10675_s4 + $0x1e8] sm:$0xff] %vm1051_vm0, %v5419_v34  ;;  %v4734_v61 = vmul.f32 %v4431_v58, %v11443_v39  ;;  %v4735_v11 = vmul.f32 %v4431_v58, %v11444_v47  ;;  %v4002_v30 = vadd.f32 1e-05, %v3822_v41  ;;  %v4700_v62 = vmul.f32 %v4346_v28, %v11445_v2  ;;  %v11454_v2 = vld [vmem:[#allocation57_spill] sm:$0xff] }
 0x486   :  { %v6650_v48 = vpop.eup %6649  ;;  %5632 = vst [vmem:[%s10675_s4 + $0x2f0] sm:$0xff] %v5452_v55  ;;  %5633 = vst.msk [vmem:[%s10675_s4 + $0x2f8] sm:$0xff] %vm1051_vm0, %v5453_v45  ;;  %v4701_v20 = vmul.f32 %v4346_v28, %v11446_v40  ;;  %v3714_v37 = vpop.f32.mrb[226].mxu1  ;;  %v11452_v45 = vld [vmem:[#allocation55_spill] sm:$0xff] }
 0x487   :  { %v5454_v31 = vadd.f32 %v9303_v50, %v4734_v61  ;;  %v5455_v25 = vadd.f32 %v9303_v50, %v4735_v11  ;;  %v4179_v46 = vmul.f32 %v6650_v48, %v3909_v3  ;;  %6655 = vrsqrt.f32 %v4002_v30  ;;  %v3716_v54 = vpop.f32.mrb[227].mxu1  ;;  %v3912_v48 = vld [vmem:[%s10674_s2 + $0x2a0] sm:$0xff] }
 0x488   :  { %v5420_v60 = vadd.f32 %v9137_v52, %v4700_v62  ;;  %v5421_v17 = vadd.f32 %v9137_v52, %v4701_v20  ;;  %v3823_v15 = vmul.f32 0.0051020407, %v3714_v37  ;;  %v4351_v35 = vpop.permute.xlu0 %4350  ;;  %v4436_v50 = vpop.permute.xlu1 %4435  ;;  %v11448_v52 = vld [vmem:[#allocation26_spill] sm:$0xff]  ;;  %v3913_v54 = vld [vmem:[%s10674_s2 + $0x2a8] sm:$0xff] }
 0x489   :  { %5634 = vst [vmem:[%s10675_s4 + $0x300] sm:$0xff] %v5454_v31  ;;  %5635 = vst.msk [vmem:[%s10675_s4 + $0x308] sm:$0xff] %vm1051_vm0, %v5455_v25  ;;  %v4702_v43 = vmul.f32 %v4351_v35, %v11447_v38  ;;  %v4703_v22 = vmul.f32 %v4351_v35, %v11448_v52  ;;  %4595 = vperm.xlu1 %6373, %v4179_v46   ;;  %v6652_v23 = vpop.eup %6651  ;;  %v4736_v63 = vmul.f32 %v4436_v50, %v11449_v21 }
 0x48a   :  { %5600 = vst [vmem:[%s10675_s4 + $0x1f0] sm:$0xff] %v5420_v60  ;;  %5601 = vst.msk [vmem:[%s10675_s4 + $0x1f8] sm:$0xff] %vm1051_vm0, %v5421_v17  ;;  %v4003_v32 = vadd.f32 1e-05, %v3823_v15  ;;  %v4737_v7 = vmul.f32 %v4436_v50, %v11450_v18  ;;  %v3719_v57 = vpop.f32.mrb[228].mxu1  ;;  %v4180_v29 = vmul.f32 %v6652_v23, %v3910_v19  ;;  %v11456_v19 = vld [vmem:[#allocation59_spill] sm:$0xff] }
 0x48b   :  { %v5422_v44 = vadd.f32 %v9143_v26, %v4702_v43  ;;  %v5423_v1 = vadd.f32 %v9143_v26, %v4703_v22  ;;  %v5456_v8 = vadd.f32 %v9317_v9, %v4736_v63  ;;  %v3824_v12 = vmul.f32 0.0051020407, %v3719_v57  ;;  %v3721_v34 = vpop.f32.mrb[229].mxu1  ;;  %v11451_v26 = vld [vmem:[#allocation54_spill] sm:$0xff] }
 0x48c   :  { %6657 = vrsqrt.f32 %v4003_v32  ;;  %v5457_v53 = vadd.f32 %v9317_v9, %v4737_v7  ;;  %v4441_v6 = vpop.permute.xlu0 %4440  ;;  %4600 = vperm.xlu0 %6372, %v4180_v29   ;;  %v3914_v7 = vld [vmem:[%s10674_s2 + $0x2b0] sm:$0xff] }
 0x48d   :  { %5602 = vst [vmem:[%s10675_s4 + $0x200] sm:$0xff] %v5422_v44  ;;  %5603 = vst.msk [vmem:[%s10675_s4 + $0x208] sm:$0xff] %vm1051_vm0, %v5423_v1  ;;  %v4738_v55 = vmul.f32 %v4441_v6, %v11451_v26  ;;  %v4739_v9 = vmul.f32 %v4441_v6, %v11452_v45  ;;  %v4004_v16 = vadd.f32 1e-05, %v3824_v12  ;;  %v11458_v1 = vld [vmem:[#allocation61_spill] sm:$0xff]  ;;  %v11459_v26 = vld [vmem:[#allocation62_spill] sm:$0xff] }
 0x48e   :  { %v6654_v41 = vpop.eup %6653  ;;  %5636 = vst [vmem:[%s10675_s4 + $0x310] sm:$0xff] %v5456_v8  ;;  %5637 = vst.msk [vmem:[%s10675_s4 + $0x318] sm:$0xff] %vm1051_vm0, %v5457_v53  ;;  %v3724_v39 = vpop.f32.mrb[230].mxu1  ;;  %v11460_v45 = vld [vmem:[#allocation63_spill] sm:$0xff] }
 0x48f   :  { %v5458_v58 = vadd.f32 %v9323_v49, %v4738_v55  ;;  %v5459_v3 = vadd.f32 %v9323_v49, %v4739_v9  ;;  %v4181_v61 = vmul.f32 %v6654_v41, %v3911_v27  ;;  %6659 = vrsqrt.f32 %v4004_v16  ;;  %v3726_v11 = vpop.f32.mrb[231].mxu1  ;;  %v4446_v28 = vpop.permute.xlu1 %4445  ;;  %v11453_v49 = vld [vmem:[#allocation56_spill] sm:$0xff]  ;;  %v3915_v27 = vld [vmem:[%s10674_s2 + $0x2b8] sm:$0xff] }
 0x490   :  { %v3825_v47 = vmul.f32 0.0051020407, %v3724_v39  ;;  %v4740_v30 = vmul.f32 %v4446_v28, %v11453_v49  ;;  %v4741_v62 = vmul.f32 %v4446_v28, %v11454_v2  ;;  %v3916_v39 = vld [vmem:[%s10674_s2 + $0x2c0] sm:$0xff]  ;;  %v11462_v11 = vld [vmem:[#allocation65_spill] sm:$0xff] }
 0x491   :  { %5638 = vst [vmem:[%s10675_s4 + $0x320] sm:$0xff] %v5458_v58  ;;  %5639 = vst.msk [vmem:[%s10675_s4 + $0x328] sm:$0xff] %vm1051_vm0, %v5459_v3  ;;  %4605 = vperm.xlu1 %6373, %v4181_v61   ;;  %v6656_v40 = vpop.eup %6655  ;;  %v11461_v61 = vld [vmem:[#allocation64_spill] sm:$0xff] }
 0x492   :  { %v4005_v20 = vadd.f32 1e-05, %v3825_v47  ;;  %v5460_v31 = vadd.f32 %v9337_v10, %v4740_v30  ;;  %v5461_v25 = vadd.f32 %v9337_v10, %v4741_v62  ;;  %v3729_v37 = vpop.f32.mrb[232].mxu1  ;;  %v4182_v46 = vmul.f32 %v6656_v40, %v3912_v48  ;;  %v11455_v10 = vld [vmem:[#allocation58_spill] sm:$0xff]  ;;  %v3917_v62 = vld [vmem:[%s10674_s2 + $0x2c8] sm:$0xff] }
 0x493   :  { %v3826_v60 = vmul.f32 0.0051020407, %v3729_v37  ;;  %v3731_v17 = vpop.f32.mrb[233].mxu1  ;;  %v4451_v15 = vpop.permute.xlu0 %4450  ;;  %v11463_v40 = vld [vmem:[#allocation66_spill] sm:$0xff] }
 0x494   :  { %6661 = vrsqrt.f32 %v4005_v20  ;;  %5640 = vst [vmem:[%s10675_s4 + $0x330] sm:$0xff] %v5460_v31  ;;  %5641 = vst.msk [vmem:[%s10675_s4 + $0x338] sm:$0xff] %vm1051_vm0, %v5461_v25  ;;  %v4742_v35 = vmul.f32 %v4451_v15, %v11455_v10  ;;  %v4743_v50 = vmul.f32 %v4451_v15, %v11456_v19  ;;  %4610 = vperm.xlu0 %6372, %v4182_v46   ;;  %v11464_v31 = vld [vmem:[#allocation67_spill] sm:$0xff]  ;;  %v4906_v37 = vld [vmem:[%s10673_s3 + $0x2c0] sm:$0xff] }
 0x495   :  { %v4006_v43 = vadd.f32 1e-05, %v3826_v60 }
 0x496   :  { %v6658_v38 = vpop.eup %6657  ;;  %v5462_v52 = vadd.f32 %v9343_v4, %v4742_v35  ;;  %v5463_v22 = vadd.f32 %v9343_v4, %v4743_v50  ;;  %v3734_v23 = vpop.f32.mrb[234].mxu1  ;;  %v11457_v4 = vld [vmem:[#allocation60_spill] sm:$0xff]  ;;  %v11466_v35 = vld [vmem:[#allocation69_spill] sm:$0xff] }
 0x497   :  { %v4183_v32 = vmul.f32 %v6658_v38, %v3913_v54  ;;  %6663 = vrsqrt.f32 %v4006_v43  ;;  %v3827_v21 = vmul.f32 0.0051020407, %v3734_v23  ;;  %v4456_v63 = vpop.permute.xlu1 %4455  ;;  %v3736_v18 = vpop.f32.mrb[235].mxu1  ;;  %v11465_v54 = vld [vmem:[#allocation68_spill] sm:$0xff]  ;;  %v11468_v23 = vld [vmem:[#allocation71_spill] sm:$0xff] }
 0x498   :  { %5642 = vst [vmem:[%s10675_s4 + $0x340] sm:$0xff] %v5462_v52  ;;  %5643 = vst.msk [vmem:[%s10675_s4 + $0x348] sm:$0xff] %vm1051_vm0, %v5463_v22  ;;  %v4744_v44 = vmul.f32 %v4456_v63, %v11457_v4  ;;  %v4745_v57 = vmul.f32 %v4456_v63, %v11458_v1  ;;  %v11467_v52 = vld [vmem:[#allocation70_spill] sm:$0xff]  ;;  %v11469_v18 = vld [vmem:[#allocation72_spill] sm:$0xff] }
 0x499   :  { %4615 = vperm.xlu1 %6373, %v4183_v32   ;;  %v6660_v29 = vpop.eup %6659  ;;  %v4007_v8 = vadd.f32 1e-05, %v3827_v21  ;;  %v11470_v4 = vld [vmem:[#allocation73_spill] sm:$0xff] }
 0x49a   :  { %v5464_v53 = vadd.f32 %v9357_v13, %v4744_v44  ;;  %v5465_v12 = vadd.f32 %v9357_v13, %v4745_v57  ;;  %v4184_v34 = vmul.f32 %v6660_v29, %v3914_v7 }
 0x49b   :  { %6665 = vrsqrt.f32 %v4007_v8  ;;  %v4461_v6 = vpop.permute.xlu0 %4460 }
 0x49c   :  { %5644 = vst [vmem:[%s10675_s4 + $0x350] sm:$0xff] %v5464_v53  ;;  %5645 = vst.msk [vmem:[%s10675_s4 + $0x358] sm:$0xff] %vm1051_vm0, %v5465_v12  ;;  %v4746_v55 = vmul.f32 %v4461_v6, %v11459_v26  ;;  %v4747_v13 = vmul.f32 %v4461_v6, %v11460_v45  ;;  %4620 = vperm.xlu0 %6372, %v4184_v34   ;;  %v11472_v53 = vld [vmem:[#allocation75_spill] sm:$0xff] }
 0x49e   :  { %v6662_v9 = vpop.eup %6661  ;;  %v5466_v41 = vadd.f32 %v9363_v24, %v4746_v55  ;;  %v5467_v16 = vadd.f32 %v9363_v24, %v4747_v13  ;;  %v11474_v55 = vld [vmem:[#allocation77_spill] sm:$0xff] }
 0x49f   :  { %v4185_v58 = vmul.f32 %v6662_v9, %v3915_v27  ;;  %v4466_v3 = vpop.permute.xlu1 %4465 }
 0x4a0   :  { %5646 = vst [vmem:[%s10675_s4 + $0x360] sm:$0xff] %v5466_v41  ;;  %5647 = vst.msk [vmem:[%s10675_s4 + $0x368] sm:$0xff] %vm1051_vm0, %v5467_v16  ;;  %v4748_v47 = vmul.f32 %v4466_v3, %v11461_v61  ;;  %v4749_v28 = vmul.f32 %v4466_v3, %v11462_v11 }
 0x4a1   :  { %4625 = vperm.xlu1 %6373, %v4185_v58   ;;  %v6664_v24 = vpop.eup %6663  ;;  %v11476_v58 = vld [vmem:[#allocation79_spill] sm:$0xff] }
 0x4a2   :  { %v5468_v48 = vadd.f32 %v9377_v56, %v4748_v47  ;;  %v5469_v49 = vadd.f32 %v9377_v56, %v4749_v28  ;;  %v4186_v30 = vmul.f32 %v6664_v24, %v3916_v39  ;;  %v11478_v28 = vld [vmem:[#allocation81_spill] sm:$0xff] }
 0x4a3   :  { %v4471_v2 = vpop.permute.xlu0 %4470 }
 0x4a4   :  { %5648 = vst [vmem:[%s10675_s4 + $0x370] sm:$0xff] %v5468_v48  ;;  %5649 = vst.msk [vmem:[%s10675_s4 + $0x378] sm:$0xff] %vm1051_vm0, %v5469_v49  ;;  %v4750_v20 = vmul.f32 %v4471_v2, %v11463_v40  ;;  %v4751_v25 = vmul.f32 %v4471_v2, %v11464_v31  ;;  %4630 = vperm.xlu0 %6372, %v4186_v30  }
 0x4a5   :  { %v6666_v56 = vpop.eup %6665 }
 0x4a6   :  { %v5470_v46 = vadd.f32 %v9383_v33, %v4750_v20  ;;  %v5471_v60 = vadd.f32 %v9383_v33, %v4751_v25  ;;  %v4187_v17 = vmul.f32 %v6666_v56, %v3917_v62  ;;  %v4907_v33 = vld [vmem:[%s10673_s3 + $0x2c8] sm:$0xff]  ;;  %v11480_v62 = vld [vmem:[#allocation86_spill] sm:$0xff]  ;;  %v11481_v20 = vld [vmem:[#allocation201_spill] sm:$0xff] }
 0x4a7   :  { %v4476_v15 = vpop.permute.xlu1 %4475 }
 0x4a8   :  { %5650 = vst [vmem:[%s10675_s4 + $0x380] sm:$0xff] %v5470_v46  ;;  %5651 = vst.msk [vmem:[%s10675_s4 + $0x388] sm:$0xff] %vm1051_vm0, %v5471_v60  ;;  %v4752_v10 = vmul.f32 %v4476_v15, %v11465_v54  ;;  %v4753_v19 = vmul.f32 %v4476_v15, %v11466_v35  ;;  %5350 = vperm.xlu0 %6372, %v4906_v37   ;;  %4635 = vperm.xlu1 %6373, %v4187_v17   ;;  %v11483_v46 = vld [vmem:[#allocation90_spill] sm:$0xff]  ;;  %v11485_v35 = vld [vmem:[#allocation92_spill] sm:$0xff] }
 0x4a9   :  { %v11484_v17 = vld [vmem:[#allocation202_spill] sm:$0xff] }
 0x4aa   :  { %v5472_v50 = vadd.f32 %v9393_v0, %v4752_v10  ;;  %v5473_v38 = vadd.f32 %v9393_v0, %v4753_v19 }
 0x4ab   :  { %v4481_v43 = vpop.permute.xlu0 %4480 }
 0x4ac   :  { %5652 = vst [vmem:[%s10675_s4 + $0x390] sm:$0xff] %v5472_v50  ;;  %5653 = vst.msk [vmem:[%s10675_s4 + $0x398] sm:$0xff] %vm1051_vm0, %v5473_v38  ;;  %v4754_v22 = vmul.f32 %v4481_v43, %v11467_v52  ;;  %v4755_v32 = vmul.f32 %v4481_v43, %v11468_v23  ;;  %5355 = vperm.xlu1 %6373, %v4907_v33   ;;  %v11486_v33 = vld [vmem:[#allocation166_spill] sm:$0xff]  ;;  %v11487_v38 = vld [vmem:[#allocation203_spill] sm:$0xff] }
 0x4ad   :  { %v11488_v23 = vld [vmem:[#allocation95_spill] sm:$0xff] }
 0x4ae   :  { %v5474_v21 = vadd.f32 %v9395_v51, %v4754_v22  ;;  %v5475_v63 = vadd.f32 %v9395_v51, %v4755_v32  ;;  %v11471_v51 = vld [vmem:[#allocation74_spill] sm:$0xff] }
 0x4af   :  { %v4486_v0 = vpop.permute.xlu1 %4485 }
 0x4b0   :  { %5654 = vst [vmem:[%s10675_s4 + $0x3a0] sm:$0xff] %v5474_v21  ;;  %5655 = vst.msk [vmem:[%s10675_s4 + $0x3a8] sm:$0xff] %vm1051_vm0, %v5475_v63  ;;  %v4756_v7 = vmul.f32 %v4486_v0, %v11469_v18  ;;  %v4757_v44 = vmul.f32 %v4486_v0, %v11470_v4  ;;  %v11489_v21 = vld [vmem:[#allocation97_spill] sm:$0xff]  ;;  %v11490_v0 = vld [vmem:[#allocation204_spill] sm:$0xff] }
 0x4b2   :  { %v5476_v1 = vadd.f32 %v9405_v14, %v4756_v7  ;;  %v5477_v57 = vadd.f32 %v9405_v14, %v4757_v44  ;;  %v11473_v14 = vld [vmem:[#allocation76_spill] sm:$0xff]  ;;  %v11491_v44 = vld [vmem:[#allocation99_spill] sm:$0xff] }
 0x4b3   :  { %v4491_v29 = vpop.permute.xlu0 %4490 }
 0x4b4   :  { %5656 = vst [vmem:[%s10675_s4 + $0x3b0] sm:$0xff] %v5476_v1  ;;  %5657 = vst.msk [vmem:[%s10675_s4 + $0x3b8] sm:$0xff] %vm1051_vm0, %v5477_v57  ;;  %v4758_v8 = vmul.f32 %v4491_v29, %v11471_v51  ;;  %v4759_v12 = vmul.f32 %v4491_v29, %v11472_v53  ;;  %v11492_v57 = vld [vmem:[#allocation101_spill] sm:$0xff] }
 0x4b5   :  { %v11493_v51 = vld [vmem:[#allocation205_spill] sm:$0xff] }
 0x4b6   :  { %v5478_v34 = vadd.f32 %v9407_v59, %v4758_v8  ;;  %v5479_v6 = vadd.f32 %v9407_v59, %v4759_v12  ;;  %v11475_v59 = vld [vmem:[#allocation78_spill] sm:$0xff] }
 0x4b7   :  { %v4496_v27 = vpop.permute.xlu1 %4495 }
 0x4b8   :  { %5658 = vst [vmem:[%s10675_s4 + $0x3c0] sm:$0xff] %v5478_v34  ;;  %5659 = vst.msk [vmem:[%s10675_s4 + $0x3c8] sm:$0xff] %vm1051_vm0, %v5479_v6  ;;  %v4760_v26 = vmul.f32 %v4496_v27, %v11473_v14  ;;  %v4761_v45 = vmul.f32 %v4496_v27, %v11474_v55  ;;  %v11494_v34 = vld [vmem:[#allocation103_spill] sm:$0xff]  ;;  %v11495_v27 = vld [vmem:[#allocation105_spill] sm:$0xff] }
 0x4ba   :  { %v5480_v13 = vadd.f32 %v9415_v36, %v4760_v26  ;;  %v5481_v9 = vadd.f32 %v9415_v36, %v4761_v45  ;;  %v11477_v36 = vld [vmem:[#allocation80_spill] sm:$0xff]  ;;  %v11496_v26 = vld [vmem:[#allocation206_spill] sm:$0xff] }
 0x4bb   :  { %v4501_v41 = vpop.permute.xlu0 %4500 }
 0x4bc   :  { %5660 = vst [vmem:[%s10675_s4 + $0x3d0] sm:$0xff] %v5480_v13  ;;  %5661 = vst.msk [vmem:[%s10675_s4 + $0x3d8] sm:$0xff] %vm1051_vm0, %v5481_v9  ;;  %v4762_v16 = vmul.f32 %v4501_v41, %v11475_v59  ;;  %v4763_v3 = vmul.f32 %v4501_v41, %v11476_v58  ;;  %v11497_v9 = vld [vmem:[#allocation107_spill] sm:$0xff]  ;;  %v11498_v59 = vld [vmem:[#allocation109_spill] sm:$0xff] }
 0x4bd   :  { %v11499_v58 = vld [vmem:[#allocation207_spill] sm:$0xff] }
 0x4be   :  { %v5482_v39 = vadd.f32 %v9417_v42, %v4762_v16  ;;  %v5483_v61 = vadd.f32 %v9417_v42, %v4763_v3  ;;  %v11479_v42 = vld [vmem:[#allocation85_spill] sm:$0xff] }
 0x4bf   :  { %v4506_v47 = vpop.permute.xlu1 %4505 }
 0x4c0   :  { %5662 = vst [vmem:[%s10675_s4 + $0x3e0] sm:$0xff] %v5482_v39  ;;  %5663 = vst.msk [vmem:[%s10675_s4 + $0x3e8] sm:$0xff] %vm1051_vm0, %v5483_v61  ;;  %v4764_v11 = vmul.f32 %v4506_v47, %v11477_v36  ;;  %v4765_v24 = vmul.f32 %v4506_v47, %v11478_v28  ;;  %v11500_v47 = vld [vmem:[#allocation111_spill] sm:$0xff] }
 0x4c2   :  { %v5484_v48 = vadd.f32 %v9425_v5, %v4764_v11  ;;  %v5485_v49 = vadd.f32 %v9425_v5, %v4765_v24  ;;  %v11482_v5 = vld [vmem:[#allocation88_spill] sm:$0xff]  ;;  %v11501_v11 = vld [vmem:[#allocation113_spill] sm:$0xff] }
 0x4c3   :  { %v4511_v30 = vpop.permute.xlu0 %4510  ;;  %v11502_v24 = vld [vmem:[#allocation208_spill] sm:$0xff] }
 0x4c4   :  { %5664 = vst [vmem:[%s10675_s4 + $0x3f0] sm:$0xff] %v5484_v48  ;;  %5665 = vst.msk [vmem:[%s10675_s4 + $0x3f8] sm:$0xff] %vm1051_vm0, %v5485_v49  ;;  %v4766_v2 = vmul.f32 %v4511_v30, %v11479_v42  ;;  %v4767_v40 = vmul.f32 %v4511_v30, %v11480_v62  ;;  %v11503_v42 = vld [vmem:[#allocation115_spill] sm:$0xff]  ;;  %v11504_v62 = vld [vmem:[#allocation117_spill] sm:$0xff] }
 0x4c6   :  { %v5486_v31 = vadd.f32 %v11481_v20, %v4766_v2  ;;  %v5487_v25 = vadd.f32 %v11481_v20, %v4767_v40  ;;  %v11505_v20 = vld [vmem:[#allocation209_spill] sm:$0xff] }
 0x4c7   :  { %v4516_v56 = vpop.permute.xlu1 %4515 }
 0x4c8   :  { %5666 = vst [vmem:[%s10675_s4 + $0x400] sm:$0xff] %v5486_v31  ;;  %5667 = vst.msk [vmem:[%s10675_s4 + $0x408] sm:$0xff] %vm1051_vm0, %v5487_v25  ;;  %v4768_v37 = vmul.f32 %v4516_v56, %v11482_v5  ;;  %v4769_v60 = vmul.f32 %v4516_v56, %v11483_v46  ;;  %v11506_v5 = vld [vmem:[#allocation119_spill] sm:$0xff]  ;;  %v11507_v46 = vld [vmem:[#allocation121_spill] sm:$0xff] }
 0x4ca   :  { %v5488_v15 = vadd.f32 %v11484_v17, %v4768_v37  ;;  %v5489_v54 = vadd.f32 %v11484_v17, %v4769_v60  ;;  %v11508_v17 = vld [vmem:[#allocation210_spill] sm:$0xff] }
 0x4cb   :  { %v4521_v10 = vpop.permute.xlu0 %4520 }
 0x4cc   :  { %5668 = vst [vmem:[%s10675_s4 + $0x410] sm:$0xff] %v5488_v15  ;;  %5669 = vst.msk [vmem:[%s10675_s4 + $0x418] sm:$0xff] %vm1051_vm0, %v5489_v54  ;;  %v4770_v19 = vmul.f32 %v4521_v10, %v11485_v35  ;;  %v4771_v50 = vmul.f32 %v4521_v10, %v11486_v33  ;;  %v11509_v35 = vld [vmem:[#allocation123_spill] sm:$0xff]  ;;  %v11510_v33 = vld [vmem:[#allocation125_spill] sm:$0xff] }
 0x4ce   :  { %v5490_v43 = vadd.f32 %v11487_v38, %v4770_v19  ;;  %v5491_v52 = vadd.f32 %v11487_v38, %v4771_v50  ;;  %v11511_v38 = vld [vmem:[#allocation211_spill] sm:$0xff] }
 0x4cf   :  { %v4526_v22 = vpop.permute.xlu1 %4525 }
 0x4d0   :  { %5670 = vst [vmem:[%s10675_s4 + $0x420] sm:$0xff] %v5490_v43  ;;  %5671 = vst.msk [vmem:[%s10675_s4 + $0x428] sm:$0xff] %vm1051_vm0, %v5491_v52  ;;  %v4772_v32 = vmul.f32 %v4526_v22, %v11488_v23  ;;  %v4773_v63 = vmul.f32 %v4526_v22, %v11489_v21  ;;  %v11512_v23 = vld [vmem:[#allocation175_spill] sm:$0xff]  ;;  %v11513_v21 = vld [vmem:[#allocation174_spill] sm:$0xff] }
 0x4d2   :  { %v5492_v18 = vadd.f32 %v11490_v0, %v4772_v32  ;;  %v5493_v7 = vadd.f32 %v11490_v0, %v4773_v63  ;;  %v11514_v0 = vld [vmem:[#allocation212_spill] sm:$0xff] }
 0x4d3   :  { %v4531_v4 = vpop.permute.xlu0 %4530 }
 0x4d4   :  { %5672 = vst [vmem:[%s10675_s4 + $0x430] sm:$0xff] %v5492_v18  ;;  %5673 = vst.msk [vmem:[%s10675_s4 + $0x438] sm:$0xff] %vm1051_vm0, %v5493_v7  ;;  %v4774_v1 = vmul.f32 %v4531_v4, %v11491_v44  ;;  %v4775_v29 = vmul.f32 %v4531_v4, %v11492_v57  ;;  %v11515_v44 = vld [vmem:[#allocation178_spill] sm:$0xff]  ;;  %v11516_v57 = vld [vmem:[#allocation177_spill] sm:$0xff] }
 0x4d6   :  { %v5494_v8 = vadd.f32 %v11493_v51, %v4774_v1  ;;  %v5495_v53 = vadd.f32 %v11493_v51, %v4775_v29  ;;  %v11517_v51 = vld [vmem:[#allocation213_spill] sm:$0xff] }
 0x4d7   :  { %v4536_v12 = vpop.permute.xlu1 %4535 }
 0x4d8   :  { %5674 = vst [vmem:[%s10675_s4 + $0x440] sm:$0xff] %v5494_v8  ;;  %5675 = vst.msk [vmem:[%s10675_s4 + $0x448] sm:$0xff] %vm1051_vm0, %v5495_v53  ;;  %v4776_v6 = vmul.f32 %v4536_v12, %v11494_v34  ;;  %v4777_v14 = vmul.f32 %v4536_v12, %v11495_v27  ;;  %v11518_v34 = vld [vmem:[#allocation180_spill] sm:$0xff]  ;;  %v11519_v27 = vld [vmem:[#allocation179_spill] sm:$0xff] }
 0x4da   :  { %v5496_v55 = vadd.f32 %v11496_v26, %v4776_v6  ;;  %v5497_v45 = vadd.f32 %v11496_v26, %v4777_v14  ;;  %v11520_v26 = vld [vmem:[#allocation214_spill] sm:$0xff] }
 0x4db   :  { %v4541_v13 = vpop.permute.xlu0 %4540 }
 0x4dc   :  { %5676 = vst [vmem:[%s10675_s4 + $0x450] sm:$0xff] %v5496_v55  ;;  %5677 = vst.msk [vmem:[%s10675_s4 + $0x458] sm:$0xff] %vm1051_vm0, %v5497_v45  ;;  %v4778_v41 = vmul.f32 %v4541_v13, %v11497_v9  ;;  %v4779_v16 = vmul.f32 %v4541_v13, %v11498_v59  ;;  %v11521_v9 = vld [vmem:[#allocation182_spill] sm:$0xff]  ;;  %v11522_v59 = vld [vmem:[#allocation181_spill] sm:$0xff] }
 0x4de   :  { %v5498_v3 = vadd.f32 %v11499_v58, %v4778_v41  ;;  %v5499_v39 = vadd.f32 %v11499_v58, %v4779_v16  ;;  %v11523_v58 = vld [vmem:[#allocation215_spill] sm:$0xff] }
 0x4df   :  { %v4546_v61 = vpop.permute.xlu1 %4545 }
 0x4e0   :  { %5678 = vst [vmem:[%s10675_s4 + $0x460] sm:$0xff] %v5498_v3  ;;  %5679 = vst.msk [vmem:[%s10675_s4 + $0x468] sm:$0xff] %vm1051_vm0, %v5499_v39  ;;  %v4780_v36 = vmul.f32 %v4546_v61, %v11500_v47  ;;  %v4781_v28 = vmul.f32 %v4546_v61, %v11501_v11  ;;  %v11524_v47 = vld [vmem:[#allocation184_spill] sm:$0xff]  ;;  %v11525_v11 = vld [vmem:[#allocation183_spill] sm:$0xff] }
 0x4e2   :  { %v5500_v48 = vadd.f32 %v11502_v24, %v4780_v36  ;;  %v5501_v49 = vadd.f32 %v11502_v24, %v4781_v28  ;;  %v11526_v24 = vld [vmem:[#allocation216_spill] sm:$0xff] }
 0x4e3   :  { %v4551_v30 = vpop.permute.xlu0 %4550 }
 0x4e4   :  { %5680 = vst [vmem:[%s10675_s4 + $0x470] sm:$0xff] %v5500_v48  ;;  %5681 = vst.msk [vmem:[%s10675_s4 + $0x478] sm:$0xff] %vm1051_vm0, %v5501_v49  ;;  %v4782_v2 = vmul.f32 %v4551_v30, %v11503_v42  ;;  %v4783_v40 = vmul.f32 %v4551_v30, %v11504_v62  ;;  %v11527_v42 = vld [vmem:[#allocation186_spill] sm:$0xff]  ;;  %v11528_v62 = vld [vmem:[#allocation185_spill] sm:$0xff] }
 0x4e6   :  { %v5502_v31 = vadd.f32 %v11505_v20, %v4782_v2  ;;  %v5503_v25 = vadd.f32 %v11505_v20, %v4783_v40  ;;  %v11529_v20 = vld [vmem:[#allocation217_spill] sm:$0xff] }
 0x4e7   :  { %v4556_v56 = vpop.permute.xlu1 %4555 }
 0x4e8   :  { %5682 = vst [vmem:[%s10675_s4 + $0x480] sm:$0xff] %v5502_v31  ;;  %5683 = vst.msk [vmem:[%s10675_s4 + $0x488] sm:$0xff] %vm1051_vm0, %v5503_v25  ;;  %v4784_v37 = vmul.f32 %v4556_v56, %v11506_v5  ;;  %v4785_v60 = vmul.f32 %v4556_v56, %v11507_v46  ;;  %v11530_v5 = vld [vmem:[#allocation188_spill] sm:$0xff]  ;;  %v11531_v46 = vld [vmem:[#allocation187_spill] sm:$0xff] }
 0x4ea   :  { %v5504_v15 = vadd.f32 %v11508_v17, %v4784_v37  ;;  %v5505_v54 = vadd.f32 %v11508_v17, %v4785_v60  ;;  %v11532_v17 = vld [vmem:[#allocation218_spill] sm:$0xff] }
 0x4eb   :  { %v4561_v10 = vpop.permute.xlu0 %4560 }
 0x4ec   :  { %5684 = vst [vmem:[%s10675_s4 + $0x490] sm:$0xff] %v5504_v15  ;;  %5685 = vst.msk [vmem:[%s10675_s4 + $0x498] sm:$0xff] %vm1051_vm0, %v5505_v54  ;;  %v4786_v19 = vmul.f32 %v4561_v10, %v11509_v35  ;;  %v4787_v50 = vmul.f32 %v4561_v10, %v11510_v33  ;;  %v11533_v35 = vld [vmem:[#allocation190_spill] sm:$0xff]  ;;  %v11534_v33 = vld [vmem:[#allocation189_spill] sm:$0xff] }
 0x4ee   :  { %v5506_v43 = vadd.f32 %v11511_v38, %v4786_v19  ;;  %v5507_v52 = vadd.f32 %v11511_v38, %v4787_v50  ;;  %v11535_v38 = vld [vmem:[#allocation219_spill] sm:$0xff] }
 0x4f0   :  { %v4566_v22 = vpop.permute.xlu1 %4565  ;;  %5686 = vst [vmem:[%s10675_s4 + $0x4a0] sm:$0xff] %v5506_v43  ;;  %5687 = vst.msk [vmem:[%s10675_s4 + $0x4a8] sm:$0xff] %vm1051_vm0, %v5507_v52 }
 0x4f1   :  { %v4788_v32 = vmul.f32 %v4566_v22, %v11512_v23  ;;  %v4789_v63 = vmul.f32 %v4566_v22, %v11513_v21  ;;  %v11536_v23 = vld [vmem:[#allocation192_spill] sm:$0xff]  ;;  %v11537_v21 = vld [vmem:[#allocation191_spill] sm:$0xff] }
 0x4f3   :  { %v5508_v18 = vadd.f32 %v11514_v0, %v4788_v32  ;;  %v5509_v7 = vadd.f32 %v11514_v0, %v4789_v63  ;;  %v4571_v4 = vpop.permute.xlu0 %4570  ;;  %v11538_v0 = vld [vmem:[#allocation220_spill] sm:$0xff] }
 0x4f4   :  { %v4790_v1 = vmul.f32 %v4571_v4, %v11515_v44  ;;  %v4791_v29 = vmul.f32 %v4571_v4, %v11516_v57  ;;  %v11539_v44 = vld [vmem:[#allocation194_spill] sm:$0xff]  ;;  %v11540_v57 = vld [vmem:[#allocation193_spill] sm:$0xff] }
 0x4f5   :  { %5688 = vst [vmem:[%s10675_s4 + $0x4b0] sm:$0xff] %v5508_v18  ;;  %5689 = vst.msk [vmem:[%s10675_s4 + $0x4b8] sm:$0xff] %vm1051_vm0, %v5509_v7 }
 0x4f6   :  { %v5510_v8 = vadd.f32 %v11517_v51, %v4790_v1  ;;  %v5511_v53 = vadd.f32 %v11517_v51, %v4791_v29  ;;  %v11541_v51 = vld [vmem:[#allocation221_spill] sm:$0xff] }
 0x4f8   :  { %v4576_v12 = vpop.permute.xlu1 %4575  ;;  %5690 = vst [vmem:[%s10675_s4 + $0x4c0] sm:$0xff] %v5510_v8  ;;  %5691 = vst.msk [vmem:[%s10675_s4 + $0x4c8] sm:$0xff] %vm1051_vm0, %v5511_v53 }
 0x4f9   :  { %v4792_v6 = vmul.f32 %v4576_v12, %v11518_v34  ;;  %v4793_v14 = vmul.f32 %v4576_v12, %v11519_v27  ;;  %v11542_v34 = vld [vmem:[#allocation196_spill] sm:$0xff]  ;;  %v11543_v27 = vld [vmem:[#allocation195_spill] sm:$0xff] }
 0x4fb   :  { %v5512_v55 = vadd.f32 %v11520_v26, %v4792_v6  ;;  %v5513_v45 = vadd.f32 %v11520_v26, %v4793_v14  ;;  %v4581_v13 = vpop.permute.xlu0 %4580  ;;  %v11544_v26 = vld [vmem:[#allocation222_spill] sm:$0xff] }
 0x4fc   :  { %v4794_v41 = vmul.f32 %v4581_v13, %v11521_v9  ;;  %v4795_v16 = vmul.f32 %v4581_v13, %v11522_v59  ;;  %v11545_v9 = vld [vmem:[#allocation198_spill] sm:$0xff]  ;;  %v11546_v59 = vld [vmem:[#allocation197_spill] sm:$0xff] }
 0x4fd   :  { %5692 = vst [vmem:[%s10675_s4 + $0x4d0] sm:$0xff] %v5512_v55  ;;  %5693 = vst.msk [vmem:[%s10675_s4 + $0x4d8] sm:$0xff] %vm1051_vm0, %v5513_v45 }
 0x4fe   :  { %v5514_v3 = vadd.f32 %v11523_v58, %v4794_v41  ;;  %v5515_v39 = vadd.f32 %v11523_v58, %v4795_v16  ;;  %v11547_v58 = vld [vmem:[#allocation223_spill] sm:$0xff] }
 0x500   :  { %v4586_v61 = vpop.permute.xlu1 %4585  ;;  %5694 = vst [vmem:[%s10675_s4 + $0x4e0] sm:$0xff] %v5514_v3  ;;  %5695 = vst.msk [vmem:[%s10675_s4 + $0x4e8] sm:$0xff] %vm1051_vm0, %v5515_v39 }
 0x501   :  { %v4796_v36 = vmul.f32 %v4586_v61, %v11524_v47  ;;  %v4797_v28 = vmul.f32 %v4586_v61, %v11525_v11  ;;  %v11548_v47 = vld [vmem:[#allocation151_spill] sm:$0xff] }
 0x502   :  { %v11549_v11 = vld [vmem:[#allocation199_spill] sm:$0xff] }
 0x503   :  { %v5516_v48 = vadd.f32 %v11526_v24, %v4796_v36  ;;  %v5517_v49 = vadd.f32 %v11526_v24, %v4797_v28  ;;  %v4591_v30 = vpop.permute.xlu0 %4590  ;;  %v11550_v24 = vld [vmem:[#allocation224_spill] sm:$0xff] }
 0x504   :  { %v4798_v2 = vmul.f32 %v4591_v30, %v11527_v42  ;;  %v4799_v40 = vmul.f32 %v4591_v30, %v11528_v62  ;;  %v11551_v42 = vld [vmem:[#allocation152_spill] sm:$0xff]  ;;  %v11552_v62 = vld [vmem:[#allocation153_spill] sm:$0xff] }
 0x505   :  { %5696 = vst [vmem:[%s10675_s4 + $0x4f0] sm:$0xff] %v5516_v48  ;;  %5697 = vst.msk [vmem:[%s10675_s4 + $0x4f8] sm:$0xff] %vm1051_vm0, %v5517_v49 }
 0x506   :  { %v5518_v31 = vadd.f32 %v11529_v20, %v4798_v2  ;;  %v5519_v25 = vadd.f32 %v11529_v20, %v4799_v40 }
 0x508   :  { %v4596_v56 = vpop.permute.xlu1 %4595  ;;  %5698 = vst [vmem:[%s10675_s4 + $0x500] sm:$0xff] %v5518_v31  ;;  %5699 = vst.msk [vmem:[%s10675_s4 + $0x508] sm:$0xff] %vm1051_vm0, %v5519_v25 }
 0x509   :  { %v4800_v37 = vmul.f32 %v4596_v56, %v11530_v5  ;;  %v4801_v60 = vmul.f32 %v4596_v56, %v11531_v46  ;;  %v11553_v5 = vld [vmem:[#allocation154_spill] sm:$0xff]  ;;  %v11554_v46 = vld [vmem:[#allocation200_spill] sm:$0xff] }
 0x50b   :  { %v5520_v15 = vadd.f32 %v11532_v17, %v4800_v37  ;;  %v5521_v54 = vadd.f32 %v11532_v17, %v4801_v60  ;;  %v4601_v10 = vpop.permute.xlu0 %4600 }
 0x50c   :  { %v4802_v19 = vmul.f32 %v4601_v10, %v11533_v35  ;;  %v4803_v50 = vmul.f32 %v4601_v10, %v11534_v33 }
 0x50d   :  { %5700 = vst [vmem:[%s10675_s4 + $0x510] sm:$0xff] %v5520_v15  ;;  %5701 = vst.msk [vmem:[%s10675_s4 + $0x518] sm:$0xff] %vm1051_vm0, %v5521_v54 }
 0x50e   :  { %v5522_v43 = vadd.f32 %v11535_v38, %v4802_v19  ;;  %v5523_v52 = vadd.f32 %v11535_v38, %v4803_v50 }
 0x510   :  { %v4606_v22 = vpop.permute.xlu1 %4605  ;;  %5702 = vst [vmem:[%s10675_s4 + $0x520] sm:$0xff] %v5522_v43  ;;  %5703 = vst.msk [vmem:[%s10675_s4 + $0x528] sm:$0xff] %vm1051_vm0, %v5523_v52 }
 0x511   :  { %v4804_v32 = vmul.f32 %v4606_v22, %v11536_v23  ;;  %v4805_v63 = vmul.f32 %v4606_v22, %v11537_v21 }
 0x513   :  { %v5524_v18 = vadd.f32 %v11538_v0, %v4804_v32  ;;  %v5525_v7 = vadd.f32 %v11538_v0, %v4805_v63  ;;  %v4611_v4 = vpop.permute.xlu0 %4610 }
 0x514   :  { %v4806_v1 = vmul.f32 %v4611_v4, %v11539_v44  ;;  %v4807_v29 = vmul.f32 %v4611_v4, %v11540_v57 }
 0x515   :  { %5704 = vst [vmem:[%s10675_s4 + $0x530] sm:$0xff] %v5524_v18  ;;  %5705 = vst.msk [vmem:[%s10675_s4 + $0x538] sm:$0xff] %vm1051_vm0, %v5525_v7 }
 0x516   :  { %v5526_v8 = vadd.f32 %v11541_v51, %v4806_v1  ;;  %v5527_v53 = vadd.f32 %v11541_v51, %v4807_v29 }
 0x518   :  { %v4616_v12 = vpop.permute.xlu1 %4615  ;;  %5706 = vst [vmem:[%s10675_s4 + $0x540] sm:$0xff] %v5526_v8  ;;  %5707 = vst.msk [vmem:[%s10675_s4 + $0x548] sm:$0xff] %vm1051_vm0, %v5527_v53 }
 0x519   :  { %v4808_v6 = vmul.f32 %v4616_v12, %v11542_v34  ;;  %v4809_v14 = vmul.f32 %v4616_v12, %v11543_v27 }
 0x51b   :  { %v5528_v55 = vadd.f32 %v11544_v26, %v4808_v6  ;;  %v5529_v45 = vadd.f32 %v11544_v26, %v4809_v14  ;;  %v4621_v13 = vpop.permute.xlu0 %4620 }
 0x51c   :  { %v4810_v41 = vmul.f32 %v4621_v13, %v11545_v9  ;;  %v4811_v16 = vmul.f32 %v4621_v13, %v11546_v59 }
 0x51d   :  { %5708 = vst [vmem:[%s10675_s4 + $0x550] sm:$0xff] %v5528_v55  ;;  %5709 = vst.msk [vmem:[%s10675_s4 + $0x558] sm:$0xff] %vm1051_vm0, %v5529_v45 }
 0x51e   :  { %v5530_v3 = vadd.f32 %v11547_v58, %v4810_v41  ;;  %v5531_v39 = vadd.f32 %v11547_v58, %v4811_v16 }
 0x520   :  { %v4626_v61 = vpop.permute.xlu1 %4625  ;;  %5710 = vst [vmem:[%s10675_s4 + $0x560] sm:$0xff] %v5530_v3  ;;  %5711 = vst.msk [vmem:[%s10675_s4 + $0x568] sm:$0xff] %vm1051_vm0, %v5531_v39 }
 0x521   :  { %v4812_v36 = vmul.f32 %v4626_v61, %v11548_v47  ;;  %v4813_v28 = vmul.f32 %v4626_v61, %v11549_v11 }
 0x523   :  { %v5532_v48 = vadd.f32 %v11550_v24, %v4812_v36  ;;  %v5533_v49 = vadd.f32 %v11550_v24, %v4813_v28  ;;  %v4631_v30 = vpop.permute.xlu0 %4630 }
 0x524   :  { %v4814_v2 = vmul.f32 %v4631_v30, %v11551_v42  ;;  %v4815_v40 = vmul.f32 %v4631_v30, %v11552_v62 }
 0x525   :  { %5712 = vst [vmem:[%s10675_s4 + $0x570] sm:$0xff] %v5532_v48  ;;  %5713 = vst.msk [vmem:[%s10675_s4 + $0x578] sm:$0xff] %vm1051_vm0, %v5533_v49 }
 0x527   :  { %v5351_v20 = vpop.permute.xlu0 %5350  ;;  %v4636_v31 = vpop.permute.xlu1 %4635 }
 0x528   :  { %v5534_v25 = vadd.f32 %v5351_v20, %v4814_v2  ;;  %v5535_v56 = vadd.f32 %v5351_v20, %v4815_v40  ;;  %v4816_v37 = vmul.f32 %v4636_v31, %v11553_v5  ;;  %v4817_v60 = vmul.f32 %v4636_v31, %v11554_v46 }
 0x52a   :  { %5714 = vst [vmem:[%s10675_s4 + $0x580] sm:$0xff] %v5534_v25  ;;  %5715 = vst.msk [vmem:[%s10675_s4 + $0x588] sm:$0xff] %vm1051_vm0, %v5535_v56 }
 0x52b   :  { %v5356_v17 = vpop.permute.xlu1 %5355 }
 0x52c   :  { %v5536_v15 = vadd.f32 %v5356_v17, %v4816_v37  ;;  %v5537_v54 = vadd.f32 %v5356_v17, %v4817_v60 }
 0x52e   :  { %5716 = vst [vmem:[%s10675_s4 + $0x590] sm:$0xff] %v5536_v15  ;;  %5717 = vst.msk [vmem:[%s10675_s4 + $0x598] sm:$0xff] %vm1051_vm0, %v5537_v54 }

</bundles_post_ra>
